<compile_context>
chip_gen: v5e
topology: v5e:2x2
jax: 0.10.0
libtpu: 0.0.40
codegen_flags: <defaults>
</compile_context>

<pallas_src>
import functools

import numpy as np
import jax
import jax.numpy as jnp
from jax.experimental import pallas as pl
from jax.experimental.pallas import tpu as pltpu


# Polyphase tap structure of ConvTranspose2d(k=7, stride=2, pad=3) applied to a
# nearest x2-upsampled input.  Output row oh = 4*m + rh reads original-input
# rows m + delta (delta in {-1, 0, +1}); ConvTranspose taps kh that land on the
# same original row fold together (their weights add).  Derived from
# oh = ih*2 - 3 + kh with ih = 2*i or 2*i + 1 (nearest upsample).
_PHASE_TAPS = (
    ((0, (1, 3)), (-1, (5,))),                 # rh = 0
    ((1, (0,)), (0, (2, 4)), (-1, (6,))),      # rh = 1
    ((1, (1,)), (0, (3, 5))),                  # rh = 2
    ((1, (0, 2)), (0, (4, 6))),                # rh = 3
)
_K = 7


def _phase_matrix():
    """M[r, d, k] = 1 if ConvTranspose tap k contributes to phase r at delta = d - 1."""
    M = np.zeros((4, 3, _K), np.float32)
    for r, taps in enumerate(_PHASE_TAPS):
        for delta, ks in taps:
            for k in ks:
                M[r, delta + 1, k] = 1.0
    return M


def _row_phases_per_step():
    """4 row-phases per grid step on single-TensorCore chips, 2 on v7x (2 TCs/chip)."""
    try:
        kind = jax.devices()[0].device_kind.lower()
    except Exception:
        kind = ""
    return 2 if "v7" in kind else 4


def _outlayer_kernel(w_ref, b_ref, x_ref, o_ref, *, N, Cin, Cout, H, W, P):
    """Computes P output row-phases per grid step.

    w_ref : VMEM (P, Cin*9, L)   folded polyphase weights; row = c*9 + dh*3 + dw,
                                 lane = o*4W + u*4 + rw (value constant over u)
    b_ref : VMEM (1, L)          bias replicated over the (u, rw) lanes of each o
    x_ref : VMEM (N, Cin, H+2, 4*(W+2))  zero-haloed input with every column
                                 repeated 4x along lanes, so a column-phase
                                 shift dw is a static 4*dw lane slice
    o_ref : VMEM (P, N, H, L)    lane = o*4W + u*4 + rw
    """
    W4 = 4 * W
    L = Cout * W4
    nsplit = 2 if P < 4 else 1              # extra ILP when few phases live per step
    accs = [[jnp.zeros((N, H, L), jnp.float32) for _ in range(nsplit)]
            for _ in range(P)]

    t = 0
    for c in range(Cin):
        for dh in range(3):
            # One row-window load per (cin, dh); the 3 dw shifts reuse it.
            rows = x_ref[:, c, dh:dh + H, :]                 # (N, H, 4*(W+2))
            for dw in range(3):
                win = rows[:, :, 4 * dw:4 * dw + W4]         # (N, H, 4W): lane = u*4 + rw
                # Replicate once over output channels; reused by ALL P phases.
                tap = jnp.concatenate([win] * Cout, axis=-1)  # (N, H, L)
                for p in range(P):
                    s = t % nsplit
                    accs[p][s] = accs[p][s] + tap * w_ref[p, t, :]
                t += 1

    for p in range(P):
        total = accs[p][0]
        for s in range(1, nsplit):
            total = total + accs[p][s]
        o_ref[p] = jax.nn.sigmoid(total + b_ref[...])


def outlayer_forward(x, w_convo, b_convo):
    """x: (N, Cin, H, W) f32; w_convo: (Cin, Cout, 7, 7) PyTorch ConvTranspose2d layout."""
    N, Cin, H, W = x.shape
    Cin2, Cout, K, K2 = w_convo.shape
    assert Cin == Cin2 and K == _K and K2 == _K
    Ho, Wo = 4 * H - 1, 4 * W - 1          # == (2H-1)*2 - 2*3 + 7
    W4 = 4 * W
    L = Cout * W4                          # lane width: o*4W + u*4 + rw

    # ---- weight folding (tiny, done once outside the kernel) ----
    M = jnp.asarray(_phase_matrix())                                  # (4, 3, 7)
    w_t = jnp.transpose(w_convo, (1, 0, 2, 3)).astype(jnp.float32)    # (Cout, Cin, kh, kw)
    # Gw[rh, rw, o, c, dh, dw] = sum_{kh in S(rh,dh), kw in S(rw,dw)} w[o, c, kh, kw]
    Gw = jnp.einsum('rik,sjl,ockl->rsocij', M, M, w_t)                # (4, 4, Cout, Cin, 3, 3)
    w_lane = jnp.transpose(Gw, (0, 3, 4, 5, 2, 1))                    # (rh, c, dh, dw, o, rw)
    w_lane = w_lane.reshape(4, Cin * 9, Cout, 1, 4)
    w_lane = jnp.broadcast_to(w_lane, (4, Cin * 9, Cout, W, 4)).reshape(4, Cin * 9, L)
    b_lane = jnp.repeat(b_convo.astype(jnp.float32), W4).reshape(1, L)

    # 1-pixel zero halo + 4x lane repeat of each column (tiny fused XLA prep op).
    # No 69x69 zero-inserted slab is ever materialized.
    x_pad = jnp.pad(x.astype(jnp.float32), ((0, 0), (0, 0), (1, 1), (1, 1)))
    x_prep = jnp.repeat(x_pad, 4, axis=-1)                            # (N, Cin, H+2, 4*(W+2))

    P = _row_phases_per_step()             # 4 -> grid=(1,), 2 -> grid=(2,) on v7x
    n_steps = 4 // P

    kernel = functools.partial(_outlayer_kernel, N=N, Cin=Cin, Cout=Cout, H=H, W=W, P=P)
    out_k = pl.pallas_call(
        kernel,
        out_shape=jax.ShapeDtypeStruct((4, N, H, L), jnp.float32),
        grid=(n_steps,),
        in_specs=[
            pl.BlockSpec((P, Cin * 9, L), lambda g: (g, 0, 0)),              # folded weights
            pl.BlockSpec((1, L), lambda g: (0, 0)),                          # bias lanes
            pl.BlockSpec((N, Cin, H + 2, 4 * (W + 2)), lambda g: (0, 0, 0, 0)),  # prepped input
        ],
        out_specs=pl.BlockSpec((P, N, H, L), lambda g: (g, 0, 0, 0)),
        compiler_params=pltpu.CompilerParams(
            dimension_semantics=("parallel",),   # lets v7x's 2 TCs split the phase steps
        ),
    )(w_lane, b_lane, x_prep)

    # De-interleave row phases; lane axis (ow = 4u + rw) stays minor throughout.
    y = out_k.reshape(4, N, H, Cout, W4)                 # (rh, n, m, o, ow)
    y = jnp.transpose(y, (1, 3, 2, 0, 4))                # (n, o, m, rh, ow)
    y = y.reshape(N, Cout, 4 * H, W4)                    # rows 4m + rh, cols 4u + rw
    return y[:, :, :Ho, :Wo]


if __name__ == "__main__":
    key = jax.random.PRNGKey(0)
    kx, kw, kb = jax.random.split(key, 3)

    N, Cin, Cout, H, W, K = 2, 4, 2, 16, 16, 7
    stride, pad = 2, 3

    x = jax.random.normal(kx, (N, Cin, H, W), jnp.float32)
    # PyTorch ConvTranspose2d weight layout: (in_channels, out_channels, kH, kW)
    w_convo = jax.random.normal(kw, (Cin, Cout, K, K), jnp.float32) * 0.1
    b_convo = jax.random.normal(kb, (Cout,), jnp.float32) * 0.1

    fwd = jax.jit(outlayer_forward)
    out = jax.block_until_ready(fwd(x, w_convo, b_convo))

    # ---- independent numpy reference of the PyTorch forward semantics ----
    xn = np.asarray(x, np.float64)
    wn = np.asarray(w_convo, np.float64)
    bn = np.asarray(b_convo, np.float64)

    x_up = np.repeat(np.repeat(xn, 2, axis=2), 2, axis=3)          # nearest upsample x2
    Hu = x_up.shape[2]
    Hf = (Hu - 1) * stride + K
    full = np.zeros((N, Cout, Hf, Hf), np.float64)
    for ih in range(Hu):                                           # direct ConvTranspose2d
        for iw in range(Hu):
            contrib = np.einsum("nc,cokl->nokl", x_up[:, :, ih, iw], wn)
            full[:, :, ih * stride:ih * stride + K, iw * stride:iw * stride + K] += contrib
    ref = full[:, :, pad:Hf - pad, pad:Hf - pad] + bn[None, :, None, None]
    ref = 1.0 / (1.0 + np.exp(-ref))                               # sigmoid

    assert out.shape == ref.shape, (out.shape, ref.shape)
    np.testing.assert_allclose(np.asarray(out), ref, rtol=2e-4, atol=2e-5)
    print("KERNEL_OK")
</pallas_src>

<mosaic_0001>
module attributes {stable_mosaic.version = 11 : i64} {
  func.func @_outlayer_kernel(%arg0: i32, %arg1: memref<4x36x128xf32, #tpu.memory_space<vmem>>, %arg2: memref<1x128xf32, #tpu.memory_space<vmem>>, %arg3: memref<2x4x18x72xf32, #tpu.memory_space<vmem>>, %arg4: memref<4x2x16x128xf32, #tpu.memory_space<vmem>>) attributes {dimension_semantics = [#tpu.dimension_semantics<parallel>], iteration_bounds = array<i64: 1>, scalar_prefetch = 0 : i64, scratch_operands = 0 : i64, tpu.core_type = #tpu.core_type<tc>, window_params = [{transform_indices = @transform_0, window_bounds = array<i64: 4, 36, 128>}, {pipeline_mode = #tpu.pipeline_mode<synchronous>, transform_indices = @transform_1, window_bounds = array<i64: 1, 128>}, {pipeline_mode = #tpu.pipeline_mode<synchronous>, transform_indices = @transform_2, window_bounds = array<i64: 2, 4, 18, 72>}, {transform_indices = @transform_3, window_bounds = array<i64: 4, 2, 16, 128>}]} {
    %cst = arith.constant 0.000000e+00 : f32
    %0 = vector.broadcast %cst : f32 to vector<2x16x128xf32>
    %cst_0 = arith.constant 0.000000e+00 : f32
    %1 = vector.broadcast %cst_0 : f32 to vector<2x16x128xf32>
    %cst_1 = arith.constant 0.000000e+00 : f32
    %2 = vector.broadcast %cst_1 : f32 to vector<2x16x128xf32>
    %cst_2 = arith.constant 0.000000e+00 : f32
    %3 = vector.broadcast %cst_2 : f32 to vector<2x16x128xf32>
    %c0 = arith.constant 0 : index
    %c0_3 = arith.constant 0 : index
    %c0_4 = arith.constant 0 : index
    %c0_5 = arith.constant 0 : index
    %4 = vector.load %arg3[%c0, %c0_3, %c0_4, %c0_5] : memref<2x4x18x72xf32, #tpu.memory_space<vmem>>, vector<2x1x16x72xf32>
    %5 = vector.shape_cast %4 : vector<2x1x16x72xf32> to vector<2x16x72xf32>
    %6 = vector.extract_strided_slice %5 {offsets = [0, 0, 0], sizes = [2, 16, 64], strides = [1, 1, 1]} : vector<2x16x72xf32> to vector<2x16x64xf32>
    %7 = tpu.concatenate %6, %6 in 2 : vector<2x16x64xf32>, vector<2x16x64xf32> -> vector<2x16x128xf32>
    %c0_6 = arith.constant 0 : index
    %c0_7 = arith.constant 0 : index
    %c0_8 = arith.constant 0 : index
    %8 = vector.load %arg1[%c0_6, %c0_7, %c0_8] : memref<4x36x128xf32, #tpu.memory_space<vmem>>, vector<1x1x128xf32>
    %9 = vector.shape_cast %8 : vector<1x1x128xf32> to vector<128xf32>
    %10 = vector.shape_cast %9 : vector<128xf32> to vector<1x1x128xf32>
    %11 = vector.broadcast %10 : vector<1x1x128xf32> to vector<2x16x128xf32>
    %12 = arith.mulf %7, %11 : vector<2x16x128xf32>
    %13 = arith.addf %0, %12 : vector<2x16x128xf32>
    %c1 = arith.constant 1 : index
    %c0_9 = arith.constant 0 : index
    %c0_10 = arith.constant 0 : index
    %14 = vector.load %arg1[%c1, %c0_9, %c0_10] : memref<4x36x128xf32, #tpu.memory_space<vmem>>, vector<1x1x128xf32>
    %15 = vector.shape_cast %14 : vector<1x1x128xf32> to vector<128xf32>
    %16 = vector.shape_cast %15 : vector<128xf32> to vector<1x1x128xf32>
    %17 = vector.broadcast %16 : vector<1x1x128xf32> to vector<2x16x128xf32>
    %18 = arith.mulf %7, %17 : vector<2x16x128xf32>
    %19 = arith.addf %1, %18 : vector<2x16x128xf32>
    %c2 = arith.constant 2 : index
    %c0_11 = arith.constant 0 : index
    %c0_12 = arith.constant 0 : index
    %20 = vector.load %arg1[%c2, %c0_11, %c0_12] : memref<4x36x128xf32, #tpu.memory_space<vmem>>, vector<1x1x128xf32>
    %21 = vector.shape_cast %20 : vector<1x1x128xf32> to vector<128xf32>
    %22 = vector.shape_cast %21 : vector<128xf32> to vector<1x1x128xf32>
    %23 = vector.broadcast %22 : vector<1x1x128xf32> to vector<2x16x128xf32>
    %24 = arith.mulf %7, %23 : vector<2x16x128xf32>
    %25 = arith.addf %2, %24 : vector<2x16x128xf32>
    %c3 = arith.constant 3 : index
    %c0_13 = arith.constant 0 : index
    %c0_14 = arith.constant 0 : index
    %26 = vector.load %arg1[%c3, %c0_13, %c0_14] : memref<4x36x128xf32, #tpu.memory_space<vmem>>, vector<1x1x128xf32>
    %27 = vector.shape_cast %26 : vector<1x1x128xf32> to vector<128xf32>
    %28 = vector.shape_cast %27 : vector<128xf32> to vector<1x1x128xf32>
    %29 = vector.broadcast %28 : vector<1x1x128xf32> to vector<2x16x128xf32>
    %30 = arith.mulf %7, %29 : vector<2x16x128xf32>
    %31 = arith.addf %3, %30 : vector<2x16x128xf32>
    %32 = vector.extract_strided_slice %5 {offsets = [0, 0, 4], sizes = [2, 16, 64], strides = [1, 1, 1]} : vector<2x16x72xf32> to vector<2x16x64xf32>
    %33 = tpu.concatenate %32, %32 in 2 : vector<2x16x64xf32>, vector<2x16x64xf32> -> vector<2x16x128xf32>
    %c0_15 = arith.constant 0 : index
    %c1_16 = arith.constant 1 : index
    %c0_17 = arith.constant 0 : index
    %34 = vector.load %arg1[%c0_15, %c1_16, %c0_17] : memref<4x36x128xf32, #tpu.memory_space<vmem>>, vector<1x1x128xf32>
    %35 = vector.shape_cast %34 : vector<1x1x128xf32> to vector<128xf32>
    %36 = vector.shape_cast %35 : vector<128xf32> to vector<1x1x128xf32>
    %37 = vector.broadcast %36 : vector<1x1x128xf32> to vector<2x16x128xf32>
    %38 = arith.mulf %33, %37 : vector<2x16x128xf32>
    %39 = arith.addf %13, %38 : vector<2x16x128xf32>
    %c1_18 = arith.constant 1 : index
    %c1_19 = arith.constant 1 : index
    %c0_20 = arith.constant 0 : index
    %40 = vector.load %arg1[%c1_18, %c1_19, %c0_20] : memref<4x36x128xf32, #tpu.memory_space<vmem>>, vector<1x1x128xf32>
    %41 = vector.shape_cast %40 : vector<1x1x128xf32> to vector<128xf32>
    %42 = vector.shape_cast %41 : vector<128xf32> to vector<1x1x128xf32>
    %43 = vector.broadcast %42 : vector<1x1x128xf32> to vector<2x16x128xf32>
    %44 = arith.mulf %33, %43 : vector<2x16x128xf32>
    %45 = arith.addf %19, %44 : vector<2x16x128xf32>
    %c2_21 = arith.constant 2 : index
    %c1_22 = arith.constant 1 : index
    %c0_23 = arith.constant 0 : index
    %46 = vector.load %arg1[%c2_21, %c1_22, %c0_23] : memref<4x36x128xf32, #tpu.memory_space<vmem>>, vector<1x1x128xf32>
    %47 = vector.shape_cast %46 : vector<1x1x128xf32> to vector<128xf32>
    %48 = vector.shape_cast %47 : vector<128xf32> to vector<1x1x128xf32>
    %49 = vector.broadcast %48 : vector<1x1x128xf32> to vector<2x16x128xf32>
    %50 = arith.mulf %33, %49 : vector<2x16x128xf32>
    %51 = arith.addf %25, %50 : vector<2x16x128xf32>
    %c3_24 = arith.constant 3 : index
    %c1_25 = arith.constant 1 : index
    %c0_26 = arith.constant 0 : index
    %52 = vector.load %arg1[%c3_24, %c1_25, %c0_26] : memref<4x36x128xf32, #tpu.memory_space<vmem>>, vector<1x1x128xf32>
    %53 = vector.shape_cast %52 : vector<1x1x128xf32> to vector<128xf32>
    %54 = vector.shape_cast %53 : vector<128xf32> to vector<1x1x128xf32>
    %55 = vector.broadcast %54 : vector<1x1x128xf32> to vector<2x16x128xf32>
    %56 = arith.mulf %33, %55 : vector<2x16x128xf32>
    %57 = arith.addf %31, %56 : vector<2x16x128xf32>
    %58 = vector.extract_strided_slice %5 {offsets = [0, 0, 8], sizes = [2, 16, 64], strides = [1, 1, 1]} : vector<2x16x72xf32> to vector<2x16x64xf32>
    %59 = tpu.concatenate %58, %58 in 2 : vector<2x16x64xf32>, vector<2x16x64xf32> -> vector<2x16x128xf32>
    %c0_27 = arith.constant 0 : index
    %c2_28 = arith.constant 2 : index
    %c0_29 = arith.constant 0 : index
    %60 = vector.load %arg1[%c0_27, %c2_28, %c0_29] : memref<4x36x128xf32, #tpu.memory_space<vmem>>, vector<1x1x128xf32>
    %61 = vector.shape_cast %60 : vector<1x1x128xf32> to vector<128xf32>
    %62 = vector.shape_cast %61 : vector<128xf32> to vector<1x1x128xf32>
    %63 = vector.broadcast %62 : vector<1x1x128xf32> to vector<2x16x128xf32>
    %64 = arith.mulf %59, %63 : vector<2x16x128xf32>
    %65 = arith.addf %39, %64 : vector<2x16x128xf32>
    %c1_30 = arith.constant 1 : index
    %c2_31 = arith.constant 2 : index
    %c0_32 = arith.constant 0 : index
    %66 = vector.load %arg1[%c1_30, %c2_31, %c0_32] : memref<4x36x128xf32, #tpu.memory_space<vmem>>, vector<1x1x128xf32>
    %67 = vector.shape_cast %66 : vector<1x1x128xf32> to vector<128xf32>
    %68 = vector.shape_cast %67 : vector<128xf32> to vector<1x1x128xf32>
    %69 = vector.broadcast %68 : vector<1x1x128xf32> to vector<2x16x128xf32>
    %70 = arith.mulf %59, %69 : vector<2x16x128xf32>
    %71 = arith.addf %45, %70 : vector<2x16x128xf32>
    %c2_33 = arith.constant 2 : index
    %c2_34 = arith.constant 2 : index
    %c0_35 = arith.constant 0 : index
    %72 = vector.load %arg1[%c2_33, %c2_34, %c0_35] : memref<4x36x128xf32, #tpu.memory_space<vmem>>, vector<1x1x128xf32>
    %73 = vector.shape_cast %72 : vector<1x1x128xf32> to vector<128xf32>
    %74 = vector.shape_cast %73 : vector<128xf32> to vector<1x1x128xf32>
    %75 = vector.broadcast %74 : vector<1x1x128xf32> to vector<2x16x128xf32>
    %76 = arith.mulf %59, %75 : vector<2x16x128xf32>
    %77 = arith.addf %51, %76 : vector<2x16x128xf32>
    %c3_36 = arith.constant 3 : index
    %c2_37 = arith.constant 2 : index
    %c0_38 = arith.constant 0 : index
    %78 = vector.load %arg1[%c3_36, %c2_37, %c0_38] : memref<4x36x128xf32, #tpu.memory_space<vmem>>, vector<1x1x128xf32>
    %79 = vector.shape_cast %78 : vector<1x1x128xf32> to vector<128xf32>
    %80 = vector.shape_cast %79 : vector<128xf32> to vector<1x1x128xf32>
    %81 = vector.broadcast %80 : vector<1x1x128xf32> to vector<2x16x128xf32>
    %82 = arith.mulf %59, %81 : vector<2x16x128xf32>
    %83 = arith.addf %57, %82 : vector<2x16x128xf32>
    %c0_39 = arith.constant 0 : index
    %c0_40 = arith.constant 0 : index
    %c1_41 = arith.constant 1 : index
    %c0_42 = arith.constant 0 : index
    %84 = vector.load %arg3[%c0_39, %c0_40, %c1_41, %c0_42] : memref<2x4x18x72xf32, #tpu.memory_space<vmem>>, vector<2x1x16x72xf32>
    %85 = vector.shape_cast %84 : vector<2x1x16x72xf32> to vector<2x16x72xf32>
    %86 = vector.extract_strided_slice %85 {offsets = [0, 0, 0], sizes = [2, 16, 64], strides = [1, 1, 1]} : vector<2x16x72xf32> to vector<2x16x64xf32>
    %87 = tpu.concatenate %86, %86 in 2 : vector<2x16x64xf32>, vector<2x16x64xf32> -> vector<2x16x128xf32>
    %c0_43 = arith.constant 0 : index
    %c3_44 = arith.constant 3 : index
    %c0_45 = arith.constant 0 : index
    %88 = vector.load %arg1[%c0_43, %c3_44, %c0_45] : memref<4x36x128xf32, #tpu.memory_space<vmem>>, vector<1x1x128xf32>
    %89 = vector.shape_cast %88 : vector<1x1x128xf32> to vector<128xf32>
    %90 = vector.shape_cast %89 : vector<128xf32> to vector<1x1x128xf32>
    %91 = vector.broadcast %90 : vector<1x1x128xf32> to vector<2x16x128xf32>
    %92 = arith.mulf %87, %91 : vector<2x16x128xf32>
    %93 = arith.addf %65, %92 : vector<2x16x128xf32>
    %c1_46 = arith.constant 1 : index
    %c3_47 = arith.constant 3 : index
    %c0_48 = arith.constant 0 : index
    %94 = vector.load %arg1[%c1_46, %c3_47, %c0_48] : memref<4x36x128xf32, #tpu.memory_space<vmem>>, vector<1x1x128xf32>
    %95 = vector.shape_cast %94 : vector<1x1x128xf32> to vector<128xf32>
    %96 = vector.shape_cast %95 : vector<128xf32> to vector<1x1x128xf32>
    %97 = vector.broadcast %96 : vector<1x1x128xf32> to vector<2x16x128xf32>
    %98 = arith.mulf %87, %97 : vector<2x16x128xf32>
    %99 = arith.addf %71, %98 : vector<2x16x128xf32>
    %c2_49 = arith.constant 2 : index
    %c3_50 = arith.constant 3 : index
    %c0_51 = arith.constant 0 : index
    %100 = vector.load %arg1[%c2_49, %c3_50, %c0_51] : memref<4x36x128xf32, #tpu.memory_space<vmem>>, vector<1x1x128xf32>
    %101 = vector.shape_cast %100 : vector<1x1x128xf32> to vector<128xf32>
    %102 = vector.shape_cast %101 : vector<128xf32> to vector<1x1x128xf32>
    %103 = vector.broadcast %102 : vector<1x1x128xf32> to vector<2x16x128xf32>
    %104 = arith.mulf %87, %103 : vector<2x16x128xf32>
    %105 = arith.addf %77, %104 : vector<2x16x128xf32>
    %c3_52 = arith.constant 3 : index
    %c3_53 = arith.constant 3 : index
    %c0_54 = arith.constant 0 : index
    %106 = vector.load %arg1[%c3_52, %c3_53, %c0_54] : memref<4x36x128xf32, #tpu.memory_space<vmem>>, vector<1x1x128xf32>
    %107 = vector.shape_cast %106 : vector<1x1x128xf32> to vector<128xf32>
    %108 = vector.shape_cast %107 : vector<128xf32> to vector<1x1x128xf32>
    %109 = vector.broadcast %108 : vector<1x1x128xf32> to vector<2x16x128xf32>
    %110 = arith.mulf %87, %109 : vector<2x16x128xf32>
    %111 = arith.addf %83, %110 : vector<2x16x128xf32>
    %112 = vector.extract_strided_slice %85 {offsets = [0, 0, 4], sizes = [2, 16, 64], strides = [1, 1, 1]} : vector<2x16x72xf32> to vector<2x16x64xf32>
    %113 = tpu.concatenate %112, %112 in 2 : vector<2x16x64xf32>, vector<2x16x64xf32> -> vector<2x16x128xf32>
    %c0_55 = arith.constant 0 : index
    %c4 = arith.constant 4 : index
    %c0_56 = arith.constant 0 : index
    %114 = vector.load %arg1[%c0_55, %c4, %c0_56] : memref<4x36x128xf32, #tpu.memory_space<vmem>>, vector<1x1x128xf32>
    %115 = vector.shape_cast %114 : vector<1x1x128xf32> to vector<128xf32>
    %116 = vector.shape_cast %115 : vector<128xf32> to vector<1x1x128xf32>
    %117 = vector.broadcast %116 : vector<1x1x128xf32> to vector<2x16x128xf32>
    %118 = arith.mulf %113, %117 : vector<2x16x128xf32>
    %119 = arith.addf %93, %118 : vector<2x16x128xf32>
    %c1_57 = arith.constant 1 : index
    %c4_58 = arith.constant 4 : index
    %c0_59 = arith.constant 0 : index
    %120 = vector.load %arg1[%c1_57, %c4_58, %c0_59] : memref<4x36x128xf32, #tpu.memory_space<vmem>>, vector<1x1x128xf32>
    %121 = vector.shape_cast %120 : vector<1x1x128xf32> to vector<128xf32>
    %122 = vector.shape_cast %121 : vector<128xf32> to vector<1x1x128xf32>
    %123 = vector.broadcast %122 : vector<1x1x128xf32> to vector<2x16x128xf32>
    %124 = arith.mulf %113, %123 : vector<2x16x128xf32>
    %125 = arith.addf %99, %124 : vector<2x16x128xf32>
    %c2_60 = arith.constant 2 : index
    %c4_61 = arith.constant 4 : index
    %c0_62 = arith.constant 0 : index
    %126 = vector.load %arg1[%c2_60, %c4_61, %c0_62] : memref<4x36x128xf32, #tpu.memory_space<vmem>>, vector<1x1x128xf32>
    %127 = vector.shape_cast %126 : vector<1x1x128xf32> to vector<128xf32>
    %128 = vector.shape_cast %127 : vector<128xf32> to vector<1x1x128xf32>
    %129 = vector.broadcast %128 : vector<1x1x128xf32> to vector<2x16x128xf32>
    %130 = arith.mulf %113, %129 : vector<2x16x128xf32>
    %131 = arith.addf %105, %130 : vector<2x16x128xf32>
    %c3_63 = arith.constant 3 : index
    %c4_64 = arith.constant 4 : index
    %c0_65 = arith.constant 0 : index
    %132 = vector.load %arg1[%c3_63, %c4_64, %c0_65] : memref<4x36x128xf32, #tpu.memory_space<vmem>>, vector<1x1x128xf32>
    %133 = vector.shape_cast %132 : vector<1x1x128xf32> to vector<128xf32>
    %134 = vector.shape_cast %133 : vector<128xf32> to vector<1x1x128xf32>
    %135 = vector.broadcast %134 : vector<1x1x128xf32> to vector<2x16x128xf32>
    %136 = arith.mulf %113, %135 : vector<2x16x128xf32>
    %137 = arith.addf %111, %136 : vector<2x16x128xf32>
    %138 = vector.extract_strided_slice %85 {offsets = [0, 0, 8], sizes = [2, 16, 64], strides = [1, 1, 1]} : vector<2x16x72xf32> to vector<2x16x64xf32>
    %139 = tpu.concatenate %138, %138 in 2 : vector<2x16x64xf32>, vector<2x16x64xf32> -> vector<2x16x128xf32>
    %c0_66 = arith.constant 0 : index
    %c5 = arith.constant 5 : index
    %c0_67 = arith.constant 0 : index
    %140 = vector.load %arg1[%c0_66, %c5, %c0_67] : memref<4x36x128xf32, #tpu.memory_space<vmem>>, vector<1x1x128xf32>
    %141 = vector.shape_cast %140 : vector<1x1x128xf32> to vector<128xf32>
    %142 = vector.shape_cast %141 : vector<128xf32> to vector<1x1x128xf32>
    %143 = vector.broadcast %142 : vector<1x1x128xf32> to vector<2x16x128xf32>
    %144 = arith.mulf %139, %143 : vector<2x16x128xf32>
    %145 = arith.addf %119, %144 : vector<2x16x128xf32>
    %c1_68 = arith.constant 1 : index
    %c5_69 = arith.constant 5 : index
    %c0_70 = arith.constant 0 : index
    %146 = vector.load %arg1[%c1_68, %c5_69, %c0_70] : memref<4x36x128xf32, #tpu.memory_space<vmem>>, vector<1x1x128xf32>
    %147 = vector.shape_cast %146 : vector<1x1x128xf32> to vector<128xf32>
    %148 = vector.shape_cast %147 : vector<128xf32> to vector<1x1x128xf32>
    %149 = vector.broadcast %148 : vector<1x1x128xf32> to vector<2x16x128xf32>
    %150 = arith.mulf %139, %149 : vector<2x16x128xf32>
    %151 = arith.addf %125, %150 : vector<2x16x128xf32>
    %c2_71 = arith.constant 2 : index
    %c5_72 = arith.constant 5 : index
    %c0_73 = arith.constant 0 : index
    %152 = vector.load %arg1[%c2_71, %c5_72, %c0_73] : memref<4x36x128xf32, #tpu.memory_space<vmem>>, vector<1x1x128xf32>
    %153 = vector.shape_cast %152 : vector<1x1x128xf32> to vector<128xf32>
    %154 = vector.shape_cast %153 : vector<128xf32> to vector<1x1x128xf32>
    %155 = vector.broadcast %154 : vector<1x1x128xf32> to vector<2x16x128xf32>
    %156 = arith.mulf %139, %155 : vector<2x16x128xf32>
    %157 = arith.addf %131, %156 : vector<2x16x128xf32>
    %c3_74 = arith.constant 3 : index
    %c5_75 = arith.constant 5 : index
    %c0_76 = arith.constant 0 : index
    %158 = vector.load %arg1[%c3_74, %c5_75, %c0_76] : memref<4x36x128xf32, #tpu.memory_space<vmem>>, vector<1x1x128xf32>
    %159 = vector.shape_cast %158 : vector<1x1x128xf32> to vector<128xf32>
    %160 = vector.shape_cast %159 : vector<128xf32> to vector<1x1x128xf32>
    %161 = vector.broadcast %160 : vector<1x1x128xf32> to vector<2x16x128xf32>
    %162 = arith.mulf %139, %161 : vector<2x16x128xf32>
    %163 = arith.addf %137, %162 : vector<2x16x128xf32>
    %c0_77 = arith.constant 0 : index
    %c0_78 = arith.constant 0 : index
    %c2_79 = arith.constant 2 : index
    %c0_80 = arith.constant 0 : index
    %164 = vector.load %arg3[%c0_77, %c0_78, %c2_79, %c0_80] : memref<2x4x18x72xf32, #tpu.memory_space<vmem>>, vector<2x1x16x72xf32>
    %165 = vector.shape_cast %164 : vector<2x1x16x72xf32> to vector<2x16x72xf32>
    %166 = vector.extract_strided_slice %165 {offsets = [0, 0, 0], sizes = [2, 16, 64], strides = [1, 1, 1]} : vector<2x16x72xf32> to vector<2x16x64xf32>
    %167 = tpu.concatenate %166, %166 in 2 : vector<2x16x64xf32>, vector<2x16x64xf32> -> vector<2x16x128xf32>
    %c0_81 = arith.constant 0 : index
    %c6 = arith.constant 6 : index
    %c0_82 = arith.constant 0 : index
    %168 = vector.load %arg1[%c0_81, %c6, %c0_82] : memref<4x36x128xf32, #tpu.memory_space<vmem>>, vector<1x1x128xf32>
    %169 = vector.shape_cast %168 : vector<1x1x128xf32> to vector<128xf32>
    %170 = vector.shape_cast %169 : vector<128xf32> to vector<1x1x128xf32>
    %171 = vector.broadcast %170 : vector<1x1x128xf32> to vector<2x16x128xf32>
    %172 = arith.mulf %167, %171 : vector<2x16x128xf32>
    %173 = arith.addf %145, %172 : vector<2x16x128xf32>
    %c1_83 = arith.constant 1 : index
    %c6_84 = arith.constant 6 : index
    %c0_85 = arith.constant 0 : index
    %174 = vector.load %arg1[%c1_83, %c6_84, %c0_85] : memref<4x36x128xf32, #tpu.memory_space<vmem>>, vector<1x1x128xf32>
    %175 = vector.shape_cast %174 : vector<1x1x128xf32> to vector<128xf32>
    %176 = vector.shape_cast %175 : vector<128xf32> to vector<1x1x128xf32>
    %177 = vector.broadcast %176 : vector<1x1x128xf32> to vector<2x16x128xf32>
    %178 = arith.mulf %167, %177 : vector<2x16x128xf32>
    %179 = arith.addf %151, %178 : vector<2x16x128xf32>
    %c2_86 = arith.constant 2 : index
    %c6_87 = arith.constant 6 : index
    %c0_88 = arith.constant 0 : index
    %180 = vector.load %arg1[%c2_86, %c6_87, %c0_88] : memref<4x36x128xf32, #tpu.memory_space<vmem>>, vector<1x1x128xf32>
    %181 = vector.shape_cast %180 : vector<1x1x128xf32> to vector<128xf32>
    %182 = vector.shape_cast %181 : vector<128xf32> to vector<1x1x128xf32>
    %183 = vector.broadcast %182 : vector<1x1x128xf32> to vector<2x16x128xf32>
    %184 = arith.mulf %167, %183 : vector<2x16x128xf32>
    %185 = arith.addf %157, %184 : vector<2x16x128xf32>
    %c3_89 = arith.constant 3 : index
    %c6_90 = arith.constant 6 : index
    %c0_91 = arith.constant 0 : index
    %186 = vector.load %arg1[%c3_89, %c6_90, %c0_91] : memref<4x36x128xf32, #tpu.memory_space<vmem>>, vector<1x1x128xf32>
    %187 = vector.shape_cast %186 : vector<1x1x128xf32> to vector<128xf32>
    %188 = vector.shape_cast %187 : vector<128xf32> to vector<1x1x128xf32>
    %189 = vector.broadcast %188 : vector<1x1x128xf32> to vector<2x16x128xf32>
    %190 = arith.mulf %167, %189 : vector<2x16x128xf32>
    %191 = arith.addf %163, %190 : vector<2x16x128xf32>
    %192 = vector.extract_strided_slice %165 {offsets = [0, 0, 4], sizes = [2, 16, 64], strides = [1, 1, 1]} : vector<2x16x72xf32> to vector<2x16x64xf32>
    %193 = tpu.concatenate %192, %192 in 2 : vector<2x16x64xf32>, vector<2x16x64xf32> -> vector<2x16x128xf32>
    %c0_92 = arith.constant 0 : index
    %c7 = arith.constant 7 : index
    %c0_93 = arith.constant 0 : index
    %194 = vector.load %arg1[%c0_92, %c7, %c0_93] : memref<4x36x128xf32, #tpu.memory_space<vmem>>, vector<1x1x128xf32>
    %195 = vector.shape_cast %194 : vector<1x1x128xf32> to vector<128xf32>
    %196 = vector.shape_cast %195 : vector<128xf32> to vector<1x1x128xf32>
    %197 = vector.broadcast %196 : vector<1x1x128xf32> to vector<2x16x128xf32>
    %198 = arith.mulf %193, %197 : vector<2x16x128xf32>
    %199 = arith.addf %173, %198 : vector<2x16x128xf32>
    %c1_94 = arith.constant 1 : index
    %c7_95 = arith.constant 7 : index
    %c0_96 = arith.constant 0 : index
    %200 = vector.load %arg1[%c1_94, %c7_95, %c0_96] : memref<4x36x128xf32, #tpu.memory_space<vmem>>, vector<1x1x128xf32>
    %201 = vector.shape_cast %200 : vector<1x1x128xf32> to vector<128xf32>
    %202 = vector.shape_cast %201 : vector<128xf32> to vector<1x1x128xf32>
    %203 = vector.broadcast %202 : vector<1x1x128xf32> to vector<2x16x128xf32>
    %204 = arith.mulf %193, %203 : vector<2x16x128xf32>
    %205 = arith.addf %179, %204 : vector<2x16x128xf32>
    %c2_97 = arith.constant 2 : index
    %c7_98 = arith.constant 7 : index
    %c0_99 = arith.constant 0 : index
    %206 = vector.load %arg1[%c2_97, %c7_98, %c0_99] : memref<4x36x128xf32, #tpu.memory_space<vmem>>, vector<1x1x128xf32>
    %207 = vector.shape_cast %206 : vector<1x1x128xf32> to vector<128xf32>
    %208 = vector.shape_cast %207 : vector<128xf32> to vector<1x1x128xf32>
    %209 = vector.broadcast %208 : vector<1x1x128xf32> to vector<2x16x128xf32>
    %210 = arith.mulf %193, %209 : vector<2x16x128xf32>
    %211 = arith.addf %185, %210 : vector<2x16x128xf32>
    %c3_100 = arith.constant 3 : index
    %c7_101 = arith.constant 7 : index
    %c0_102 = arith.constant 0 : index
    %212 = vector.load %arg1[%c3_100, %c7_101, %c0_102] : memref<4x36x128xf32, #tpu.memory_space<vmem>>, vector<1x1x128xf32>
    %213 = vector.shape_cast %212 : vector<1x1x128xf32> to vector<128xf32>
    %214 = vector.shape_cast %213 : vector<128xf32> to vector<1x1x128xf32>
    %215 = vector.broadcast %214 : vector<1x1x128xf32> to vector<2x16x128xf32>
    %216 = arith.mulf %193, %215 : vector<2x16x128xf32>
    %217 = arith.addf %191, %216 : vector<2x16x128xf32>
    %218 = vector.extract_strided_slice %165 {offsets = [0, 0, 8], sizes = [2, 16, 64], strides = [1, 1, 1]} : vector<2x16x72xf32> to vector<2x16x64xf32>
    %219 = tpu.concatenate %218, %218 in 2 : vector<2x16x64xf32>, vector<2x16x64xf32> -> vector<2x16x128xf32>
    %c0_103 = arith.constant 0 : index
    %c8 = arith.constant 8 : index
    %c0_104 = arith.constant 0 : index
    %220 = vector.load %arg1[%c0_103, %c8, %c0_104] : memref<4x36x128xf32, #tpu.memory_space<vmem>>, vector<1x1x128xf32>
    %221 = vector.shape_cast %220 : vector<1x1x128xf32> to vector<128xf32>
    %222 = vector.shape_cast %221 : vector<128xf32> to vector<1x1x128xf32>
    %223 = vector.broadcast %222 : vector<1x1x128xf32> to vector<2x16x128xf32>
    %224 = arith.mulf %219, %223 : vector<2x16x128xf32>
    %225 = arith.addf %199, %224 : vector<2x16x128xf32>
    %c1_105 = arith.constant 1 : index
    %c8_106 = arith.constant 8 : index
    %c0_107 = arith.constant 0 : index
    %226 = vector.load %arg1[%c1_105, %c8_106, %c0_107] : memref<4x36x128xf32, #tpu.memory_space<vmem>>, vector<1x1x128xf32>
    %227 = vector.shape_cast %226 : vector<1x1x128xf32> to vector<128xf32>
    %228 = vector.shape_cast %227 : vector<128xf32> to vector<1x1x128xf32>
    %229 = vector.broadcast %228 : vector<1x1x128xf32> to vector<2x16x128xf32>
    %230 = arith.mulf %219, %229 : vector<2x16x128xf32>
    %231 = arith.addf %205, %230 : vector<2x16x128xf32>
    %c2_108 = arith.constant 2 : index
    %c8_109 = arith.constant 8 : index
    %c0_110 = arith.constant 0 : index
    %232 = vector.load %arg1[%c2_108, %c8_109, %c0_110] : memref<4x36x128xf32, #tpu.memory_space<vmem>>, vector<1x1x128xf32>
    %233 = vector.shape_cast %232 : vector<1x1x128xf32> to vector<128xf32>
    %234 = vector.shape_cast %233 : vector<128xf32> to vector<1x1x128xf32>
    %235 = vector.broadcast %234 : vector<1x1x128xf32> to vector<2x16x128xf32>
    %236 = arith.mulf %219, %235 : vector<2x16x128xf32>
    %237 = arith.addf %211, %236 : vector<2x16x128xf32>
    %c3_111 = arith.constant 3 : index
    %c8_112 = arith.constant 8 : index
    %c0_113 = arith.constant 0 : index
    %238 = vector.load %arg1[%c3_111, %c8_112, %c0_113] : memref<4x36x128xf32, #tpu.memory_space<vmem>>, vector<1x1x128xf32>
    %239 = vector.shape_cast %238 : vector<1x1x128xf32> to vector<128xf32>
    %240 = vector.shape_cast %239 : vector<128xf32> to vector<1x1x128xf32>
    %241 = vector.broadcast %240 : vector<1x1x128xf32> to vector<2x16x128xf32>
    %242 = arith.mulf %219, %241 : vector<2x16x128xf32>
    %243 = arith.addf %217, %242 : vector<2x16x128xf32>
    %c0_114 = arith.constant 0 : index
    %c1_115 = arith.constant 1 : index
    %c0_116 = arith.constant 0 : index
    %c0_117 = arith.constant 0 : index
    %244 = vector.load %arg3[%c0_114, %c1_115, %c0_116, %c0_117] : memref<2x4x18x72xf32, #tpu.memory_space<vmem>>, vector<2x1x16x72xf32>
    %245 = vector.shape_cast %244 : vector<2x1x16x72xf32> to vector<2x16x72xf32>
    %246 = vector.extract_strided_slice %245 {offsets = [0, 0, 0], sizes = [2, 16, 64], strides = [1, 1, 1]} : vector<2x16x72xf32> to vector<2x16x64xf32>
    %247 = tpu.concatenate %246, %246 in 2 : vector<2x16x64xf32>, vector<2x16x64xf32> -> vector<2x16x128xf32>
    %c0_118 = arith.constant 0 : index
    %c9 = arith.constant 9 : index
    %c0_119 = arith.constant 0 : index
    %248 = vector.load %arg1[%c0_118, %c9, %c0_119] : memref<4x36x128xf32, #tpu.memory_space<vmem>>, vector<1x1x128xf32>
    %249 = vector.shape_cast %248 : vector<1x1x128xf32> to vector<128xf32>
    %250 = vector.shape_cast %249 : vector<128xf32> to vector<1x1x128xf32>
    %251 = vector.broadcast %250 : vector<1x1x128xf32> to vector<2x16x128xf32>
    %252 = arith.mulf %247, %251 : vector<2x16x128xf32>
    %253 = arith.addf %225, %252 : vector<2x16x128xf32>
    %c1_120 = arith.constant 1 : index
    %c9_121 = arith.constant 9 : index
    %c0_122 = arith.constant 0 : index
    %254 = vector.load %arg1[%c1_120, %c9_121, %c0_122] : memref<4x36x128xf32, #tpu.memory_space<vmem>>, vector<1x1x128xf32>
    %255 = vector.shape_cast %254 : vector<1x1x128xf32> to vector<128xf32>
    %256 = vector.shape_cast %255 : vector<128xf32> to vector<1x1x128xf32>
    %257 = vector.broadcast %256 : vector<1x1x128xf32> to vector<2x16x128xf32>
    %258 = arith.mulf %247, %257 : vector<2x16x128xf32>
    %259 = arith.addf %231, %258 : vector<2x16x128xf32>
    %c2_123 = arith.constant 2 : index
    %c9_124 = arith.constant 9 : index
    %c0_125 = arith.constant 0 : index
    %260 = vector.load %arg1[%c2_123, %c9_124, %c0_125] : memref<4x36x128xf32, #tpu.memory_space<vmem>>, vector<1x1x128xf32>
    %261 = vector.shape_cast %260 : vector<1x1x128xf32> to vector<128xf32>
    %262 = vector.shape_cast %261 : vector<128xf32> to vector<1x1x128xf32>
    %263 = vector.broadcast %262 : vector<1x1x128xf32> to vector<2x16x128xf32>
    %264 = arith.mulf %247, %263 : vector<2x16x128xf32>
    %265 = arith.addf %237, %264 : vector<2x16x128xf32>
    %c3_126 = arith.constant 3 : index
    %c9_127 = arith.constant 9 : index
    %c0_128 = arith.constant 0 : index
    %266 = vector.load %arg1[%c3_126, %c9_127, %c0_128] : memref<4x36x128xf32, #tpu.memory_space<vmem>>, vector<1x1x128xf32>
    %267 = vector.shape_cast %266 : vector<1x1x128xf32> to vector<128xf32>
    %268 = vector.shape_cast %267 : vector<128xf32> to vector<1x1x128xf32>
    %269 = vector.broadcast %268 : vector<1x1x128xf32> to vector<2x16x128xf32>
    %270 = arith.mulf %247, %269 : vector<2x16x128xf32>
    %271 = arith.addf %243, %270 : vector<2x16x128xf32>
    %272 = vector.extract_strided_slice %245 {offsets = [0, 0, 4], sizes = [2, 16, 64], strides = [1, 1, 1]} : vector<2x16x72xf32> to vector<2x16x64xf32>
    %273 = tpu.concatenate %272, %272 in 2 : vector<2x16x64xf32>, vector<2x16x64xf32> -> vector<2x16x128xf32>
    %c0_129 = arith.constant 0 : index
    %c10 = arith.constant 10 : index
    %c0_130 = arith.constant 0 : index
    %274 = vector.load %arg1[%c0_129, %c10, %c0_130] : memref<4x36x128xf32, #tpu.memory_space<vmem>>, vector<1x1x128xf32>
    %275 = vector.shape_cast %274 : vector<1x1x128xf32> to vector<128xf32>
    %276 = vector.shape_cast %275 : vector<128xf32> to vector<1x1x128xf32>
    %277 = vector.broadcast %276 : vector<1x1x128xf32> to vector<2x16x128xf32>
    %278 = arith.mulf %273, %277 : vector<2x16x128xf32>
    %279 = arith.addf %253, %278 : vector<2x16x128xf32>
    %c1_131 = arith.constant 1 : index
    %c10_132 = arith.constant 10 : index
    %c0_133 = arith.constant 0 : index
    %280 = vector.load %arg1[%c1_131, %c10_132, %c0_133] : memref<4x36x128xf32, #tpu.memory_space<vmem>>, vector<1x1x128xf32>
    %281 = vector.shape_cast %280 : vector<1x1x128xf32> to vector<128xf32>
    %282 = vector.shape_cast %281 : vector<128xf32> to vector<1x1x128xf32>
    %283 = vector.broadcast %282 : vector<1x1x128xf32> to vector<2x16x128xf32>
    %284 = arith.mulf %273, %283 : vector<2x16x128xf32>
    %285 = arith.addf %259, %284 : vector<2x16x128xf32>
    %c2_134 = arith.constant 2 : index
    %c10_135 = arith.constant 10 : index
    %c0_136 = arith.constant 0 : index
    %286 = vector.load %arg1[%c2_134, %c10_135, %c0_136] : memref<4x36x128xf32, #tpu.memory_space<vmem>>, vector<1x1x128xf32>
    %287 = vector.shape_cast %286 : vector<1x1x128xf32> to vector<128xf32>
    %288 = vector.shape_cast %287 : vector<128xf32> to vector<1x1x128xf32>
    %289 = vector.broadcast %288 : vector<1x1x128xf32> to vector<2x16x128xf32>
    %290 = arith.mulf %273, %289 : vector<2x16x128xf32>
    %291 = arith.addf %265, %290 : vector<2x16x128xf32>
    %c3_137 = arith.constant 3 : index
    %c10_138 = arith.constant 10 : index
    %c0_139 = arith.constant 0 : index
    %292 = vector.load %arg1[%c3_137, %c10_138, %c0_139] : memref<4x36x128xf32, #tpu.memory_space<vmem>>, vector<1x1x128xf32>
    %293 = vector.shape_cast %292 : vector<1x1x128xf32> to vector<128xf32>
    %294 = vector.shape_cast %293 : vector<128xf32> to vector<1x1x128xf32>
    %295 = vector.broadcast %294 : vector<1x1x128xf32> to vector<2x16x128xf32>
    %296 = arith.mulf %273, %295 : vector<2x16x128xf32>
    %297 = arith.addf %271, %296 : vector<2x16x128xf32>
    %298 = vector.extract_strided_slice %245 {offsets = [0, 0, 8], sizes = [2, 16, 64], strides = [1, 1, 1]} : vector<2x16x72xf32> to vector<2x16x64xf32>
    %299 = tpu.concatenate %298, %298 in 2 : vector<2x16x64xf32>, vector<2x16x64xf32> -> vector<2x16x128xf32>
    %c0_140 = arith.constant 0 : index
    %c11 = arith.constant 11 : index
    %c0_141 = arith.constant 0 : index
    %300 = vector.load %arg1[%c0_140, %c11, %c0_141] : memref<4x36x128xf32, #tpu.memory_space<vmem>>, vector<1x1x128xf32>
    %301 = vector.shape_cast %300 : vector<1x1x128xf32> to vector<128xf32>
    %302 = vector.shape_cast %301 : vector<128xf32> to vector<1x1x128xf32>
    %303 = vector.broadcast %302 : vector<1x1x128xf32> to vector<2x16x128xf32>
    %304 = arith.mulf %299, %303 : vector<2x16x128xf32>
    %305 = arith.addf %279, %304 : vector<2x16x128xf32>
    %c1_142 = arith.constant 1 : index
    %c11_143 = arith.constant 11 : index
    %c0_144 = arith.constant 0 : index
    %306 = vector.load %arg1[%c1_142, %c11_143, %c0_144] : memref<4x36x128xf32, #tpu.memory_space<vmem>>, vector<1x1x128xf32>
    %307 = vector.shape_cast %306 : vector<1x1x128xf32> to vector<128xf32>
    %308 = vector.shape_cast %307 : vector<128xf32> to vector<1x1x128xf32>
    %309 = vector.broadcast %308 : vector<1x1x128xf32> to vector<2x16x128xf32>
    %310 = arith.mulf %299, %309 : vector<2x16x128xf32>
    %311 = arith.addf %285, %310 : vector<2x16x128xf32>
    %c2_145 = arith.constant 2 : index
    %c11_146 = arith.constant 11 : index
    %c0_147 = arith.constant 0 : index
    %312 = vector.load %arg1[%c2_145, %c11_146, %c0_147] : memref<4x36x128xf32, #tpu.memory_space<vmem>>, vector<1x1x128xf32>
    %313 = vector.shape_cast %312 : vector<1x1x128xf32> to vector<128xf32>
    %314 = vector.shape_cast %313 : vector<128xf32> to vector<1x1x128xf32>
    %315 = vector.broadcast %314 : vector<1x1x128xf32> to vector<2x16x128xf32>
    %316 = arith.mulf %299, %315 : vector<2x16x128xf32>
    %317 = arith.addf %291, %316 : vector<2x16x128xf32>
    %c3_148 = arith.constant 3 : index
    %c11_149 = arith.constant 11 : index
    %c0_150 = arith.constant 0 : index
    %318 = vector.load %arg1[%c3_148, %c11_149, %c0_150] : memref<4x36x128xf32, #tpu.memory_space<vmem>>, vector<1x1x128xf32>
    %319 = vector.shape_cast %318 : vector<1x1x128xf32> to vector<128xf32>
    %320 = vector.shape_cast %319 : vector<128xf32> to vector<1x1x128xf32>
    %321 = vector.broadcast %320 : vector<1x1x128xf32> to vector<2x16x128xf32>
    %322 = arith.mulf %299, %321 : vector<2x16x128xf32>
    %323 = arith.addf %297, %322 : vector<2x16x128xf32>
    %c0_151 = arith.constant 0 : index
    %c1_152 = arith.constant 1 : index
    %c1_153 = arith.constant 1 : index
    %c0_154 = arith.constant 0 : index
    %324 = vector.load %arg3[%c0_151, %c1_152, %c1_153, %c0_154] : memref<2x4x18x72xf32, #tpu.memory_space<vmem>>, vector<2x1x16x72xf32>
    %325 = vector.shape_cast %324 : vector<2x1x16x72xf32> to vector<2x16x72xf32>
    %326 = vector.extract_strided_slice %325 {offsets = [0, 0, 0], sizes = [2, 16, 64], strides = [1, 1, 1]} : vector<2x16x72xf32> to vector<2x16x64xf32>
    %327 = tpu.concatenate %326, %326 in 2 : vector<2x16x64xf32>, vector<2x16x64xf32> -> vector<2x16x128xf32>
    %c0_155 = arith.constant 0 : index
    %c12 = arith.constant 12 : index
    %c0_156 = arith.constant 0 : index
    %328 = vector.load %arg1[%c0_155, %c12, %c0_156] : memref<4x36x128xf32, #tpu.memory_space<vmem>>, vector<1x1x128xf32>
    %329 = vector.shape_cast %328 : vector<1x1x128xf32> to vector<128xf32>
    %330 = vector.shape_cast %329 : vector<128xf32> to vector<1x1x128xf32>
    %331 = vector.broadcast %330 : vector<1x1x128xf32> to vector<2x16x128xf32>
    %332 = arith.mulf %327, %331 : vector<2x16x128xf32>
    %333 = arith.addf %305, %332 : vector<2x16x128xf32>
    %c1_157 = arith.constant 1 : index
    %c12_158 = arith.constant 12 : index
    %c0_159 = arith.constant 0 : index
    %334 = vector.load %arg1[%c1_157, %c12_158, %c0_159] : memref<4x36x128xf32, #tpu.memory_space<vmem>>, vector<1x1x128xf32>
    %335 = vector.shape_cast %334 : vector<1x1x128xf32> to vector<128xf32>
    %336 = vector.shape_cast %335 : vector<128xf32> to vector<1x1x128xf32>
    %337 = vector.broadcast %336 : vector<1x1x128xf32> to vector<2x16x128xf32>
    %338 = arith.mulf %327, %337 : vector<2x16x128xf32>
    %339 = arith.addf %311, %338 : vector<2x16x128xf32>
    %c2_160 = arith.constant 2 : index
    %c12_161 = arith.constant 12 : index
    %c0_162 = arith.constant 0 : index
    %340 = vector.load %arg1[%c2_160, %c12_161, %c0_162] : memref<4x36x128xf32, #tpu.memory_space<vmem>>, vector<1x1x128xf32>
    %341 = vector.shape_cast %340 : vector<1x1x128xf32> to vector<128xf32>
    %342 = vector.shape_cast %341 : vector<128xf32> to vector<1x1x128xf32>
    %343 = vector.broadcast %342 : vector<1x1x128xf32> to vector<2x16x128xf32>
    %344 = arith.mulf %327, %343 : vector<2x16x128xf32>
    %345 = arith.addf %317, %344 : vector<2x16x128xf32>
    %c3_163 = arith.constant 3 : index
    %c12_164 = arith.constant 12 : index
    %c0_165 = arith.constant 0 : index
    %346 = vector.load %arg1[%c3_163, %c12_164, %c0_165] : memref<4x36x128xf32, #tpu.memory_space<vmem>>, vector<1x1x128xf32>
    %347 = vector.shape_cast %346 : vector<1x1x128xf32> to vector<128xf32>
    %348 = vector.shape_cast %347 : vector<128xf32> to vector<1x1x128xf32>
    %349 = vector.broadcast %348 : vector<1x1x128xf32> to vector<2x16x128xf32>
    %350 = arith.mulf %327, %349 : vector<2x16x128xf32>
    %351 = arith.addf %323, %350 : vector<2x16x128xf32>
    %352 = vector.extract_strided_slice %325 {offsets = [0, 0, 4], sizes = [2, 16, 64], strides = [1, 1, 1]} : vector<2x16x72xf32> to vector<2x16x64xf32>
    %353 = tpu.concatenate %352, %352 in 2 : vector<2x16x64xf32>, vector<2x16x64xf32> -> vector<2x16x128xf32>
    %c0_166 = arith.constant 0 : index
    %c13 = arith.constant 13 : index
    %c0_167 = arith.constant 0 : index
    %354 = vector.load %arg1[%c0_166, %c13, %c0_167] : memref<4x36x128xf32, #tpu.memory_space<vmem>>, vector<1x1x128xf32>
    %355 = vector.shape_cast %354 : vector<1x1x128xf32> to vector<128xf32>
    %356 = vector.shape_cast %355 : vector<128xf32> to vector<1x1x128xf32>
    %357 = vector.broadcast %356 : vector<1x1x128xf32> to vector<2x16x128xf32>
    %358 = arith.mulf %353, %357 : vector<2x16x128xf32>
    %359 = arith.addf %333, %358 : vector<2x16x128xf32>
    %c1_168 = arith.constant 1 : index
    %c13_169 = arith.constant 13 : index
    %c0_170 = arith.constant 0 : index
    %360 = vector.load %arg1[%c1_168, %c13_169, %c0_170] : memref<4x36x128xf32, #tpu.memory_space<vmem>>, vector<1x1x128xf32>
    %361 = vector.shape_cast %360 : vector<1x1x128xf32> to vector<128xf32>
    %362 = vector.shape_cast %361 : vector<128xf32> to vector<1x1x128xf32>
    %363 = vector.broadcast %362 : vector<1x1x128xf32> to vector<2x16x128xf32>
    %364 = arith.mulf %353, %363 : vector<2x16x128xf32>
    %365 = arith.addf %339, %364 : vector<2x16x128xf32>
    %c2_171 = arith.constant 2 : index
    %c13_172 = arith.constant 13 : index
    %c0_173 = arith.constant 0 : index
    %366 = vector.load %arg1[%c2_171, %c13_172, %c0_173] : memref<4x36x128xf32, #tpu.memory_space<vmem>>, vector<1x1x128xf32>
    %367 = vector.shape_cast %366 : vector<1x1x128xf32> to vector<128xf32>
    %368 = vector.shape_cast %367 : vector<128xf32> to vector<1x1x128xf32>
    %369 = vector.broadcast %368 : vector<1x1x128xf32> to vector<2x16x128xf32>
    %370 = arith.mulf %353, %369 : vector<2x16x128xf32>
    %371 = arith.addf %345, %370 : vector<2x16x128xf32>
    %c3_174 = arith.constant 3 : index
    %c13_175 = arith.constant 13 : index
    %c0_176 = arith.constant 0 : index
    %372 = vector.load %arg1[%c3_174, %c13_175, %c0_176] : memref<4x36x128xf32, #tpu.memory_space<vmem>>, vector<1x1x128xf32>
    %373 = vector.shape_cast %372 : vector<1x1x128xf32> to vector<128xf32>
    %374 = vector.shape_cast %373 : vector<128xf32> to vector<1x1x128xf32>
    %375 = vector.broadcast %374 : vector<1x1x128xf32> to vector<2x16x128xf32>
    %376 = arith.mulf %353, %375 : vector<2x16x128xf32>
    %377 = arith.addf %351, %376 : vector<2x16x128xf32>
    %378 = vector.extract_strided_slice %325 {offsets = [0, 0, 8], sizes = [2, 16, 64], strides = [1, 1, 1]} : vector<2x16x72xf32> to vector<2x16x64xf32>
    %379 = tpu.concatenate %378, %378 in 2 : vector<2x16x64xf32>, vector<2x16x64xf32> -> vector<2x16x128xf32>
    %c0_177 = arith.constant 0 : index
    %c14 = arith.constant 14 : index
    %c0_178 = arith.constant 0 : index
    %380 = vector.load %arg1[%c0_177, %c14, %c0_178] : memref<4x36x128xf32, #tpu.memory_space<vmem>>, vector<1x1x128xf32>
    %381 = vector.shape_cast %380 : vector<1x1x128xf32> to vector<128xf32>
    %382 = vector.shape_cast %381 : vector<128xf32> to vector<1x1x128xf32>
    %383 = vector.broadcast %382 : vector<1x1x128xf32> to vector<2x16x128xf32>
    %384 = arith.mulf %379, %383 : vector<2x16x128xf32>
    %385 = arith.addf %359, %384 : vector<2x16x128xf32>
    %c1_179 = arith.constant 1 : index
    %c14_180 = arith.constant 14 : index
    %c0_181 = arith.constant 0 : index
    %386 = vector.load %arg1[%c1_179, %c14_180, %c0_181] : memref<4x36x128xf32, #tpu.memory_space<vmem>>, vector<1x1x128xf32>
    %387 = vector.shape_cast %386 : vector<1x1x128xf32> to vector<128xf32>
    %388 = vector.shape_cast %387 : vector<128xf32> to vector<1x1x128xf32>
    %389 = vector.broadcast %388 : vector<1x1x128xf32> to vector<2x16x128xf32>
    %390 = arith.mulf %379, %389 : vector<2x16x128xf32>
    %391 = arith.addf %365, %390 : vector<2x16x128xf32>
    %c2_182 = arith.constant 2 : index
    %c14_183 = arith.constant 14 : index
    %c0_184 = arith.constant 0 : index
    %392 = vector.load %arg1[%c2_182, %c14_183, %c0_184] : memref<4x36x128xf32, #tpu.memory_space<vmem>>, vector<1x1x128xf32>
    %393 = vector.shape_cast %392 : vector<1x1x128xf32> to vector<128xf32>
    %394 = vector.shape_cast %393 : vector<128xf32> to vector<1x1x128xf32>
    %395 = vector.broadcast %394 : vector<1x1x128xf32> to vector<2x16x128xf32>
    %396 = arith.mulf %379, %395 : vector<2x16x128xf32>
    %397 = arith.addf %371, %396 : vector<2x16x128xf32>
    %c3_185 = arith.constant 3 : index
    %c14_186 = arith.constant 14 : index
    %c0_187 = arith.constant 0 : index
    %398 = vector.load %arg1[%c3_185, %c14_186, %c0_187] : memref<4x36x128xf32, #tpu.memory_space<vmem>>, vector<1x1x128xf32>
    %399 = vector.shape_cast %398 : vector<1x1x128xf32> to vector<128xf32>
    %400 = vector.shape_cast %399 : vector<128xf32> to vector<1x1x128xf32>
    %401 = vector.broadcast %400 : vector<1x1x128xf32> to vector<2x16x128xf32>
    %402 = arith.mulf %379, %401 : vector<2x16x128xf32>
    %403 = arith.addf %377, %402 : vector<2x16x128xf32>
    %c0_188 = arith.constant 0 : index
    %c1_189 = arith.constant 1 : index
    %c2_190 = arith.constant 2 : index
    %c0_191 = arith.constant 0 : index
    %404 = vector.load %arg3[%c0_188, %c1_189, %c2_190, %c0_191] : memref<2x4x18x72xf32, #tpu.memory_space<vmem>>, vector<2x1x16x72xf32>
    %405 = vector.shape_cast %404 : vector<2x1x16x72xf32> to vector<2x16x72xf32>
    %406 = vector.extract_strided_slice %405 {offsets = [0, 0, 0], sizes = [2, 16, 64], strides = [1, 1, 1]} : vector<2x16x72xf32> to vector<2x16x64xf32>
    %407 = tpu.concatenate %406, %406 in 2 : vector<2x16x64xf32>, vector<2x16x64xf32> -> vector<2x16x128xf32>
    %c0_192 = arith.constant 0 : index
    %c15 = arith.constant 15 : index
    %c0_193 = arith.constant 0 : index
    %408 = vector.load %arg1[%c0_192, %c15, %c0_193] : memref<4x36x128xf32, #tpu.memory_space<vmem>>, vector<1x1x128xf32>
    %409 = vector.shape_cast %408 : vector<1x1x128xf32> to vector<128xf32>
    %410 = vector.shape_cast %409 : vector<128xf32> to vector<1x1x128xf32>
    %411 = vector.broadcast %410 : vector<1x1x128xf32> to vector<2x16x128xf32>
    %412 = arith.mulf %407, %411 : vector<2x16x128xf32>
    %413 = arith.addf %385, %412 : vector<2x16x128xf32>
    %c1_194 = arith.constant 1 : index
    %c15_195 = arith.constant 15 : index
    %c0_196 = arith.constant 0 : index
    %414 = vector.load %arg1[%c1_194, %c15_195, %c0_196] : memref<4x36x128xf32, #tpu.memory_space<vmem>>, vector<1x1x128xf32>
    %415 = vector.shape_cast %414 : vector<1x1x128xf32> to vector<128xf32>
    %416 = vector.shape_cast %415 : vector<128xf32> to vector<1x1x128xf32>
    %417 = vector.broadcast %416 : vector<1x1x128xf32> to vector<2x16x128xf32>
    %418 = arith.mulf %407, %417 : vector<2x16x128xf32>
    %419 = arith.addf %391, %418 : vector<2x16x128xf32>
    %c2_197 = arith.constant 2 : index
    %c15_198 = arith.constant 15 : index
    %c0_199 = arith.constant 0 : index
    %420 = vector.load %arg1[%c2_197, %c15_198, %c0_199] : memref<4x36x128xf32, #tpu.memory_space<vmem>>, vector<1x1x128xf32>
    %421 = vector.shape_cast %420 : vector<1x1x128xf32> to vector<128xf32>
    %422 = vector.shape_cast %421 : vector<128xf32> to vector<1x1x128xf32>
    %423 = vector.broadcast %422 : vector<1x1x128xf32> to vector<2x16x128xf32>
    %424 = arith.mulf %407, %423 : vector<2x16x128xf32>
    %425 = arith.addf %397, %424 : vector<2x16x128xf32>
    %c3_200 = arith.constant 3 : index
    %c15_201 = arith.constant 15 : index
    %c0_202 = arith.constant 0 : index
    %426 = vector.load %arg1[%c3_200, %c15_201, %c0_202] : memref<4x36x128xf32, #tpu.memory_space<vmem>>, vector<1x1x128xf32>
    %427 = vector.shape_cast %426 : vector<1x1x128xf32> to vector<128xf32>
    %428 = vector.shape_cast %427 : vector<128xf32> to vector<1x1x128xf32>
    %429 = vector.broadcast %428 : vector<1x1x128xf32> to vector<2x16x128xf32>
    %430 = arith.mulf %407, %429 : vector<2x16x128xf32>
    %431 = arith.addf %403, %430 : vector<2x16x128xf32>
    %432 = vector.extract_strided_slice %405 {offsets = [0, 0, 4], sizes = [2, 16, 64], strides = [1, 1, 1]} : vector<2x16x72xf32> to vector<2x16x64xf32>
    %433 = tpu.concatenate %432, %432 in 2 : vector<2x16x64xf32>, vector<2x16x64xf32> -> vector<2x16x128xf32>
    %c0_203 = arith.constant 0 : index
    %c16 = arith.constant 16 : index
    %c0_204 = arith.constant 0 : index
    %434 = vector.load %arg1[%c0_203, %c16, %c0_204] : memref<4x36x128xf32, #tpu.memory_space<vmem>>, vector<1x1x128xf32>
    %435 = vector.shape_cast %434 : vector<1x1x128xf32> to vector<128xf32>
    %436 = vector.shape_cast %435 : vector<128xf32> to vector<1x1x128xf32>
    %437 = vector.broadcast %436 : vector<1x1x128xf32> to vector<2x16x128xf32>
    %438 = arith.mulf %433, %437 : vector<2x16x128xf32>
    %439 = arith.addf %413, %438 : vector<2x16x128xf32>
    %c1_205 = arith.constant 1 : index
    %c16_206 = arith.constant 16 : index
    %c0_207 = arith.constant 0 : index
    %440 = vector.load %arg1[%c1_205, %c16_206, %c0_207] : memref<4x36x128xf32, #tpu.memory_space<vmem>>, vector<1x1x128xf32>
    %441 = vector.shape_cast %440 : vector<1x1x128xf32> to vector<128xf32>
    %442 = vector.shape_cast %441 : vector<128xf32> to vector<1x1x128xf32>
    %443 = vector.broadcast %442 : vector<1x1x128xf32> to vector<2x16x128xf32>
    %444 = arith.mulf %433, %443 : vector<2x16x128xf32>
    %445 = arith.addf %419, %444 : vector<2x16x128xf32>
    %c2_208 = arith.constant 2 : index
    %c16_209 = arith.constant 16 : index
    %c0_210 = arith.constant 0 : index
    %446 = vector.load %arg1[%c2_208, %c16_209, %c0_210] : memref<4x36x128xf32, #tpu.memory_space<vmem>>, vector<1x1x128xf32>
    %447 = vector.shape_cast %446 : vector<1x1x128xf32> to vector<128xf32>
    %448 = vector.shape_cast %447 : vector<128xf32> to vector<1x1x128xf32>
    %449 = vector.broadcast %448 : vector<1x1x128xf32> to vector<2x16x128xf32>
    %450 = arith.mulf %433, %449 : vector<2x16x128xf32>
    %451 = arith.addf %425, %450 : vector<2x16x128xf32>
    %c3_211 = arith.constant 3 : index
    %c16_212 = arith.constant 16 : index
    %c0_213 = arith.constant 0 : index
    %452 = vector.load %arg1[%c3_211, %c16_212, %c0_213] : memref<4x36x128xf32, #tpu.memory_space<vmem>>, vector<1x1x128xf32>
    %453 = vector.shape_cast %452 : vector<1x1x128xf32> to vector<128xf32>
    %454 = vector.shape_cast %453 : vector<128xf32> to vector<1x1x128xf32>
    %455 = vector.broadcast %454 : vector<1x1x128xf32> to vector<2x16x128xf32>
    %456 = arith.mulf %433, %455 : vector<2x16x128xf32>
    %457 = arith.addf %431, %456 : vector<2x16x128xf32>
    %458 = vector.extract_strided_slice %405 {offsets = [0, 0, 8], sizes = [2, 16, 64], strides = [1, 1, 1]} : vector<2x16x72xf32> to vector<2x16x64xf32>
    %459 = tpu.concatenate %458, %458 in 2 : vector<2x16x64xf32>, vector<2x16x64xf32> -> vector<2x16x128xf32>
    %c0_214 = arith.constant 0 : index
    %c17 = arith.constant 17 : index
    %c0_215 = arith.constant 0 : index
    %460 = vector.load %arg1[%c0_214, %c17, %c0_215] : memref<4x36x128xf32, #tpu.memory_space<vmem>>, vector<1x1x128xf32>
    %461 = vector.shape_cast %460 : vector<1x1x128xf32> to vector<128xf32>
    %462 = vector.shape_cast %461 : vector<128xf32> to vector<1x1x128xf32>
    %463 = vector.broadcast %462 : vector<1x1x128xf32> to vector<2x16x128xf32>
    %464 = arith.mulf %459, %463 : vector<2x16x128xf32>
    %465 = arith.addf %439, %464 : vector<2x16x128xf32>
    %c1_216 = arith.constant 1 : index
    %c17_217 = arith.constant 17 : index
    %c0_218 = arith.constant 0 : index
    %466 = vector.load %arg1[%c1_216, %c17_217, %c0_218] : memref<4x36x128xf32, #tpu.memory_space<vmem>>, vector<1x1x128xf32>
    %467 = vector.shape_cast %466 : vector<1x1x128xf32> to vector<128xf32>
    %468 = vector.shape_cast %467 : vector<128xf32> to vector<1x1x128xf32>
    %469 = vector.broadcast %468 : vector<1x1x128xf32> to vector<2x16x128xf32>
    %470 = arith.mulf %459, %469 : vector<2x16x128xf32>
    %471 = arith.addf %445, %470 : vector<2x16x128xf32>
    %c2_219 = arith.constant 2 : index
    %c17_220 = arith.constant 17 : index
    %c0_221 = arith.constant 0 : index
    %472 = vector.load %arg1[%c2_219, %c17_220, %c0_221] : memref<4x36x128xf32, #tpu.memory_space<vmem>>, vector<1x1x128xf32>
    %473 = vector.shape_cast %472 : vector<1x1x128xf32> to vector<128xf32>
    %474 = vector.shape_cast %473 : vector<128xf32> to vector<1x1x128xf32>
    %475 = vector.broadcast %474 : vector<1x1x128xf32> to vector<2x16x128xf32>
    %476 = arith.mulf %459, %475 : vector<2x16x128xf32>
    %477 = arith.addf %451, %476 : vector<2x16x128xf32>
    %c3_222 = arith.constant 3 : index
    %c17_223 = arith.constant 17 : index
    %c0_224 = arith.constant 0 : index
    %478 = vector.load %arg1[%c3_222, %c17_223, %c0_224] : memref<4x36x128xf32, #tpu.memory_space<vmem>>, vector<1x1x128xf32>
    %479 = vector.shape_cast %478 : vector<1x1x128xf32> to vector<128xf32>
    %480 = vector.shape_cast %479 : vector<128xf32> to vector<1x1x128xf32>
    %481 = vector.broadcast %480 : vector<1x1x128xf32> to vector<2x16x128xf32>
    %482 = arith.mulf %459, %481 : vector<2x16x128xf32>
    %483 = arith.addf %457, %482 : vector<2x16x128xf32>
    %c0_225 = arith.constant 0 : index
    %c2_226 = arith.constant 2 : index
    %c0_227 = arith.constant 0 : index
    %c0_228 = arith.constant 0 : index
    %484 = vector.load %arg3[%c0_225, %c2_226, %c0_227, %c0_228] : memref<2x4x18x72xf32, #tpu.memory_space<vmem>>, vector<2x1x16x72xf32>
    %485 = vector.shape_cast %484 : vector<2x1x16x72xf32> to vector<2x16x72xf32>
    %486 = vector.extract_strided_slice %485 {offsets = [0, 0, 0], sizes = [2, 16, 64], strides = [1, 1, 1]} : vector<2x16x72xf32> to vector<2x16x64xf32>
    %487 = tpu.concatenate %486, %486 in 2 : vector<2x16x64xf32>, vector<2x16x64xf32> -> vector<2x16x128xf32>
    %c0_229 = arith.constant 0 : index
    %c18 = arith.constant 18 : index
    %c0_230 = arith.constant 0 : index
    %488 = vector.load %arg1[%c0_229, %c18, %c0_230] : memref<4x36x128xf32, #tpu.memory_space<vmem>>, vector<1x1x128xf32>
    %489 = vector.shape_cast %488 : vector<1x1x128xf32> to vector<128xf32>
    %490 = vector.shape_cast %489 : vector<128xf32> to vector<1x1x128xf32>
    %491 = vector.broadcast %490 : vector<1x1x128xf32> to vector<2x16x128xf32>
    %492 = arith.mulf %487, %491 : vector<2x16x128xf32>
    %493 = arith.addf %465, %492 : vector<2x16x128xf32>
    %c1_231 = arith.constant 1 : index
    %c18_232 = arith.constant 18 : index
    %c0_233 = arith.constant 0 : index
    %494 = vector.load %arg1[%c1_231, %c18_232, %c0_233] : memref<4x36x128xf32, #tpu.memory_space<vmem>>, vector<1x1x128xf32>
    %495 = vector.shape_cast %494 : vector<1x1x128xf32> to vector<128xf32>
    %496 = vector.shape_cast %495 : vector<128xf32> to vector<1x1x128xf32>
    %497 = vector.broadcast %496 : vector<1x1x128xf32> to vector<2x16x128xf32>
    %498 = arith.mulf %487, %497 : vector<2x16x128xf32>
    %499 = arith.addf %471, %498 : vector<2x16x128xf32>
    %c2_234 = arith.constant 2 : index
    %c18_235 = arith.constant 18 : index
    %c0_236 = arith.constant 0 : index
    %500 = vector.load %arg1[%c2_234, %c18_235, %c0_236] : memref<4x36x128xf32, #tpu.memory_space<vmem>>, vector<1x1x128xf32>
    %501 = vector.shape_cast %500 : vector<1x1x128xf32> to vector<128xf32>
    %502 = vector.shape_cast %501 : vector<128xf32> to vector<1x1x128xf32>
    %503 = vector.broadcast %502 : vector<1x1x128xf32> to vector<2x16x128xf32>
    %504 = arith.mulf %487, %503 : vector<2x16x128xf32>
    %505 = arith.addf %477, %504 : vector<2x16x128xf32>
    %c3_237 = arith.constant 3 : index
    %c18_238 = arith.constant 18 : index
    %c0_239 = arith.constant 0 : index
    %506 = vector.load %arg1[%c3_237, %c18_238, %c0_239] : memref<4x36x128xf32, #tpu.memory_space<vmem>>, vector<1x1x128xf32>
    %507 = vector.shape_cast %506 : vector<1x1x128xf32> to vector<128xf32>
    %508 = vector.shape_cast %507 : vector<128xf32> to vector<1x1x128xf32>
    %509 = vector.broadcast %508 : vector<1x1x128xf32> to vector<2x16x128xf32>
    %510 = arith.mulf %487, %509 : vector<2x16x128xf32>
    %511 = arith.addf %483, %510 : vector<2x16x128xf32>
    %512 = vector.extract_strided_slice %485 {offsets = [0, 0, 4], sizes = [2, 16, 64], strides = [1, 1, 1]} : vector<2x16x72xf32> to vector<2x16x64xf32>
    %513 = tpu.concatenate %512, %512 in 2 : vector<2x16x64xf32>, vector<2x16x64xf32> -> vector<2x16x128xf32>
    %c0_240 = arith.constant 0 : index
    %c19 = arith.constant 19 : index
    %c0_241 = arith.constant 0 : index
    %514 = vector.load %arg1[%c0_240, %c19, %c0_241] : memref<4x36x128xf32, #tpu.memory_space<vmem>>, vector<1x1x128xf32>
    %515 = vector.shape_cast %514 : vector<1x1x128xf32> to vector<128xf32>
    %516 = vector.shape_cast %515 : vector<128xf32> to vector<1x1x128xf32>
    %517 = vector.broadcast %516 : vector<1x1x128xf32> to vector<2x16x128xf32>
    %518 = arith.mulf %513, %517 : vector<2x16x128xf32>
    %519 = arith.addf %493, %518 : vector<2x16x128xf32>
    %c1_242 = arith.constant 1 : index
    %c19_243 = arith.constant 19 : index
    %c0_244 = arith.constant 0 : index
    %520 = vector.load %arg1[%c1_242, %c19_243, %c0_244] : memref<4x36x128xf32, #tpu.memory_space<vmem>>, vector<1x1x128xf32>
    %521 = vector.shape_cast %520 : vector<1x1x128xf32> to vector<128xf32>
    %522 = vector.shape_cast %521 : vector<128xf32> to vector<1x1x128xf32>
    %523 = vector.broadcast %522 : vector<1x1x128xf32> to vector<2x16x128xf32>
    %524 = arith.mulf %513, %523 : vector<2x16x128xf32>
    %525 = arith.addf %499, %524 : vector<2x16x128xf32>
    %c2_245 = arith.constant 2 : index
    %c19_246 = arith.constant 19 : index
    %c0_247 = arith.constant 0 : index
    %526 = vector.load %arg1[%c2_245, %c19_246, %c0_247] : memref<4x36x128xf32, #tpu.memory_space<vmem>>, vector<1x1x128xf32>
    %527 = vector.shape_cast %526 : vector<1x1x128xf32> to vector<128xf32>
    %528 = vector.shape_cast %527 : vector<128xf32> to vector<1x1x128xf32>
    %529 = vector.broadcast %528 : vector<1x1x128xf32> to vector<2x16x128xf32>
    %530 = arith.mulf %513, %529 : vector<2x16x128xf32>
    %531 = arith.addf %505, %530 : vector<2x16x128xf32>
    %c3_248 = arith.constant 3 : index
    %c19_249 = arith.constant 19 : index
    %c0_250 = arith.constant 0 : index
    %532 = vector.load %arg1[%c3_248, %c19_249, %c0_250] : memref<4x36x128xf32, #tpu.memory_space<vmem>>, vector<1x1x128xf32>
    %533 = vector.shape_cast %532 : vector<1x1x128xf32> to vector<128xf32>
    %534 = vector.shape_cast %533 : vector<128xf32> to vector<1x1x128xf32>
    %535 = vector.broadcast %534 : vector<1x1x128xf32> to vector<2x16x128xf32>
    %536 = arith.mulf %513, %535 : vector<2x16x128xf32>
    %537 = arith.addf %511, %536 : vector<2x16x128xf32>
    %538 = vector.extract_strided_slice %485 {offsets = [0, 0, 8], sizes = [2, 16, 64], strides = [1, 1, 1]} : vector<2x16x72xf32> to vector<2x16x64xf32>
    %539 = tpu.concatenate %538, %538 in 2 : vector<2x16x64xf32>, vector<2x16x64xf32> -> vector<2x16x128xf32>
    %c0_251 = arith.constant 0 : index
    %c20 = arith.constant 20 : index
    %c0_252 = arith.constant 0 : index
    %540 = vector.load %arg1[%c0_251, %c20, %c0_252] : memref<4x36x128xf32, #tpu.memory_space<vmem>>, vector<1x1x128xf32>
    %541 = vector.shape_cast %540 : vector<1x1x128xf32> to vector<128xf32>
    %542 = vector.shape_cast %541 : vector<128xf32> to vector<1x1x128xf32>
    %543 = vector.broadcast %542 : vector<1x1x128xf32> to vector<2x16x128xf32>
    %544 = arith.mulf %539, %543 : vector<2x16x128xf32>
    %545 = arith.addf %519, %544 : vector<2x16x128xf32>
    %c1_253 = arith.constant 1 : index
    %c20_254 = arith.constant 20 : index
    %c0_255 = arith.constant 0 : index
    %546 = vector.load %arg1[%c1_253, %c20_254, %c0_255] : memref<4x36x128xf32, #tpu.memory_space<vmem>>, vector<1x1x128xf32>
    %547 = vector.shape_cast %546 : vector<1x1x128xf32> to vector<128xf32>
    %548 = vector.shape_cast %547 : vector<128xf32> to vector<1x1x128xf32>
    %549 = vector.broadcast %548 : vector<1x1x128xf32> to vector<2x16x128xf32>
    %550 = arith.mulf %539, %549 : vector<2x16x128xf32>
    %551 = arith.addf %525, %550 : vector<2x16x128xf32>
    %c2_256 = arith.constant 2 : index
    %c20_257 = arith.constant 20 : index
    %c0_258 = arith.constant 0 : index
    %552 = vector.load %arg1[%c2_256, %c20_257, %c0_258] : memref<4x36x128xf32, #tpu.memory_space<vmem>>, vector<1x1x128xf32>
    %553 = vector.shape_cast %552 : vector<1x1x128xf32> to vector<128xf32>
    %554 = vector.shape_cast %553 : vector<128xf32> to vector<1x1x128xf32>
    %555 = vector.broadcast %554 : vector<1x1x128xf32> to vector<2x16x128xf32>
    %556 = arith.mulf %539, %555 : vector<2x16x128xf32>
    %557 = arith.addf %531, %556 : vector<2x16x128xf32>
    %c3_259 = arith.constant 3 : index
    %c20_260 = arith.constant 20 : index
    %c0_261 = arith.constant 0 : index
    %558 = vector.load %arg1[%c3_259, %c20_260, %c0_261] : memref<4x36x128xf32, #tpu.memory_space<vmem>>, vector<1x1x128xf32>
    %559 = vector.shape_cast %558 : vector<1x1x128xf32> to vector<128xf32>
    %560 = vector.shape_cast %559 : vector<128xf32> to vector<1x1x128xf32>
    %561 = vector.broadcast %560 : vector<1x1x128xf32> to vector<2x16x128xf32>
    %562 = arith.mulf %539, %561 : vector<2x16x128xf32>
    %563 = arith.addf %537, %562 : vector<2x16x128xf32>
    %c0_262 = arith.constant 0 : index
    %c2_263 = arith.constant 2 : index
    %c1_264 = arith.constant 1 : index
    %c0_265 = arith.constant 0 : index
    %564 = vector.load %arg3[%c0_262, %c2_263, %c1_264, %c0_265] : memref<2x4x18x72xf32, #tpu.memory_space<vmem>>, vector<2x1x16x72xf32>
    %565 = vector.shape_cast %564 : vector<2x1x16x72xf32> to vector<2x16x72xf32>
    %566 = vector.extract_strided_slice %565 {offsets = [0, 0, 0], sizes = [2, 16, 64], strides = [1, 1, 1]} : vector<2x16x72xf32> to vector<2x16x64xf32>
    %567 = tpu.concatenate %566, %566 in 2 : vector<2x16x64xf32>, vector<2x16x64xf32> -> vector<2x16x128xf32>
    %c0_266 = arith.constant 0 : index
    %c21 = arith.constant 21 : index
    %c0_267 = arith.constant 0 : index
    %568 = vector.load %arg1[%c0_266, %c21, %c0_267] : memref<4x36x128xf32, #tpu.memory_space<vmem>>, vector<1x1x128xf32>
    %569 = vector.shape_cast %568 : vector<1x1x128xf32> to vector<128xf32>
    %570 = vector.shape_cast %569 : vector<128xf32> to vector<1x1x128xf32>
    %571 = vector.broadcast %570 : vector<1x1x128xf32> to vector<2x16x128xf32>
    %572 = arith.mulf %567, %571 : vector<2x16x128xf32>
    %573 = arith.addf %545, %572 : vector<2x16x128xf32>
    %c1_268 = arith.constant 1 : index
    %c21_269 = arith.constant 21 : index
    %c0_270 = arith.constant 0 : index
    %574 = vector.load %arg1[%c1_268, %c21_269, %c0_270] : memref<4x36x128xf32, #tpu.memory_space<vmem>>, vector<1x1x128xf32>
    %575 = vector.shape_cast %574 : vector<1x1x128xf32> to vector<128xf32>
    %576 = vector.shape_cast %575 : vector<128xf32> to vector<1x1x128xf32>
    %577 = vector.broadcast %576 : vector<1x1x128xf32> to vector<2x16x128xf32>
    %578 = arith.mulf %567, %577 : vector<2x16x128xf32>
    %579 = arith.addf %551, %578 : vector<2x16x128xf32>
    %c2_271 = arith.constant 2 : index
    %c21_272 = arith.constant 21 : index
    %c0_273 = arith.constant 0 : index
    %580 = vector.load %arg1[%c2_271, %c21_272, %c0_273] : memref<4x36x128xf32, #tpu.memory_space<vmem>>, vector<1x1x128xf32>
    %581 = vector.shape_cast %580 : vector<1x1x128xf32> to vector<128xf32>
    %582 = vector.shape_cast %581 : vector<128xf32> to vector<1x1x128xf32>
    %583 = vector.broadcast %582 : vector<1x1x128xf32> to vector<2x16x128xf32>
    %584 = arith.mulf %567, %583 : vector<2x16x128xf32>
    %585 = arith.addf %557, %584 : vector<2x16x128xf32>
    %c3_274 = arith.constant 3 : index
    %c21_275 = arith.constant 21 : index
    %c0_276 = arith.constant 0 : index
    %586 = vector.load %arg1[%c3_274, %c21_275, %c0_276] : memref<4x36x128xf32, #tpu.memory_space<vmem>>, vector<1x1x128xf32>
    %587 = vector.shape_cast %586 : vector<1x1x128xf32> to vector<128xf32>
    %588 = vector.shape_cast %587 : vector<128xf32> to vector<1x1x128xf32>
    %589 = vector.broadcast %588 : vector<1x1x128xf32> to vector<2x16x128xf32>
    %590 = arith.mulf %567, %589 : vector<2x16x128xf32>
    %591 = arith.addf %563, %590 : vector<2x16x128xf32>
    %592 = vector.extract_strided_slice %565 {offsets = [0, 0, 4], sizes = [2, 16, 64], strides = [1, 1, 1]} : vector<2x16x72xf32> to vector<2x16x64xf32>
    %593 = tpu.concatenate %592, %592 in 2 : vector<2x16x64xf32>, vector<2x16x64xf32> -> vector<2x16x128xf32>
    %c0_277 = arith.constant 0 : index
    %c22 = arith.constant 22 : index
    %c0_278 = arith.constant 0 : index
    %594 = vector.load %arg1[%c0_277, %c22, %c0_278] : memref<4x36x128xf32, #tpu.memory_space<vmem>>, vector<1x1x128xf32>
    %595 = vector.shape_cast %594 : vector<1x1x128xf32> to vector<128xf32>
    %596 = vector.shape_cast %595 : vector<128xf32> to vector<1x1x128xf32>
    %597 = vector.broadcast %596 : vector<1x1x128xf32> to vector<2x16x128xf32>
    %598 = arith.mulf %593, %597 : vector<2x16x128xf32>
    %599 = arith.addf %573, %598 : vector<2x16x128xf32>
    %c1_279 = arith.constant 1 : index
    %c22_280 = arith.constant 22 : index
    %c0_281 = arith.constant 0 : index
    %600 = vector.load %arg1[%c1_279, %c22_280, %c0_281] : memref<4x36x128xf32, #tpu.memory_space<vmem>>, vector<1x1x128xf32>
    %601 = vector.shape_cast %600 : vector<1x1x128xf32> to vector<128xf32>
    %602 = vector.shape_cast %601 : vector<128xf32> to vector<1x1x128xf32>
    %603 = vector.broadcast %602 : vector<1x1x128xf32> to vector<2x16x128xf32>
    %604 = arith.mulf %593, %603 : vector<2x16x128xf32>
    %605 = arith.addf %579, %604 : vector<2x16x128xf32>
    %c2_282 = arith.constant 2 : index
    %c22_283 = arith.constant 22 : index
    %c0_284 = arith.constant 0 : index
    %606 = vector.load %arg1[%c2_282, %c22_283, %c0_284] : memref<4x36x128xf32, #tpu.memory_space<vmem>>, vector<1x1x128xf32>
    %607 = vector.shape_cast %606 : vector<1x1x128xf32> to vector<128xf32>
    %608 = vector.shape_cast %607 : vector<128xf32> to vector<1x1x128xf32>
    %609 = vector.broadcast %608 : vector<1x1x128xf32> to vector<2x16x128xf32>
    %610 = arith.mulf %593, %609 : vector<2x16x128xf32>
    %611 = arith.addf %585, %610 : vector<2x16x128xf32>
    %c3_285 = arith.constant 3 : index
    %c22_286 = arith.constant 22 : index
    %c0_287 = arith.constant 0 : index
    %612 = vector.load %arg1[%c3_285, %c22_286, %c0_287] : memref<4x36x128xf32, #tpu.memory_space<vmem>>, vector<1x1x128xf32>
    %613 = vector.shape_cast %612 : vector<1x1x128xf32> to vector<128xf32>
    %614 = vector.shape_cast %613 : vector<128xf32> to vector<1x1x128xf32>
    %615 = vector.broadcast %614 : vector<1x1x128xf32> to vector<2x16x128xf32>
    %616 = arith.mulf %593, %615 : vector<2x16x128xf32>
    %617 = arith.addf %591, %616 : vector<2x16x128xf32>
    %618 = vector.extract_strided_slice %565 {offsets = [0, 0, 8], sizes = [2, 16, 64], strides = [1, 1, 1]} : vector<2x16x72xf32> to vector<2x16x64xf32>
    %619 = tpu.concatenate %618, %618 in 2 : vector<2x16x64xf32>, vector<2x16x64xf32> -> vector<2x16x128xf32>
    %c0_288 = arith.constant 0 : index
    %c23 = arith.constant 23 : index
    %c0_289 = arith.constant 0 : index
    %620 = vector.load %arg1[%c0_288, %c23, %c0_289] : memref<4x36x128xf32, #tpu.memory_space<vmem>>, vector<1x1x128xf32>
    %621 = vector.shape_cast %620 : vector<1x1x128xf32> to vector<128xf32>
    %622 = vector.shape_cast %621 : vector<128xf32> to vector<1x1x128xf32>
    %623 = vector.broadcast %622 : vector<1x1x128xf32> to vector<2x16x128xf32>
    %624 = arith.mulf %619, %623 : vector<2x16x128xf32>
    %625 = arith.addf %599, %624 : vector<2x16x128xf32>
    %c1_290 = arith.constant 1 : index
    %c23_291 = arith.constant 23 : index
    %c0_292 = arith.constant 0 : index
    %626 = vector.load %arg1[%c1_290, %c23_291, %c0_292] : memref<4x36x128xf32, #tpu.memory_space<vmem>>, vector<1x1x128xf32>
    %627 = vector.shape_cast %626 : vector<1x1x128xf32> to vector<128xf32>
    %628 = vector.shape_cast %627 : vector<128xf32> to vector<1x1x128xf32>
    %629 = vector.broadcast %628 : vector<1x1x128xf32> to vector<2x16x128xf32>
    %630 = arith.mulf %619, %629 : vector<2x16x128xf32>
    %631 = arith.addf %605, %630 : vector<2x16x128xf32>
    %c2_293 = arith.constant 2 : index
    %c23_294 = arith.constant 23 : index
    %c0_295 = arith.constant 0 : index
    %632 = vector.load %arg1[%c2_293, %c23_294, %c0_295] : memref<4x36x128xf32, #tpu.memory_space<vmem>>, vector<1x1x128xf32>
    %633 = vector.shape_cast %632 : vector<1x1x128xf32> to vector<128xf32>
    %634 = vector.shape_cast %633 : vector<128xf32> to vector<1x1x128xf32>
    %635 = vector.broadcast %634 : vector<1x1x128xf32> to vector<2x16x128xf32>
    %636 = arith.mulf %619, %635 : vector<2x16x128xf32>
    %637 = arith.addf %611, %636 : vector<2x16x128xf32>
    %c3_296 = arith.constant 3 : index
    %c23_297 = arith.constant 23 : index
    %c0_298 = arith.constant 0 : index
    %638 = vector.load %arg1[%c3_296, %c23_297, %c0_298] : memref<4x36x128xf32, #tpu.memory_space<vmem>>, vector<1x1x128xf32>
    %639 = vector.shape_cast %638 : vector<1x1x128xf32> to vector<128xf32>
    %640 = vector.shape_cast %639 : vector<128xf32> to vector<1x1x128xf32>
    %641 = vector.broadcast %640 : vector<1x1x128xf32> to vector<2x16x128xf32>
    %642 = arith.mulf %619, %641 : vector<2x16x128xf32>
    %643 = arith.addf %617, %642 : vector<2x16x128xf32>
    %c0_299 = arith.constant 0 : index
    %c2_300 = arith.constant 2 : index
    %c2_301 = arith.constant 2 : index
    %c0_302 = arith.constant 0 : index
    %644 = vector.load %arg3[%c0_299, %c2_300, %c2_301, %c0_302] : memref<2x4x18x72xf32, #tpu.memory_space<vmem>>, vector<2x1x16x72xf32>
    %645 = vector.shape_cast %644 : vector<2x1x16x72xf32> to vector<2x16x72xf32>
    %646 = vector.extract_strided_slice %645 {offsets = [0, 0, 0], sizes = [2, 16, 64], strides = [1, 1, 1]} : vector<2x16x72xf32> to vector<2x16x64xf32>
    %647 = tpu.concatenate %646, %646 in 2 : vector<2x16x64xf32>, vector<2x16x64xf32> -> vector<2x16x128xf32>
    %c0_303 = arith.constant 0 : index
    %c24 = arith.constant 24 : index
    %c0_304 = arith.constant 0 : index
    %648 = vector.load %arg1[%c0_303, %c24, %c0_304] : memref<4x36x128xf32, #tpu.memory_space<vmem>>, vector<1x1x128xf32>
    %649 = vector.shape_cast %648 : vector<1x1x128xf32> to vector<128xf32>
    %650 = vector.shape_cast %649 : vector<128xf32> to vector<1x1x128xf32>
    %651 = vector.broadcast %650 : vector<1x1x128xf32> to vector<2x16x128xf32>
    %652 = arith.mulf %647, %651 : vector<2x16x128xf32>
    %653 = arith.addf %625, %652 : vector<2x16x128xf32>
    %c1_305 = arith.constant 1 : index
    %c24_306 = arith.constant 24 : index
    %c0_307 = arith.constant 0 : index
    %654 = vector.load %arg1[%c1_305, %c24_306, %c0_307] : memref<4x36x128xf32, #tpu.memory_space<vmem>>, vector<1x1x128xf32>
    %655 = vector.shape_cast %654 : vector<1x1x128xf32> to vector<128xf32>
    %656 = vector.shape_cast %655 : vector<128xf32> to vector<1x1x128xf32>
    %657 = vector.broadcast %656 : vector<1x1x128xf32> to vector<2x16x128xf32>
    %658 = arith.mulf %647, %657 : vector<2x16x128xf32>
    %659 = arith.addf %631, %658 : vector<2x16x128xf32>
    %c2_308 = arith.constant 2 : index
    %c24_309 = arith.constant 24 : index
    %c0_310 = arith.constant 0 : index
    %660 = vector.load %arg1[%c2_308, %c24_309, %c0_310] : memref<4x36x128xf32, #tpu.memory_space<vmem>>, vector<1x1x128xf32>
    %661 = vector.shape_cast %660 : vector<1x1x128xf32> to vector<128xf32>
    %662 = vector.shape_cast %661 : vector<128xf32> to vector<1x1x128xf32>
    %663 = vector.broadcast %662 : vector<1x1x128xf32> to vector<2x16x128xf32>
    %664 = arith.mulf %647, %663 : vector<2x16x128xf32>
    %665 = arith.addf %637, %664 : vector<2x16x128xf32>
    %c3_311 = arith.constant 3 : index
    %c24_312 = arith.constant 24 : index
    %c0_313 = arith.constant 0 : index
    %666 = vector.load %arg1[%c3_311, %c24_312, %c0_313] : memref<4x36x128xf32, #tpu.memory_space<vmem>>, vector<1x1x128xf32>
    %667 = vector.shape_cast %666 : vector<1x1x128xf32> to vector<128xf32>
    %668 = vector.shape_cast %667 : vector<128xf32> to vector<1x1x128xf32>
    %669 = vector.broadcast %668 : vector<1x1x128xf32> to vector<2x16x128xf32>
    %670 = arith.mulf %647, %669 : vector<2x16x128xf32>
    %671 = arith.addf %643, %670 : vector<2x16x128xf32>
    %672 = vector.extract_strided_slice %645 {offsets = [0, 0, 4], sizes = [2, 16, 64], strides = [1, 1, 1]} : vector<2x16x72xf32> to vector<2x16x64xf32>
    %673 = tpu.concatenate %672, %672 in 2 : vector<2x16x64xf32>, vector<2x16x64xf32> -> vector<2x16x128xf32>
    %c0_314 = arith.constant 0 : index
    %c25 = arith.constant 25 : index
    %c0_315 = arith.constant 0 : index
    %674 = vector.load %arg1[%c0_314, %c25, %c0_315] : memref<4x36x128xf32, #tpu.memory_space<vmem>>, vector<1x1x128xf32>
    %675 = vector.shape_cast %674 : vector<1x1x128xf32> to vector<128xf32>
    %676 = vector.shape_cast %675 : vector<128xf32> to vector<1x1x128xf32>
    %677 = vector.broadcast %676 : vector<1x1x128xf32> to vector<2x16x128xf32>
    %678 = arith.mulf %673, %677 : vector<2x16x128xf32>
    %679 = arith.addf %653, %678 : vector<2x16x128xf32>
    %c1_316 = arith.constant 1 : index
    %c25_317 = arith.constant 25 : index
    %c0_318 = arith.constant 0 : index
    %680 = vector.load %arg1[%c1_316, %c25_317, %c0_318] : memref<4x36x128xf32, #tpu.memory_space<vmem>>, vector<1x1x128xf32>
    %681 = vector.shape_cast %680 : vector<1x1x128xf32> to vector<128xf32>
    %682 = vector.shape_cast %681 : vector<128xf32> to vector<1x1x128xf32>
    %683 = vector.broadcast %682 : vector<1x1x128xf32> to vector<2x16x128xf32>
    %684 = arith.mulf %673, %683 : vector<2x16x128xf32>
    %685 = arith.addf %659, %684 : vector<2x16x128xf32>
    %c2_319 = arith.constant 2 : index
    %c25_320 = arith.constant 25 : index
    %c0_321 = arith.constant 0 : index
    %686 = vector.load %arg1[%c2_319, %c25_320, %c0_321] : memref<4x36x128xf32, #tpu.memory_space<vmem>>, vector<1x1x128xf32>
    %687 = vector.shape_cast %686 : vector<1x1x128xf32> to vector<128xf32>
    %688 = vector.shape_cast %687 : vector<128xf32> to vector<1x1x128xf32>
    %689 = vector.broadcast %688 : vector<1x1x128xf32> to vector<2x16x128xf32>
    %690 = arith.mulf %673, %689 : vector<2x16x128xf32>
    %691 = arith.addf %665, %690 : vector<2x16x128xf32>
    %c3_322 = arith.constant 3 : index
    %c25_323 = arith.constant 25 : index
    %c0_324 = arith.constant 0 : index
    %692 = vector.load %arg1[%c3_322, %c25_323, %c0_324] : memref<4x36x128xf32, #tpu.memory_space<vmem>>, vector<1x1x128xf32>
    %693 = vector.shape_cast %692 : vector<1x1x128xf32> to vector<128xf32>
    %694 = vector.shape_cast %693 : vector<128xf32> to vector<1x1x128xf32>
    %695 = vector.broadcast %694 : vector<1x1x128xf32> to vector<2x16x128xf32>
    %696 = arith.mulf %673, %695 : vector<2x16x128xf32>
    %697 = arith.addf %671, %696 : vector<2x16x128xf32>
    %698 = vector.extract_strided_slice %645 {offsets = [0, 0, 8], sizes = [2, 16, 64], strides = [1, 1, 1]} : vector<2x16x72xf32> to vector<2x16x64xf32>
    %699 = tpu.concatenate %698, %698 in 2 : vector<2x16x64xf32>, vector<2x16x64xf32> -> vector<2x16x128xf32>
    %c0_325 = arith.constant 0 : index
    %c26 = arith.constant 26 : index
    %c0_326 = arith.constant 0 : index
    %700 = vector.load %arg1[%c0_325, %c26, %c0_326] : memref<4x36x128xf32, #tpu.memory_space<vmem>>, vector<1x1x128xf32>
    %701 = vector.shape_cast %700 : vector<1x1x128xf32> to vector<128xf32>
    %702 = vector.shape_cast %701 : vector<128xf32> to vector<1x1x128xf32>
    %703 = vector.broadcast %702 : vector<1x1x128xf32> to vector<2x16x128xf32>
    %704 = arith.mulf %699, %703 : vector<2x16x128xf32>
    %705 = arith.addf %679, %704 : vector<2x16x128xf32>
    %c1_327 = arith.constant 1 : index
    %c26_328 = arith.constant 26 : index
    %c0_329 = arith.constant 0 : index
    %706 = vector.load %arg1[%c1_327, %c26_328, %c0_329] : memref<4x36x128xf32, #tpu.memory_space<vmem>>, vector<1x1x128xf32>
    %707 = vector.shape_cast %706 : vector<1x1x128xf32> to vector<128xf32>
    %708 = vector.shape_cast %707 : vector<128xf32> to vector<1x1x128xf32>
    %709 = vector.broadcast %708 : vector<1x1x128xf32> to vector<2x16x128xf32>
    %710 = arith.mulf %699, %709 : vector<2x16x128xf32>
    %711 = arith.addf %685, %710 : vector<2x16x128xf32>
    %c2_330 = arith.constant 2 : index
    %c26_331 = arith.constant 26 : index
    %c0_332 = arith.constant 0 : index
    %712 = vector.load %arg1[%c2_330, %c26_331, %c0_332] : memref<4x36x128xf32, #tpu.memory_space<vmem>>, vector<1x1x128xf32>
    %713 = vector.shape_cast %712 : vector<1x1x128xf32> to vector<128xf32>
    %714 = vector.shape_cast %713 : vector<128xf32> to vector<1x1x128xf32>
    %715 = vector.broadcast %714 : vector<1x1x128xf32> to vector<2x16x128xf32>
    %716 = arith.mulf %699, %715 : vector<2x16x128xf32>
    %717 = arith.addf %691, %716 : vector<2x16x128xf32>
    %c3_333 = arith.constant 3 : index
    %c26_334 = arith.constant 26 : index
    %c0_335 = arith.constant 0 : index
    %718 = vector.load %arg1[%c3_333, %c26_334, %c0_335] : memref<4x36x128xf32, #tpu.memory_space<vmem>>, vector<1x1x128xf32>
    %719 = vector.shape_cast %718 : vector<1x1x128xf32> to vector<128xf32>
    %720 = vector.shape_cast %719 : vector<128xf32> to vector<1x1x128xf32>
    %721 = vector.broadcast %720 : vector<1x1x128xf32> to vector<2x16x128xf32>
    %722 = arith.mulf %699, %721 : vector<2x16x128xf32>
    %723 = arith.addf %697, %722 : vector<2x16x128xf32>
    %c0_336 = arith.constant 0 : index
    %c3_337 = arith.constant 3 : index
    %c0_338 = arith.constant 0 : index
    %c0_339 = arith.constant 0 : index
    %724 = vector.load %arg3[%c0_336, %c3_337, %c0_338, %c0_339] : memref<2x4x18x72xf32, #tpu.memory_space<vmem>>, vector<2x1x16x72xf32>
    %725 = vector.shape_cast %724 : vector<2x1x16x72xf32> to vector<2x16x72xf32>
    %726 = vector.extract_strided_slice %725 {offsets = [0, 0, 0], sizes = [2, 16, 64], strides = [1, 1, 1]} : vector<2x16x72xf32> to vector<2x16x64xf32>
    %727 = tpu.concatenate %726, %726 in 2 : vector<2x16x64xf32>, vector<2x16x64xf32> -> vector<2x16x128xf32>
    %c0_340 = arith.constant 0 : index
    %c27 = arith.constant 27 : index
    %c0_341 = arith.constant 0 : index
    %728 = vector.load %arg1[%c0_340, %c27, %c0_341] : memref<4x36x128xf32, #tpu.memory_space<vmem>>, vector<1x1x128xf32>
    %729 = vector.shape_cast %728 : vector<1x1x128xf32> to vector<128xf32>
    %730 = vector.shape_cast %729 : vector<128xf32> to vector<1x1x128xf32>
    %731 = vector.broadcast %730 : vector<1x1x128xf32> to vector<2x16x128xf32>
    %732 = arith.mulf %727, %731 : vector<2x16x128xf32>
    %733 = arith.addf %705, %732 : vector<2x16x128xf32>
    %c1_342 = arith.constant 1 : index
    %c27_343 = arith.constant 27 : index
    %c0_344 = arith.constant 0 : index
    %734 = vector.load %arg1[%c1_342, %c27_343, %c0_344] : memref<4x36x128xf32, #tpu.memory_space<vmem>>, vector<1x1x128xf32>
    %735 = vector.shape_cast %734 : vector<1x1x128xf32> to vector<128xf32>
    %736 = vector.shape_cast %735 : vector<128xf32> to vector<1x1x128xf32>
    %737 = vector.broadcast %736 : vector<1x1x128xf32> to vector<2x16x128xf32>
    %738 = arith.mulf %727, %737 : vector<2x16x128xf32>
    %739 = arith.addf %711, %738 : vector<2x16x128xf32>
    %c2_345 = arith.constant 2 : index
    %c27_346 = arith.constant 27 : index
    %c0_347 = arith.constant 0 : index
    %740 = vector.load %arg1[%c2_345, %c27_346, %c0_347] : memref<4x36x128xf32, #tpu.memory_space<vmem>>, vector<1x1x128xf32>
    %741 = vector.shape_cast %740 : vector<1x1x128xf32> to vector<128xf32>
    %742 = vector.shape_cast %741 : vector<128xf32> to vector<1x1x128xf32>
    %743 = vector.broadcast %742 : vector<1x1x128xf32> to vector<2x16x128xf32>
    %744 = arith.mulf %727, %743 : vector<2x16x128xf32>
    %745 = arith.addf %717, %744 : vector<2x16x128xf32>
    %c3_348 = arith.constant 3 : index
    %c27_349 = arith.constant 27 : index
    %c0_350 = arith.constant 0 : index
    %746 = vector.load %arg1[%c3_348, %c27_349, %c0_350] : memref<4x36x128xf32, #tpu.memory_space<vmem>>, vector<1x1x128xf32>
    %747 = vector.shape_cast %746 : vector<1x1x128xf32> to vector<128xf32>
    %748 = vector.shape_cast %747 : vector<128xf32> to vector<1x1x128xf32>
    %749 = vector.broadcast %748 : vector<1x1x128xf32> to vector<2x16x128xf32>
    %750 = arith.mulf %727, %749 : vector<2x16x128xf32>
    %751 = arith.addf %723, %750 : vector<2x16x128xf32>
    %752 = vector.extract_strided_slice %725 {offsets = [0, 0, 4], sizes = [2, 16, 64], strides = [1, 1, 1]} : vector<2x16x72xf32> to vector<2x16x64xf32>
    %753 = tpu.concatenate %752, %752 in 2 : vector<2x16x64xf32>, vector<2x16x64xf32> -> vector<2x16x128xf32>
    %c0_351 = arith.constant 0 : index
    %c28 = arith.constant 28 : index
    %c0_352 = arith.constant 0 : index
    %754 = vector.load %arg1[%c0_351, %c28, %c0_352] : memref<4x36x128xf32, #tpu.memory_space<vmem>>, vector<1x1x128xf32>
    %755 = vector.shape_cast %754 : vector<1x1x128xf32> to vector<128xf32>
    %756 = vector.shape_cast %755 : vector<128xf32> to vector<1x1x128xf32>
    %757 = vector.broadcast %756 : vector<1x1x128xf32> to vector<2x16x128xf32>
    %758 = arith.mulf %753, %757 : vector<2x16x128xf32>
    %759 = arith.addf %733, %758 : vector<2x16x128xf32>
    %c1_353 = arith.constant 1 : index
    %c28_354 = arith.constant 28 : index
    %c0_355 = arith.constant 0 : index
    %760 = vector.load %arg1[%c1_353, %c28_354, %c0_355] : memref<4x36x128xf32, #tpu.memory_space<vmem>>, vector<1x1x128xf32>
    %761 = vector.shape_cast %760 : vector<1x1x128xf32> to vector<128xf32>
    %762 = vector.shape_cast %761 : vector<128xf32> to vector<1x1x128xf32>
    %763 = vector.broadcast %762 : vector<1x1x128xf32> to vector<2x16x128xf32>
    %764 = arith.mulf %753, %763 : vector<2x16x128xf32>
    %765 = arith.addf %739, %764 : vector<2x16x128xf32>
    %c2_356 = arith.constant 2 : index
    %c28_357 = arith.constant 28 : index
    %c0_358 = arith.constant 0 : index
    %766 = vector.load %arg1[%c2_356, %c28_357, %c0_358] : memref<4x36x128xf32, #tpu.memory_space<vmem>>, vector<1x1x128xf32>
    %767 = vector.shape_cast %766 : vector<1x1x128xf32> to vector<128xf32>
    %768 = vector.shape_cast %767 : vector<128xf32> to vector<1x1x128xf32>
    %769 = vector.broadcast %768 : vector<1x1x128xf32> to vector<2x16x128xf32>
    %770 = arith.mulf %753, %769 : vector<2x16x128xf32>
    %771 = arith.addf %745, %770 : vector<2x16x128xf32>
    %c3_359 = arith.constant 3 : index
    %c28_360 = arith.constant 28 : index
    %c0_361 = arith.constant 0 : index
    %772 = vector.load %arg1[%c3_359, %c28_360, %c0_361] : memref<4x36x128xf32, #tpu.memory_space<vmem>>, vector<1x1x128xf32>
    %773 = vector.shape_cast %772 : vector<1x1x128xf32> to vector<128xf32>
    %774 = vector.shape_cast %773 : vector<128xf32> to vector<1x1x128xf32>
    %775 = vector.broadcast %774 : vector<1x1x128xf32> to vector<2x16x128xf32>
    %776 = arith.mulf %753, %775 : vector<2x16x128xf32>
    %777 = arith.addf %751, %776 : vector<2x16x128xf32>
    %778 = vector.extract_strided_slice %725 {offsets = [0, 0, 8], sizes = [2, 16, 64], strides = [1, 1, 1]} : vector<2x16x72xf32> to vector<2x16x64xf32>
    %779 = tpu.concatenate %778, %778 in 2 : vector<2x16x64xf32>, vector<2x16x64xf32> -> vector<2x16x128xf32>
    %c0_362 = arith.constant 0 : index
    %c29 = arith.constant 29 : index
    %c0_363 = arith.constant 0 : index
    %780 = vector.load %arg1[%c0_362, %c29, %c0_363] : memref<4x36x128xf32, #tpu.memory_space<vmem>>, vector<1x1x128xf32>
    %781 = vector.shape_cast %780 : vector<1x1x128xf32> to vector<128xf32>
    %782 = vector.shape_cast %781 : vector<128xf32> to vector<1x1x128xf32>
    %783 = vector.broadcast %782 : vector<1x1x128xf32> to vector<2x16x128xf32>
    %784 = arith.mulf %779, %783 : vector<2x16x128xf32>
    %785 = arith.addf %759, %784 : vector<2x16x128xf32>
    %c1_364 = arith.constant 1 : index
    %c29_365 = arith.constant 29 : index
    %c0_366 = arith.constant 0 : index
    %786 = vector.load %arg1[%c1_364, %c29_365, %c0_366] : memref<4x36x128xf32, #tpu.memory_space<vmem>>, vector<1x1x128xf32>
    %787 = vector.shape_cast %786 : vector<1x1x128xf32> to vector<128xf32>
    %788 = vector.shape_cast %787 : vector<128xf32> to vector<1x1x128xf32>
    %789 = vector.broadcast %788 : vector<1x1x128xf32> to vector<2x16x128xf32>
    %790 = arith.mulf %779, %789 : vector<2x16x128xf32>
    %791 = arith.addf %765, %790 : vector<2x16x128xf32>
    %c2_367 = arith.constant 2 : index
    %c29_368 = arith.constant 29 : index
    %c0_369 = arith.constant 0 : index
    %792 = vector.load %arg1[%c2_367, %c29_368, %c0_369] : memref<4x36x128xf32, #tpu.memory_space<vmem>>, vector<1x1x128xf32>
    %793 = vector.shape_cast %792 : vector<1x1x128xf32> to vector<128xf32>
    %794 = vector.shape_cast %793 : vector<128xf32> to vector<1x1x128xf32>
    %795 = vector.broadcast %794 : vector<1x1x128xf32> to vector<2x16x128xf32>
    %796 = arith.mulf %779, %795 : vector<2x16x128xf32>
    %797 = arith.addf %771, %796 : vector<2x16x128xf32>
    %c3_370 = arith.constant 3 : index
    %c29_371 = arith.constant 29 : index
    %c0_372 = arith.constant 0 : index
    %798 = vector.load %arg1[%c3_370, %c29_371, %c0_372] : memref<4x36x128xf32, #tpu.memory_space<vmem>>, vector<1x1x128xf32>
    %799 = vector.shape_cast %798 : vector<1x1x128xf32> to vector<128xf32>
    %800 = vector.shape_cast %799 : vector<128xf32> to vector<1x1x128xf32>
    %801 = vector.broadcast %800 : vector<1x1x128xf32> to vector<2x16x128xf32>
    %802 = arith.mulf %779, %801 : vector<2x16x128xf32>
    %803 = arith.addf %777, %802 : vector<2x16x128xf32>
    %c0_373 = arith.constant 0 : index
    %c3_374 = arith.constant 3 : index
    %c1_375 = arith.constant 1 : index
    %c0_376 = arith.constant 0 : index
    %804 = vector.load %arg3[%c0_373, %c3_374, %c1_375, %c0_376] : memref<2x4x18x72xf32, #tpu.memory_space<vmem>>, vector<2x1x16x72xf32>
    %805 = vector.shape_cast %804 : vector<2x1x16x72xf32> to vector<2x16x72xf32>
    %806 = vector.extract_strided_slice %805 {offsets = [0, 0, 0], sizes = [2, 16, 64], strides = [1, 1, 1]} : vector<2x16x72xf32> to vector<2x16x64xf32>
    %807 = tpu.concatenate %806, %806 in 2 : vector<2x16x64xf32>, vector<2x16x64xf32> -> vector<2x16x128xf32>
    %c0_377 = arith.constant 0 : index
    %c30 = arith.constant 30 : index
    %c0_378 = arith.constant 0 : index
    %808 = vector.load %arg1[%c0_377, %c30, %c0_378] : memref<4x36x128xf32, #tpu.memory_space<vmem>>, vector<1x1x128xf32>
    %809 = vector.shape_cast %808 : vector<1x1x128xf32> to vector<128xf32>
    %810 = vector.shape_cast %809 : vector<128xf32> to vector<1x1x128xf32>
    %811 = vector.broadcast %810 : vector<1x1x128xf32> to vector<2x16x128xf32>
    %812 = arith.mulf %807, %811 : vector<2x16x128xf32>
    %813 = arith.addf %785, %812 : vector<2x16x128xf32>
    %c1_379 = arith.constant 1 : index
    %c30_380 = arith.constant 30 : index
    %c0_381 = arith.constant 0 : index
    %814 = vector.load %arg1[%c1_379, %c30_380, %c0_381] : memref<4x36x128xf32, #tpu.memory_space<vmem>>, vector<1x1x128xf32>
    %815 = vector.shape_cast %814 : vector<1x1x128xf32> to vector<128xf32>
    %816 = vector.shape_cast %815 : vector<128xf32> to vector<1x1x128xf32>
    %817 = vector.broadcast %816 : vector<1x1x128xf32> to vector<2x16x128xf32>
    %818 = arith.mulf %807, %817 : vector<2x16x128xf32>
    %819 = arith.addf %791, %818 : vector<2x16x128xf32>
    %c2_382 = arith.constant 2 : index
    %c30_383 = arith.constant 30 : index
    %c0_384 = arith.constant 0 : index
    %820 = vector.load %arg1[%c2_382, %c30_383, %c0_384] : memref<4x36x128xf32, #tpu.memory_space<vmem>>, vector<1x1x128xf32>
    %821 = vector.shape_cast %820 : vector<1x1x128xf32> to vector<128xf32>
    %822 = vector.shape_cast %821 : vector<128xf32> to vector<1x1x128xf32>
    %823 = vector.broadcast %822 : vector<1x1x128xf32> to vector<2x16x128xf32>
    %824 = arith.mulf %807, %823 : vector<2x16x128xf32>
    %825 = arith.addf %797, %824 : vector<2x16x128xf32>
    %c3_385 = arith.constant 3 : index
    %c30_386 = arith.constant 30 : index
    %c0_387 = arith.constant 0 : index
    %826 = vector.load %arg1[%c3_385, %c30_386, %c0_387] : memref<4x36x128xf32, #tpu.memory_space<vmem>>, vector<1x1x128xf32>
    %827 = vector.shape_cast %826 : vector<1x1x128xf32> to vector<128xf32>
    %828 = vector.shape_cast %827 : vector<128xf32> to vector<1x1x128xf32>
    %829 = vector.broadcast %828 : vector<1x1x128xf32> to vector<2x16x128xf32>
    %830 = arith.mulf %807, %829 : vector<2x16x128xf32>
    %831 = arith.addf %803, %830 : vector<2x16x128xf32>
    %832 = vector.extract_strided_slice %805 {offsets = [0, 0, 4], sizes = [2, 16, 64], strides = [1, 1, 1]} : vector<2x16x72xf32> to vector<2x16x64xf32>
    %833 = tpu.concatenate %832, %832 in 2 : vector<2x16x64xf32>, vector<2x16x64xf32> -> vector<2x16x128xf32>
    %c0_388 = arith.constant 0 : index
    %c31 = arith.constant 31 : index
    %c0_389 = arith.constant 0 : index
    %834 = vector.load %arg1[%c0_388, %c31, %c0_389] : memref<4x36x128xf32, #tpu.memory_space<vmem>>, vector<1x1x128xf32>
    %835 = vector.shape_cast %834 : vector<1x1x128xf32> to vector<128xf32>
    %836 = vector.shape_cast %835 : vector<128xf32> to vector<1x1x128xf32>
    %837 = vector.broadcast %836 : vector<1x1x128xf32> to vector<2x16x128xf32>
    %838 = arith.mulf %833, %837 : vector<2x16x128xf32>
    %839 = arith.addf %813, %838 : vector<2x16x128xf32>
    %c1_390 = arith.constant 1 : index
    %c31_391 = arith.constant 31 : index
    %c0_392 = arith.constant 0 : index
    %840 = vector.load %arg1[%c1_390, %c31_391, %c0_392] : memref<4x36x128xf32, #tpu.memory_space<vmem>>, vector<1x1x128xf32>
    %841 = vector.shape_cast %840 : vector<1x1x128xf32> to vector<128xf32>
    %842 = vector.shape_cast %841 : vector<128xf32> to vector<1x1x128xf32>
    %843 = vector.broadcast %842 : vector<1x1x128xf32> to vector<2x16x128xf32>
    %844 = arith.mulf %833, %843 : vector<2x16x128xf32>
    %845 = arith.addf %819, %844 : vector<2x16x128xf32>
    %c2_393 = arith.constant 2 : index
    %c31_394 = arith.constant 31 : index
    %c0_395 = arith.constant 0 : index
    %846 = vector.load %arg1[%c2_393, %c31_394, %c0_395] : memref<4x36x128xf32, #tpu.memory_space<vmem>>, vector<1x1x128xf32>
    %847 = vector.shape_cast %846 : vector<1x1x128xf32> to vector<128xf32>
    %848 = vector.shape_cast %847 : vector<128xf32> to vector<1x1x128xf32>
    %849 = vector.broadcast %848 : vector<1x1x128xf32> to vector<2x16x128xf32>
    %850 = arith.mulf %833, %849 : vector<2x16x128xf32>
    %851 = arith.addf %825, %850 : vector<2x16x128xf32>
    %c3_396 = arith.constant 3 : index
    %c31_397 = arith.constant 31 : index
    %c0_398 = arith.constant 0 : index
    %852 = vector.load %arg1[%c3_396, %c31_397, %c0_398] : memref<4x36x128xf32, #tpu.memory_space<vmem>>, vector<1x1x128xf32>
    %853 = vector.shape_cast %852 : vector<1x1x128xf32> to vector<128xf32>
    %854 = vector.shape_cast %853 : vector<128xf32> to vector<1x1x128xf32>
    %855 = vector.broadcast %854 : vector<1x1x128xf32> to vector<2x16x128xf32>
    %856 = arith.mulf %833, %855 : vector<2x16x128xf32>
    %857 = arith.addf %831, %856 : vector<2x16x128xf32>
    %858 = vector.extract_strided_slice %805 {offsets = [0, 0, 8], sizes = [2, 16, 64], strides = [1, 1, 1]} : vector<2x16x72xf32> to vector<2x16x64xf32>
    %859 = tpu.concatenate %858, %858 in 2 : vector<2x16x64xf32>, vector<2x16x64xf32> -> vector<2x16x128xf32>
    %c0_399 = arith.constant 0 : index
    %c32 = arith.constant 32 : index
    %c0_400 = arith.constant 0 : index
    %860 = vector.load %arg1[%c0_399, %c32, %c0_400] : memref<4x36x128xf32, #tpu.memory_space<vmem>>, vector<1x1x128xf32>
    %861 = vector.shape_cast %860 : vector<1x1x128xf32> to vector<128xf32>
    %862 = vector.shape_cast %861 : vector<128xf32> to vector<1x1x128xf32>
    %863 = vector.broadcast %862 : vector<1x1x128xf32> to vector<2x16x128xf32>
    %864 = arith.mulf %859, %863 : vector<2x16x128xf32>
    %865 = arith.addf %839, %864 : vector<2x16x128xf32>
    %c1_401 = arith.constant 1 : index
    %c32_402 = arith.constant 32 : index
    %c0_403 = arith.constant 0 : index
    %866 = vector.load %arg1[%c1_401, %c32_402, %c0_403] : memref<4x36x128xf32, #tpu.memory_space<vmem>>, vector<1x1x128xf32>
    %867 = vector.shape_cast %866 : vector<1x1x128xf32> to vector<128xf32>
    %868 = vector.shape_cast %867 : vector<128xf32> to vector<1x1x128xf32>
    %869 = vector.broadcast %868 : vector<1x1x128xf32> to vector<2x16x128xf32>
    %870 = arith.mulf %859, %869 : vector<2x16x128xf32>
    %871 = arith.addf %845, %870 : vector<2x16x128xf32>
    %c2_404 = arith.constant 2 : index
    %c32_405 = arith.constant 32 : index
    %c0_406 = arith.constant 0 : index
    %872 = vector.load %arg1[%c2_404, %c32_405, %c0_406] : memref<4x36x128xf32, #tpu.memory_space<vmem>>, vector<1x1x128xf32>
    %873 = vector.shape_cast %872 : vector<1x1x128xf32> to vector<128xf32>
    %874 = vector.shape_cast %873 : vector<128xf32> to vector<1x1x128xf32>
    %875 = vector.broadcast %874 : vector<1x1x128xf32> to vector<2x16x128xf32>
    %876 = arith.mulf %859, %875 : vector<2x16x128xf32>
    %877 = arith.addf %851, %876 : vector<2x16x128xf32>
    %c3_407 = arith.constant 3 : index
    %c32_408 = arith.constant 32 : index
    %c0_409 = arith.constant 0 : index
    %878 = vector.load %arg1[%c3_407, %c32_408, %c0_409] : memref<4x36x128xf32, #tpu.memory_space<vmem>>, vector<1x1x128xf32>
    %879 = vector.shape_cast %878 : vector<1x1x128xf32> to vector<128xf32>
    %880 = vector.shape_cast %879 : vector<128xf32> to vector<1x1x128xf32>
    %881 = vector.broadcast %880 : vector<1x1x128xf32> to vector<2x16x128xf32>
    %882 = arith.mulf %859, %881 : vector<2x16x128xf32>
    %883 = arith.addf %857, %882 : vector<2x16x128xf32>
    %c0_410 = arith.constant 0 : index
    %c3_411 = arith.constant 3 : index
    %c2_412 = arith.constant 2 : index
    %c0_413 = arith.constant 0 : index
    %884 = vector.load %arg3[%c0_410, %c3_411, %c2_412, %c0_413] : memref<2x4x18x72xf32, #tpu.memory_space<vmem>>, vector<2x1x16x72xf32>
    %885 = vector.shape_cast %884 : vector<2x1x16x72xf32> to vector<2x16x72xf32>
    %886 = vector.extract_strided_slice %885 {offsets = [0, 0, 0], sizes = [2, 16, 64], strides = [1, 1, 1]} : vector<2x16x72xf32> to vector<2x16x64xf32>
    %887 = tpu.concatenate %886, %886 in 2 : vector<2x16x64xf32>, vector<2x16x64xf32> -> vector<2x16x128xf32>
    %c0_414 = arith.constant 0 : index
    %c33 = arith.constant 33 : index
    %c0_415 = arith.constant 0 : index
    %888 = vector.load %arg1[%c0_414, %c33, %c0_415] : memref<4x36x128xf32, #tpu.memory_space<vmem>>, vector<1x1x128xf32>
    %889 = vector.shape_cast %888 : vector<1x1x128xf32> to vector<128xf32>
    %890 = vector.shape_cast %889 : vector<128xf32> to vector<1x1x128xf32>
    %891 = vector.broadcast %890 : vector<1x1x128xf32> to vector<2x16x128xf32>
    %892 = arith.mulf %887, %891 : vector<2x16x128xf32>
    %893 = arith.addf %865, %892 : vector<2x16x128xf32>
    %c1_416 = arith.constant 1 : index
    %c33_417 = arith.constant 33 : index
    %c0_418 = arith.constant 0 : index
    %894 = vector.load %arg1[%c1_416, %c33_417, %c0_418] : memref<4x36x128xf32, #tpu.memory_space<vmem>>, vector<1x1x128xf32>
    %895 = vector.shape_cast %894 : vector<1x1x128xf32> to vector<128xf32>
    %896 = vector.shape_cast %895 : vector<128xf32> to vector<1x1x128xf32>
    %897 = vector.broadcast %896 : vector<1x1x128xf32> to vector<2x16x128xf32>
    %898 = arith.mulf %887, %897 : vector<2x16x128xf32>
    %899 = arith.addf %871, %898 : vector<2x16x128xf32>
    %c2_419 = arith.constant 2 : index
    %c33_420 = arith.constant 33 : index
    %c0_421 = arith.constant 0 : index
    %900 = vector.load %arg1[%c2_419, %c33_420, %c0_421] : memref<4x36x128xf32, #tpu.memory_space<vmem>>, vector<1x1x128xf32>
    %901 = vector.shape_cast %900 : vector<1x1x128xf32> to vector<128xf32>
    %902 = vector.shape_cast %901 : vector<128xf32> to vector<1x1x128xf32>
    %903 = vector.broadcast %902 : vector<1x1x128xf32> to vector<2x16x128xf32>
    %904 = arith.mulf %887, %903 : vector<2x16x128xf32>
    %905 = arith.addf %877, %904 : vector<2x16x128xf32>
    %c3_422 = arith.constant 3 : index
    %c33_423 = arith.constant 33 : index
    %c0_424 = arith.constant 0 : index
    %906 = vector.load %arg1[%c3_422, %c33_423, %c0_424] : memref<4x36x128xf32, #tpu.memory_space<vmem>>, vector<1x1x128xf32>
    %907 = vector.shape_cast %906 : vector<1x1x128xf32> to vector<128xf32>
    %908 = vector.shape_cast %907 : vector<128xf32> to vector<1x1x128xf32>
    %909 = vector.broadcast %908 : vector<1x1x128xf32> to vector<2x16x128xf32>
    %910 = arith.mulf %887, %909 : vector<2x16x128xf32>
    %911 = arith.addf %883, %910 : vector<2x16x128xf32>
    %912 = vector.extract_strided_slice %885 {offsets = [0, 0, 4], sizes = [2, 16, 64], strides = [1, 1, 1]} : vector<2x16x72xf32> to vector<2x16x64xf32>
    %913 = tpu.concatenate %912, %912 in 2 : vector<2x16x64xf32>, vector<2x16x64xf32> -> vector<2x16x128xf32>
    %c0_425 = arith.constant 0 : index
    %c34 = arith.constant 34 : index
    %c0_426 = arith.constant 0 : index
    %914 = vector.load %arg1[%c0_425, %c34, %c0_426] : memref<4x36x128xf32, #tpu.memory_space<vmem>>, vector<1x1x128xf32>
    %915 = vector.shape_cast %914 : vector<1x1x128xf32> to vector<128xf32>
    %916 = vector.shape_cast %915 : vector<128xf32> to vector<1x1x128xf32>
    %917 = vector.broadcast %916 : vector<1x1x128xf32> to vector<2x16x128xf32>
    %918 = arith.mulf %913, %917 : vector<2x16x128xf32>
    %919 = arith.addf %893, %918 : vector<2x16x128xf32>
    %c1_427 = arith.constant 1 : index
    %c34_428 = arith.constant 34 : index
    %c0_429 = arith.constant 0 : index
    %920 = vector.load %arg1[%c1_427, %c34_428, %c0_429] : memref<4x36x128xf32, #tpu.memory_space<vmem>>, vector<1x1x128xf32>
    %921 = vector.shape_cast %920 : vector<1x1x128xf32> to vector<128xf32>
    %922 = vector.shape_cast %921 : vector<128xf32> to vector<1x1x128xf32>
    %923 = vector.broadcast %922 : vector<1x1x128xf32> to vector<2x16x128xf32>
    %924 = arith.mulf %913, %923 : vector<2x16x128xf32>
    %925 = arith.addf %899, %924 : vector<2x16x128xf32>
    %c2_430 = arith.constant 2 : index
    %c34_431 = arith.constant 34 : index
    %c0_432 = arith.constant 0 : index
    %926 = vector.load %arg1[%c2_430, %c34_431, %c0_432] : memref<4x36x128xf32, #tpu.memory_space<vmem>>, vector<1x1x128xf32>
    %927 = vector.shape_cast %926 : vector<1x1x128xf32> to vector<128xf32>
    %928 = vector.shape_cast %927 : vector<128xf32> to vector<1x1x128xf32>
    %929 = vector.broadcast %928 : vector<1x1x128xf32> to vector<2x16x128xf32>
    %930 = arith.mulf %913, %929 : vector<2x16x128xf32>
    %931 = arith.addf %905, %930 : vector<2x16x128xf32>
    %c3_433 = arith.constant 3 : index
    %c34_434 = arith.constant 34 : index
    %c0_435 = arith.constant 0 : index
    %932 = vector.load %arg1[%c3_433, %c34_434, %c0_435] : memref<4x36x128xf32, #tpu.memory_space<vmem>>, vector<1x1x128xf32>
    %933 = vector.shape_cast %932 : vector<1x1x128xf32> to vector<128xf32>
    %934 = vector.shape_cast %933 : vector<128xf32> to vector<1x1x128xf32>
    %935 = vector.broadcast %934 : vector<1x1x128xf32> to vector<2x16x128xf32>
    %936 = arith.mulf %913, %935 : vector<2x16x128xf32>
    %937 = arith.addf %911, %936 : vector<2x16x128xf32>
    %938 = vector.extract_strided_slice %885 {offsets = [0, 0, 8], sizes = [2, 16, 64], strides = [1, 1, 1]} : vector<2x16x72xf32> to vector<2x16x64xf32>
    %939 = tpu.concatenate %938, %938 in 2 : vector<2x16x64xf32>, vector<2x16x64xf32> -> vector<2x16x128xf32>
    %c0_436 = arith.constant 0 : index
    %c35 = arith.constant 35 : index
    %c0_437 = arith.constant 0 : index
    %940 = vector.load %arg1[%c0_436, %c35, %c0_437] : memref<4x36x128xf32, #tpu.memory_space<vmem>>, vector<1x1x128xf32>
    %941 = vector.shape_cast %940 : vector<1x1x128xf32> to vector<128xf32>
    %942 = vector.shape_cast %941 : vector<128xf32> to vector<1x1x128xf32>
    %943 = vector.broadcast %942 : vector<1x1x128xf32> to vector<2x16x128xf32>
    %944 = arith.mulf %939, %943 : vector<2x16x128xf32>
    %945 = arith.addf %919, %944 : vector<2x16x128xf32>
    %c1_438 = arith.constant 1 : index
    %c35_439 = arith.constant 35 : index
    %c0_440 = arith.constant 0 : index
    %946 = vector.load %arg1[%c1_438, %c35_439, %c0_440] : memref<4x36x128xf32, #tpu.memory_space<vmem>>, vector<1x1x128xf32>
    %947 = vector.shape_cast %946 : vector<1x1x128xf32> to vector<128xf32>
    %948 = vector.shape_cast %947 : vector<128xf32> to vector<1x1x128xf32>
    %949 = vector.broadcast %948 : vector<1x1x128xf32> to vector<2x16x128xf32>
    %950 = arith.mulf %939, %949 : vector<2x16x128xf32>
    %951 = arith.addf %925, %950 : vector<2x16x128xf32>
    %c2_441 = arith.constant 2 : index
    %c35_442 = arith.constant 35 : index
    %c0_443 = arith.constant 0 : index
    %952 = vector.load %arg1[%c2_441, %c35_442, %c0_443] : memref<4x36x128xf32, #tpu.memory_space<vmem>>, vector<1x1x128xf32>
    %953 = vector.shape_cast %952 : vector<1x1x128xf32> to vector<128xf32>
    %954 = vector.shape_cast %953 : vector<128xf32> to vector<1x1x128xf32>
    %955 = vector.broadcast %954 : vector<1x1x128xf32> to vector<2x16x128xf32>
    %956 = arith.mulf %939, %955 : vector<2x16x128xf32>
    %957 = arith.addf %931, %956 : vector<2x16x128xf32>
    %c3_444 = arith.constant 3 : index
    %c35_445 = arith.constant 35 : index
    %c0_446 = arith.constant 0 : index
    %958 = vector.load %arg1[%c3_444, %c35_445, %c0_446] : memref<4x36x128xf32, #tpu.memory_space<vmem>>, vector<1x1x128xf32>
    %959 = vector.shape_cast %958 : vector<1x1x128xf32> to vector<128xf32>
    %960 = vector.shape_cast %959 : vector<128xf32> to vector<1x1x128xf32>
    %961 = vector.broadcast %960 : vector<1x1x128xf32> to vector<2x16x128xf32>
    %962 = arith.mulf %939, %961 : vector<2x16x128xf32>
    %963 = arith.addf %937, %962 : vector<2x16x128xf32>
    %c0_447 = arith.constant 0 : index
    %c0_448 = arith.constant 0 : index
    %964 = vector.load %arg2[%c0_447, %c0_448] : memref<1x128xf32, #tpu.memory_space<vmem>>, vector<1x128xf32>
    %965 = vector.shape_cast %964 : vector<1x128xf32> to vector<1x1x128xf32>
    %966 = vector.broadcast %965 : vector<1x1x128xf32> to vector<2x16x128xf32>
    %967 = arith.addf %945, %966 : vector<2x16x128xf32>
    %968 = arith.negf %967 : vector<2x16x128xf32>
    %969 = math.exp %968 : vector<2x16x128xf32>
    %cst_449 = arith.constant 1.000000e+00 : f32
    %970 = vector.broadcast %cst_449 : f32 to vector<2x16x128xf32>
    %971 = arith.addf %970, %969 : vector<2x16x128xf32>
    %972 = arith.divf %970, %971 : vector<2x16x128xf32>
    %c0_450 = arith.constant 0 : index
    %c0_451 = arith.constant 0 : index
    %c0_452 = arith.constant 0 : index
    %c0_453 = arith.constant 0 : index
    %973 = vector.load %arg4[%c0_450, %c0_451, %c0_452, %c0_453] : memref<4x2x16x128xf32, #tpu.memory_space<vmem>>, vector<1x2x16x128xf32>
    %974 = vector.shape_cast %973 : vector<1x2x16x128xf32> to vector<2x16x128xf32>
    %975 = vector.shape_cast %972 : vector<2x16x128xf32> to vector<1x2x16x128xf32>
    tpu.vector_store %arg4[%c0_450, %c0_451, %c0_452, %c0_453], %975 {strides = array<i32>} : memref<4x2x16x128xf32, #tpu.memory_space<vmem>>, vector<1x2x16x128xf32>,
    %c0_454 = arith.constant 0 : index
    %c0_455 = arith.constant 0 : index
    %976 = vector.load %arg2[%c0_454, %c0_455] : memref<1x128xf32, #tpu.memory_space<vmem>>, vector<1x128xf32>
    %977 = vector.shape_cast %976 : vector<1x128xf32> to vector<1x1x128xf32>
    %978 = vector.broadcast %977 : vector<1x1x128xf32> to vector<2x16x128xf32>
    %979 = arith.addf %951, %978 : vector<2x16x128xf32>
    %980 = arith.negf %979 : vector<2x16x128xf32>
    %981 = math.exp %980 : vector<2x16x128xf32>
    %cst_456 = arith.constant 1.000000e+00 : f32
    %982 = vector.broadcast %cst_456 : f32 to vector<2x16x128xf32>
    %983 = arith.addf %982, %981 : vector<2x16x128xf32>
    %984 = arith.divf %982, %983 : vector<2x16x128xf32>
    %c1_457 = arith.constant 1 : index
    %c0_458 = arith.constant 0 : index
    %c0_459 = arith.constant 0 : index
    %c0_460 = arith.constant 0 : index
    %985 = vector.load %arg4[%c1_457, %c0_458, %c0_459, %c0_460] : memref<4x2x16x128xf32, #tpu.memory_space<vmem>>, vector<1x2x16x128xf32>
    %986 = vector.shape_cast %985 : vector<1x2x16x128xf32> to vector<2x16x128xf32>
    %987 = vector.shape_cast %984 : vector<2x16x128xf32> to vector<1x2x16x128xf32>
    tpu.vector_store %arg4[%c1_457, %c0_458, %c0_459, %c0_460], %987 {strides = array<i32>} : memref<4x2x16x128xf32, #tpu.memory_space<vmem>>, vector<1x2x16x128xf32>,
    %c0_461 = arith.constant 0 : index
    %c0_462 = arith.constant 0 : index
    %988 = vector.load %arg2[%c0_461, %c0_462] : memref<1x128xf32, #tpu.memory_space<vmem>>, vector<1x128xf32>
    %989 = vector.shape_cast %988 : vector<1x128xf32> to vector<1x1x128xf32>
    %990 = vector.broadcast %989 : vector<1x1x128xf32> to vector<2x16x128xf32>
    %991 = arith.addf %957, %990 : vector<2x16x128xf32>
    %992 = arith.negf %991 : vector<2x16x128xf32>
    %993 = math.exp %992 : vector<2x16x128xf32>
    %cst_463 = arith.constant 1.000000e+00 : f32
    %994 = vector.broadcast %cst_463 : f32 to vector<2x16x128xf32>
    %995 = arith.addf %994, %993 : vector<2x16x128xf32>
    %996 = arith.divf %994, %995 : vector<2x16x128xf32>
    %c2_464 = arith.constant 2 : index
    %c0_465 = arith.constant 0 : index
    %c0_466 = arith.constant 0 : index
    %c0_467 = arith.constant 0 : index
    %997 = vector.load %arg4[%c2_464, %c0_465, %c0_466, %c0_467] : memref<4x2x16x128xf32, #tpu.memory_space<vmem>>, vector<1x2x16x128xf32>
    %998 = vector.shape_cast %997 : vector<1x2x16x128xf32> to vector<2x16x128xf32>
    %999 = vector.shape_cast %996 : vector<2x16x128xf32> to vector<1x2x16x128xf32>
    tpu.vector_store %arg4[%c2_464, %c0_465, %c0_466, %c0_467], %999 {strides = array<i32>} : memref<4x2x16x128xf32, #tpu.memory_space<vmem>>, vector<1x2x16x128xf32>,
    %c0_468 = arith.constant 0 : index
    %c0_469 = arith.constant 0 : index
    %1000 = vector.load %arg2[%c0_468, %c0_469] : memref<1x128xf32, #tpu.memory_space<vmem>>, vector<1x128xf32>
    %1001 = vector.shape_cast %1000 : vector<1x128xf32> to vector<1x1x128xf32>
    %1002 = vector.broadcast %1001 : vector<1x1x128xf32> to vector<2x16x128xf32>
    %1003 = arith.addf %963, %1002 : vector<2x16x128xf32>
    %1004 = arith.negf %1003 : vector<2x16x128xf32>
    %1005 = math.exp %1004 : vector<2x16x128xf32>
    %cst_470 = arith.constant 1.000000e+00 : f32
    %1006 = vector.broadcast %cst_470 : f32 to vector<2x16x128xf32>
    %1007 = arith.addf %1006, %1005 : vector<2x16x128xf32>
    %1008 = arith.divf %1006, %1007 : vector<2x16x128xf32>
    %c3_471 = arith.constant 3 : index
    %c0_472 = arith.constant 0 : index
    %c0_473 = arith.constant 0 : index
    %c0_474 = arith.constant 0 : index
    %1009 = vector.load %arg4[%c3_471, %c0_472, %c0_473, %c0_474] : memref<4x2x16x128xf32, #tpu.memory_space<vmem>>, vector<1x2x16x128xf32>
    %1010 = vector.shape_cast %1009 : vector<1x2x16x128xf32> to vector<2x16x128xf32>
    %1011 = vector.shape_cast %1008 : vector<2x16x128xf32> to vector<1x2x16x128xf32>
    tpu.vector_store %arg4[%c3_471, %c0_472, %c0_473, %c0_474], %1011 {strides = array<i32>} : memref<4x2x16x128xf32, #tpu.memory_space<vmem>>, vector<1x2x16x128xf32>,
    return
  }
  func.func @transform_0(%arg0: i32) -> (i32, i32, i32) {
    %c0_i32 = arith.constant 0 : i32
    %c0_i32_0 = arith.constant 0 : i32
    %c0_i32_1 = arith.constant 0 : i32
    return %arg0, %c0_i32, %c0_i32_0 : i32, i32, i32
  }
  func.func @transform_1(%arg0: i32) -> (i32, i32) {
    %c0_i32 = arith.constant 0 : i32
    %c0_i32_0 = arith.constant 0 : i32
    %c0_i32_1 = arith.constant 0 : i32
    return %c0_i32, %c0_i32_0 : i32, i32
  }
  func.func @transform_2(%arg0: i32) -> (i32, i32, i32, i32) {
    %c0_i32 = arith.constant 0 : i32
    %c0_i32_0 = arith.constant 0 : i32
    %c0_i32_1 = arith.constant 0 : i32
    %c0_i32_2 = arith.constant 0 : i32
    %c0_i32_3 = arith.constant 0 : i32
    return %c0_i32, %c0_i32_0, %c0_i32_1, %c0_i32_2 : i32, i32, i32, i32
  }
  func.func @transform_3(%arg0: i32) -> (i32, i32, i32, i32) {
    %c0_i32 = arith.constant 0 : i32
    %c0_i32_0 = arith.constant 0 : i32
    %c0_i32_1 = arith.constant 0 : i32
    %c0_i32_2 = arith.constant 0 : i32
    return %arg0, %c0_i32, %c0_i32_0, %c0_i32_1 : i32, i32, i32, i32
  }
}

</mosaic_0001>

<bundles_post_ra>
// kernel: outlayer_forward.1
= control target key start
LH: loop header
LB: loop body
LE: loop exit
PB: predicated region body
PF: predicated region fallthrough
CT: control target
= control target key end

     0   :  { %s3180_s16 = smov 64   ;;  %s3181_s17 = smov 124   ;;  %vm34_vm0 = vcmask 523264   ;;  %s6680_s2 = inlined_call_operand.vmem [shape: f32[2,4,18,72], index: 2, kind: input, shape index: {}]   ;;  %s6681_s0 = inlined_call_operand.vmem [shape: f32[4,36,128], index: 0, kind: input, shape index: {}]   ;;  %s6682_s1 = inlined_call_operand.vmem [shape: f32[1,128], index: 1, kind: input, shape index: {}]   ;;  %s6683_s3 = inlined_call_operand.vmem [shape: f32[4,2,16,128], index: 3, kind: output, shape index: {}]  }
   0x1   :  { %v3208_v0 = vld [vmem:[%s6680_s2 + $0x60] sm:$0xff]  ;;  %v3224_v2 = vld [vmem:[%s6680_s2 + $0x68] sm:$0xff]  ;;  %s3182_s22 = smov 60   ;;  %s3183_s23 = smov 120   ;;  %v3435_v34 = vld [vmem:[%s6680_s2 + $0x18] sm:$0xff] }
   0x2   :  { %v3213_v1 = vld [vmem:[%s6680_s2] sm:$0xff]  ;;  %26 = vrot.lane.b32.xlu1 %v3208_v0, %s3180_s16  ;;  %v3229_v3 = vld [vmem:[%s6680_s2 + $0x8] sm:$0xff]  ;;  %s3184_s24 = smov 56   ;;  %6697 = vst [vmem:[#allocation8_spill] sm:$0xff] %v3435_v34  ;;  %v3440_v35 = vld [vmem:[%s6680_s2 + $0x78] sm:$0xff] }
   0x3   :  { %22 = vrot.lane.b32.xlu0 %v3213_v1, %s3180_s16  ;;  %82 = vrot.lane.b32.xlu2 %v3213_v1, %s3181_s17  ;;  %v3264_v4 = vld [vmem:[%s6680_s2 + $0x1] sm:$0xff]  ;;  %v3280_v6 = vld [vmem:[%s6680_s2 + $0x9] sm:$0xff]  ;;  %6698 = vst [vmem:[#allocation9_spill] sm:$0xff] %v3440_v35 }
   0x4   :  { %v3275_v5 = vld [vmem:[%s6680_s2 + $0x61] sm:$0xff]  ;;  %v3285_v7 = vld [vmem:[%s6680_s2 + $0x69] sm:$0xff]  ;;  %v3516_v55 = vld [vmem:[%s6680_s2 + $0x19] sm:$0xff] }
   0x5   :  { %v3330_v10 = vld [vmem:[%s6680_s2 + $0x2] sm:$0xff]  ;;  %v3335_v11 = vld [vmem:[%s6680_s2 + $0xa] sm:$0xff]  ;;  %v3532_v59 = vld [vmem:[%s6680_s2 + $0x79] sm:$0xff] }
   0x6   :  { %6691 = vst [vmem:[#allocation2_spill] sm:$0xff] %v3330_v10  ;;  %v3348_v13 = vld [vmem:[%s6680_s2 + $0x6a] sm:$0xff]  ;;  %v3353_v14 = vld [vmem:[%s6680_s2 + $0x62] sm:$0xff] }
   0x7   :  { %6692 = vst [vmem:[#allocation3_spill] sm:$0xff] %v3335_v11  ;;  %v3430_v33 = vld [vmem:[%s6680_s2 + $0x20] sm:$0xff] }
   0x8   :  { %6693 = vst [vmem:[#allocation4_spill] sm:$0xff] %v3348_v13  ;;  %v2810_v39 = vld [vmem:[%s6680_s2 + $0x80] sm:$0xff] }
   0x9   :  { %6694 = vst [vmem:[#allocation5_spill] sm:$0xff] %v3353_v14  ;;  %v2821_v60 = vld [vmem:[%s6680_s2 + $0x21] sm:$0xff] }
   0xa   :  { %28 = vrot.lane.b32.xlu1 %v3224_v2, %s3180_s16  ;;  %6696 = vst [vmem:[#allocation7_spill] sm:$0xff] %v3430_v33  ;;  %v3540_v61 = vld [vmem:[%s6680_s2 + $0x81] sm:$0xff] }
   0xb   :  { %24 = vrot.lane.b32.xlu0 %v3229_v3, %s3180_s16  ;;  %84 = vrot.lane.b32.xlu2 %v3229_v3, %s3181_s17 }
  0x12   :  { %88 = vrot.lane.b32.xlu1 %v3224_v2, %s3181_s17 }
  0x13   :  { %86 = vrot.lane.b32.xlu0 %v3208_v0, %s3181_s17  ;;  %94 = vrot.lane.b32.xlu2 %v3213_v1, %s3182_s22 }
  0x1a   :  { %98 = vrot.lane.b32.xlu1 %v3208_v0, %s3182_s22 }
  0x1b   :  { %96 = vrot.lane.b32.xlu0 %v3229_v3, %s3182_s22  ;;  %100 = vrot.lane.b32.xlu2 %v3224_v2, %s3182_s22 }
  0x22   :  { %152 = vrot.lane.b32.xlu1 %v3229_v3, %s3183_s23 }
  0x23   :  { %150 = vrot.lane.b32.xlu0 %v3213_v1, %s3183_s23  ;;  %154 = vrot.lane.b32.xlu2 %v3208_v0, %s3183_s23 }
  0x2a   :  { %162 = vrot.lane.b32.xlu1 %v3213_v1, %s3184_s24 }
  0x2b   :  { %156 = vrot.lane.b32.xlu0 %v3224_v2, %s3183_s23  ;;  %164 = vrot.lane.b32.xlu2 %v3229_v3, %s3184_s24 }
  0x32   :  { %168 = vrot.lane.b32.xlu1 %v3224_v2, %s3184_s24 }
  0x33   :  { %166 = vrot.lane.b32.xlu0 %v3208_v0, %s3184_s24  ;;  %226 = vrot.lane.b32.xlu2 %v3264_v4, %s3180_s16 }
  0x3a   :  { %230 = vrot.lane.b32.xlu1 %v3275_v5, %s3180_s16 }
  0x3b   :  { %228 = vrot.lane.b32.xlu0 %v3280_v6, %s3180_s16  ;;  %232 = vrot.lane.b32.xlu2 %v3285_v7, %s3180_s16 }
  0x42   :  { %284 = vrot.lane.b32.xlu1 %v3280_v6, %s3181_s17 }
  0x43   :  { %282 = vrot.lane.b32.xlu0 %v3264_v4, %s3181_s17  ;;  %286 = vrot.lane.b32.xlu2 %v3275_v5, %s3181_s17 }
  0x4a   :  { %294 = vrot.lane.b32.xlu1 %v3264_v4, %s3182_s22 }
  0x4b   :  { %288 = vrot.lane.b32.xlu0 %v3285_v7, %s3181_s17  ;;  %296 = vrot.lane.b32.xlu2 %v3280_v6, %s3182_s22 }
  0x52   :  { %300 = vrot.lane.b32.xlu1 %v3285_v7, %s3182_s22 }
  0x53   :  { %298 = vrot.lane.b32.xlu0 %v3275_v5, %s3182_s22  ;;  %350 = vrot.lane.b32.xlu2 %v3264_v4, %s3183_s23 }
  0x5a   :  { %354 = vrot.lane.b32.xlu1 %v3275_v5, %s3183_s23 }
  0x5b   :  { %352 = vrot.lane.b32.xlu0 %v3280_v6, %s3183_s23  ;;  %356 = vrot.lane.b32.xlu2 %v3285_v7, %s3183_s23 }
  0x5d   :  { %v3317_v8 = vpop.permute.xlu2 %82 }
  0x62   :  { %364 = vrot.lane.b32.xlu1 %v3280_v6, %s3184_s24 }
  0x63   :  { %362 = vrot.lane.b32.xlu0 %v3264_v4, %s3184_s24  ;;  %366 = vrot.lane.b32.xlu2 %v3275_v5, %s3184_s24 }
  0x65   :  { %v3325_v9 = vpop.permute.xlu2 %84 }
  0x6a   :  { %426 = vrot.lane.b32.xlu1 %v3330_v10, %s3180_s16 }
  0x6b   :  { %368 = vrot.lane.b32.xlu0 %v3285_v7, %s3184_s24  ;;  %428 = vrot.lane.b32.xlu2 %v3335_v11, %s3180_s16 }
  0x6d   :  { %v3343_v12 = vpop.permute.xlu2 %94 }
  0x72   :  { %432 = vrot.lane.b32.xlu1 %v3348_v13, %s3180_s16 }
  0x73   :  { %430 = vrot.lane.b32.xlu0 %v3353_v14, %s3180_s16  ;;  %482 = vrot.lane.b32.xlu2 %v3330_v10, %s3181_s17 }
  0x74   :  { %v3361_v15 = vpop.permute.xlu1 %26 }
  0x75   :  { %v3363_v16 = vpop.permute.xlu0 %22  ;;  %v3365_v17 = vpop.permute.xlu2 %100 }
  0x7a   :  { %486 = vrot.lane.b32.xlu1 %v3353_v14, %s3181_s17 }
  0x7b   :  { %484 = vrot.lane.b32.xlu0 %v3335_v11, %s3181_s17  ;;  %488 = vrot.lane.b32.xlu2 %v3348_v13, %s3181_s17 }
  0x7c   :  { %v3373_v18 = vpop.permute.xlu1 %28 }
  0x7d   :  { %v3375_v19 = vpop.permute.xlu0 %24  ;;  %v3377_v20 = vpop.permute.xlu2 %154 }
  0x82   :  { %496 = vrot.lane.b32.xlu1 %v3335_v11, %s3182_s22 }
  0x83   :  { %494 = vrot.lane.b32.xlu0 %v3330_v10, %s3182_s22  ;;  %498 = vrot.lane.b32.xlu2 %v3353_v14, %s3182_s22 }
  0x84   :  { %v3385_v21 = vpop.permute.xlu1 %88 }
  0x85   :  { %v3387_v22 = vpop.permute.xlu0 %86  ;;  %v3389_v23 = vpop.permute.xlu2 %164 }
  0x8a   :  { %550 = vrot.lane.b32.xlu1 %v3330_v10, %s3183_s23 }
  0x8b   :  { %500 = vrot.lane.b32.xlu0 %v3348_v13, %s3182_s22  ;;  %552 = vrot.lane.b32.xlu2 %v3335_v11, %s3183_s23 }
  0x8c   :  { %v3397_v24 = vpop.permute.xlu1 %98 }
  0x8d   :  { %v3399_v25 = vpop.permute.xlu0 %96  ;;  %v3401_v26 = vpop.permute.xlu2 %226 }
  0x92   :  { %556 = vrot.lane.b32.xlu1 %v3348_v13, %s3183_s23 }
  0x93   :  { %554 = vrot.lane.b32.xlu0 %v3353_v14, %s3183_s23  ;;  %562 = vrot.lane.b32.xlu2 %v3330_v10, %s3184_s24 }
  0x94   :  { %v3409_v27 = vpop.permute.xlu1 %152 }
  0x95   :  { %v3411_v28 = vpop.permute.xlu0 %150  ;;  %v3413_v29 = vpop.permute.xlu2 %232 }
  0x9a   :  { %566 = vrot.lane.b32.xlu1 %v3353_v14, %s3184_s24 }
  0x9b   :  { %564 = vrot.lane.b32.xlu0 %v3335_v11, %s3184_s24  ;;  %568 = vrot.lane.b32.xlu2 %v3348_v13, %s3184_s24  ;;  %v106_v13 = vsel %vm34_vm0, %v3317_v8, %v3343_v12  ;;  %v38_v11 = vsel %vm34_vm0, %v3224_v2, %v3373_v18 }
  0x9c   :  { %v3421_v30 = vpop.permute.xlu1 %162 }
  0x9d   :  { %v3423_v31 = vpop.permute.xlu0 %156  ;;  %v3425_v32 = vpop.permute.xlu2 %286 }
  0x9e   :  { %6695 = vst [vmem:[#allocation6_spill] sm:$0xff] %v3425_v32 }
  0xa2   :  { %629 = vrot.lane.b32.xlu1 %v3430_v33, %s3180_s16 }
  0xa3   :  { %627 = vrot.lane.b32.xlu0 %v3435_v34, %s3180_s16  ;;  %631 = vrot.lane.b32.xlu2 %v3440_v35, %s3180_s16 }
  0xa4   :  { %v3448_v36 = vpop.permute.xlu1 %168 }
  0xa5   :  { %v3450_v37 = vpop.permute.xlu0 %166  ;;  %v3452_v38 = vpop.permute.xlu2 %296 }
  0xaa   :  { %683 = vrot.lane.b32.xlu1 %v3435_v34, %s3181_s17 }
  0xab   :  { %633 = vrot.lane.b32.xlu0 %v2810_v39, %s3180_s16  ;;  %685 = vrot.lane.b32.xlu2 %v3430_v33, %s3181_s17 }
  0xac   :  { %v3462_v40 = vpop.permute.xlu1 %230 }
  0xad   :  { %v3464_v41 = vpop.permute.xlu0 %228  ;;  %v3466_v42 = vpop.permute.xlu2 %350 }
  0xae   :  { %6699 = vst [vmem:[#allocation10_spill] sm:$0xff] %v3466_v42 }
  0xb2   :  { %689 = vrot.lane.b32.xlu1 %v2810_v39, %s3181_s17 }
  0xb3   :  { %687 = vrot.lane.b32.xlu0 %v3440_v35, %s3181_s17  ;;  %695 = vrot.lane.b32.xlu2 %v3435_v34, %s3182_s22 }
  0xb4   :  { %v3473_v43 = vpop.permute.xlu1 %284 }
  0xb5   :  { %v3475_v44 = vpop.permute.xlu0 %282  ;;  %v3477_v45 = vpop.permute.xlu2 %356 }
  0xb6   :  { %6700 = vst [vmem:[#allocation11_spill] sm:$0xff] %v3477_v45  ;;  %v3621_v45 = vld [vmem:[%s6681_s0 + $0x79] ss:$0 sm:$0xff] }
  0xba   :  { %699 = vrot.lane.b32.xlu1 %v3440_v35, %s3182_s22 }
  0xbb   :  { %697 = vrot.lane.b32.xlu0 %v3430_v33, %s3182_s22  ;;  %701 = vrot.lane.b32.xlu2 %v2810_v39, %s3182_s22 }
  0xbc   :  { %v3484_v46 = vpop.permute.xlu1 %294 }
  0xbd   :  { %v3486_v47 = vpop.permute.xlu0 %288  ;;  %v3488_v48 = vpop.permute.xlu2 %366 }
  0xbe   :  { %6701 = vst [vmem:[#allocation12_spill] sm:$0xff] %v3488_v48  ;;  %v109_v48 = vsel %vm34_vm0, %v3385_v21, %v3365_v17  ;;  %v108_v17 = vsel %vm34_vm0, %v3387_v22, %v3397_v24 }
  0xbf   :  { %v145_v24 = vmul.f32 %v3621_v45, %v109_v48 }
  0xc2   :  { %753 = vrot.lane.b32.xlu1 %v3430_v33, %s3183_s23 }
  0xc3   :  { %751 = vrot.lane.b32.xlu0 %v3435_v34, %s3183_s23  ;;  %755 = vrot.lane.b32.xlu2 %v3440_v35, %s3183_s23 }
  0xc4   :  { %v3496_v49 = vpop.permute.xlu1 %300 }
  0xc5   :  { %v3498_v50 = vpop.permute.xlu0 %298  ;;  %v3500_v51 = vpop.permute.xlu2 %428 }
  0xc6   :  { %6702 = vst [vmem:[#allocation13_spill] sm:$0xff] %v3500_v51 }
  0xca   :  { %763 = vrot.lane.b32.xlu1 %v3435_v34, %s3184_s24 }
  0xcb   :  { %757 = vrot.lane.b32.xlu0 %v2810_v39, %s3183_s23  ;;  %765 = vrot.lane.b32.xlu2 %v3430_v33, %s3184_s24 }
  0xcc   :  { %v3505_v52 = vpop.permute.xlu1 %354 }
  0xcd   :  { %6703 = vst [vmem:[#allocation14_spill] sm:$0xff] %v3505_v52  ;;  %v3507_v53 = vpop.permute.xlu0 %352  ;;  %v3511_v54 = vpop.permute.xlu2 %482 }
  0xce   :  { %6704 = vst [vmem:[#allocation15_spill] sm:$0xff] %v3507_v53  ;;  %v37_v53 = vsel %vm34_vm0, %v3208_v0, %v3361_v15 }
  0xcf   :  { %6705 = vst [vmem:[#allocation16_spill] sm:$0xff] %v3511_v54 }
  0xd2   :  { %769 = vrot.lane.b32.xlu1 %v2810_v39, %s3184_s24 }
  0xd3   :  { %767 = vrot.lane.b32.xlu0 %v3440_v35, %s3184_s24  ;;  %827 = vrot.lane.b32.xlu2 %v3516_v55, %s3180_s16 }
  0xd4   :  { %v3521_v56 = vpop.permute.xlu1 %364 }
  0xd5   :  { %6706 = vst [vmem:[#allocation17_spill] sm:$0xff] %v3521_v56  ;;  %v3523_v57 = vpop.permute.xlu0 %362  ;;  %v3527_v58 = vpop.permute.xlu2 %488 }
  0xd6   :  { %6707 = vst [vmem:[#allocation18_spill] sm:$0xff] %v3523_v57 }
  0xd7   :  { %6708 = vst [vmem:[#allocation19_spill] sm:$0xff] %v3527_v58 }
  0xda   :  { %831 = vrot.lane.b32.xlu1 %v3532_v59, %s3180_s16 }
  0xdb   :  { %829 = vrot.lane.b32.xlu0 %v2821_v60, %s3180_s16  ;;  %833 = vrot.lane.b32.xlu2 %v3540_v61, %s3180_s16 }
  0xdc   :  { %v3545_v62 = vpop.permute.xlu1 %426 }
  0xdd   :  { %6709 = vst [vmem:[#allocation20_spill] sm:$0xff] %v3545_v62  ;;  %v3547_v63 = vpop.permute.xlu0 %368  ;;  %v3551_v39 = vpop.permute.xlu2 %498 }
  0xde   :  { %6710 = vst [vmem:[#allocation21_spill] sm:$0xff] %v3547_v63  ;;  %v35_v63 = vsel %vm34_vm0, %v3213_v1, %v3363_v16 }
  0xdf   :  { %6711 = vst [vmem:[#allocation22_spill] sm:$0xff] %v3551_v39 }
  0xe2   :  { %885 = vrot.lane.b32.xlu1 %v2821_v60, %s3181_s17 }
  0xe3   :  { %883 = vrot.lane.b32.xlu0 %v3516_v55, %s3181_s17  ;;  %887 = vrot.lane.b32.xlu2 %v3532_v59, %s3181_s17 }
  0xe4   :  { %v3556_v34 = vpop.permute.xlu1 %432 }
  0xe5   :  { %6712 = vst [vmem:[#allocation23_spill] sm:$0xff] %v3556_v34  ;;  %v3558_v33 = vpop.permute.xlu0 %430  ;;  %v3562_v35 = vpop.permute.xlu2 %552  ;;  %v2960_v34 = vld [vmem:[%s6681_s0 + $0x78] ss:$0 sm:$0xff] }
  0xe6   :  { %6713 = vst [vmem:[#allocation24_spill] sm:$0xff] %v3558_v33  ;;  %v2959_v33 = vld [vmem:[%s6681_s0 + $0x50] ss:$0 sm:$0xff]  ;;  %v76_v0 = vmul.f32 %v2960_v34, %v37_v53 }
  0xe7   :  { %6714 = vst [vmem:[#allocation25_spill] sm:$0xff] %v3562_v35  ;;  %v63_v16 = vmul.f32 %v2959_v33, %v35_v63  ;;  %v65_v52 = vmul.f32 %v2959_v33, %v37_v53 }
  0xea   :  { %895 = vrot.lane.b32.xlu1 %v3516_v55, %s3182_s22 }
  0xeb   :  { %889 = vrot.lane.b32.xlu0 %v3540_v61, %s3181_s17  ;;  %897 = vrot.lane.b32.xlu2 %v2821_v60, %s3182_s22 }
  0xec   :  { %v3568_v58 = vpop.permute.xlu1 %486 }
  0xed   :  { %6715 = vst [vmem:[#allocation26_spill] sm:$0xff] %v3568_v58  ;;  %v3570_v54 = vpop.permute.xlu0 %484  ;;  %v3573_v39 = vpop.permute.xlu2 %562 }
  0xee   :  { %6716 = vst [vmem:[#allocation27_spill] sm:$0xff] %v3570_v54  ;;  %v3593_v54 = vld [vmem:[%s6681_s0 + $0x29] ss:$0 sm:$0xff] }
  0xef   :  { %6717 = vst [vmem:[#allocation28_spill] sm:$0xff] %v3573_v39  ;;  %v2961_v39 = vld [vmem:[%s6681_s0 + $0x1] ss:$0 sm:$0xff]  ;;  %v122_v42 = vmul.f32 %v3593_v54, %v106_v13 }
  0xf0   :  { %v112_v12 = vmul.f32 %v2961_v39, %v106_v13 }
  0xf2   :  { %901 = vrot.lane.b32.xlu1 %v3540_v61, %s3182_s22 }
  0xf3   :  { %899 = vrot.lane.b32.xlu0 %v3532_v59, %s3182_s22  ;;  %951 = vrot.lane.b32.xlu2 %v3516_v55, %s3183_s23 }
  0xf4   :  { %v3579_v35 = vpop.permute.xlu1 %496 }
  0xf5   :  { %6718 = vst [vmem:[#allocation29_spill] sm:$0xff] %v3579_v35  ;;  %v3581_v14 = vpop.permute.xlu0 %494  ;;  %v3585_v58 = vpop.permute.xlu2 %568  ;;  %v3598_v35 = vld [vmem:[%s6681_s0 + $0x51] ss:$0 sm:$0xff] }
  0xf6   :  { %6719 = vst [vmem:[#allocation30_spill] sm:$0xff] %v3581_v14  ;;  %v2958_v14 = vld [vmem:[%s6681_s0 + $0x28] ss:$0 sm:$0xff]  ;;  %v132_v57 = vmul.f32 %v3598_v35, %v106_v13  ;;  %v135_v22 = vmul.f32 %v3598_v35, %v109_v48 }
  0xf7   :  { %6720 = vst [vmem:[#allocation31_spill] sm:$0xff] %v3585_v58  ;;  %v2957_v58 = vld [vmem:[%s6681_s0] ss:$0 sm:$0xff]  ;;  %v52_v1 = vmul.f32 %v2958_v14, %v35_v63  ;;  %v54_v51 = vmul.f32 %v2958_v14, %v37_v53 }
  0xf8   :  { %v41_v56 = vmul.f32 %v2957_v58, %v35_v63  ;;  %v44_v18 = vmul.f32 %v2957_v58, %v38_v11 }
  0xf9   :  { %v3649_v32 = vadd.f32 %v122_v42, %v52_v1  ;;  %v3681_v1 = vld [vmem:[%s6680_s2 + $0x1a] sm:$0xff] }
  0xfa   :  { %955 = vrot.lane.b32.xlu1 %v3532_v59, %s3183_s23  ;;  %v3647_v15 = vadd.f32 %v112_v12, %v41_v56  ;;  %v107_v56 = vsel %vm34_vm0, %v3325_v9, %v3399_v25  ;;  %v114_v12 = vmul.f32 %v2961_v39, %v108_v17  ;;  %v134_v9 = vmul.f32 %v3598_v35, %v108_v17 }
  0xfb   :  { %953 = vrot.lane.b32.xlu0 %v2821_v60, %s3183_s23  ;;  %957 = vrot.lane.b32.xlu2 %v3540_v61, %s3183_s23  ;;  %v144_v25 = vmul.f32 %v3621_v45, %v108_v17 }
  0xfc   :  { %v3626_v10 = vpop.permute.xlu1 %550 }
  0xfd   :  { %6721 = vst [vmem:[#allocation32_spill] sm:$0xff] %v3626_v10  ;;  %v3628_v62 = vpop.permute.xlu0 %500  ;;  %v3632_v8 = vpop.permute.xlu2 %631  ;;  %v142_v10 = vmul.f32 %v3621_v45, %v106_v13  ;;  %v3651_v13 = vadd.f32 %v132_v57, %v63_v16  ;;  %v77_v57 = vmul.f32 %v2960_v34, %v38_v11 }
  0xfe   :  { %6722 = vst [vmem:[#allocation33_spill] sm:$0xff] %v3628_v62  ;;  %v74_v62 = vmul.f32 %v2960_v34, %v35_v63  ;;  %v36_v63 = vsel %vm34_vm0, %v3229_v3, %v3375_v19  ;;  %v66_v19 = vmul.f32 %v2959_v33, %v38_v11 }
  0xff   :  { %6723 = vst [vmem:[#allocation34_spill] sm:$0xff] %v3632_v8  ;;  %v43_v8 = vmul.f32 %v2957_v58, %v37_v53  ;;  %v55_v53 = vmul.f32 %v2958_v14, %v38_v11  ;;  %v64_v16 = vmul.f32 %v2959_v33, %v36_v63  ;;  %v113_v11 = vmul.f32 %v2961_v39, %v107_v56  ;;  %v3698_v33 = vld [vmem:[%s6681_s0 + $0x2a] ss:$0 sm:$0xff] }
 0x100   :  { %v3655_v2 = vadd.f32 %v142_v10, %v74_v62  ;;  %v125_v10 = vmul.f32 %v3593_v54, %v109_v48  ;;  %v53_v62 = vmul.f32 %v2958_v14, %v36_v63  ;;  %v75_v14 = vmul.f32 %v2960_v34, %v36_v63  ;;  %v3708_v34 = vld [vmem:[%s6680_s2 + $0x22] sm:$0xff] }
 0x102   :  { %965 = vrot.lane.b32.xlu1 %v2821_v60, %s3184_s24  ;;  %v42_v60 = vmul.f32 %v2957_v58, %v36_v63  ;;  %v3712_v63 = vadd.f32 %v145_v24, %v77_v57  ;;  %v3769_v57 = vld [vmem:[%s6681_s0 + $0x7b] ss:$0 sm:$0xff] }
 0x103   :  { %963 = vrot.lane.b32.xlu0 %v3516_v55, %s3184_s24  ;;  %967 = vrot.lane.b32.xlu2 %v3532_v59, %s3184_s24  ;;  %v115_v55 = vmul.f32 %v2961_v39, %v109_v48  ;;  %v124_v59 = vmul.f32 %v3593_v54, %v108_v17  ;;  %v3688_v48 = vld [vmem:[%s6681_s0 + $0x2] ss:$0 sm:$0xff]  ;;  %v3703_v39 = vld [vmem:[%s6681_s0 + $0x52] ss:$0 sm:$0xff]  ;;  %v175_v17 = vsel %vm34_vm0, %v3409_v27, %v3389_v23 }
 0x104   :  { %v3663_v21 = vpop.permute.xlu1 %556  ;;  %v3736_v23 = vld [vmem:[%s6681_s0 + $0x3] ss:$0 sm:$0xff]  ;;  %v3740_v27 = vadd.f32 %v134_v9, %v65_v52 }
 0x105   :  { %6724 = vst [vmem:[#allocation35_spill] sm:$0xff] %v3663_v21  ;;  %v3665_v42 = vpop.permute.xlu0 %554  ;;  %v3673_v3 = vpop.permute.xlu2 %685  ;;  %v3690_v58 = vadd.f32 %v115_v55, %v44_v18  ;;  %v3710_v18 = vadd.f32 %v135_v22, %v66_v19  ;;  %v3725_v55 = vadd.f32 %v114_v12, %v43_v8  ;;  %v143_v19 = vmul.f32 %v3621_v45, %v107_v56 }
 0x106   :  { %6725 = vst [vmem:[#allocation36_spill] sm:$0xff] %v3665_v42  ;;  %v123_v42 = vmul.f32 %v3593_v54, %v107_v56  ;;  %v133_v54 = vmul.f32 %v3598_v35, %v107_v56  ;;  %v174_v35 = vsel %vm34_vm0, %v3411_v28, %v3421_v30  ;;  %v3742_v8 = vadd.f32 %v144_v25, %v76_v0  ;;  %v3750_v28 = vld [vmem:[%s6681_s0 + $0x2b] ss:$0 sm:$0xff]  ;;  %v3755_v30 = vld [vmem:[%s6681_s0 + $0x53] ss:$0 sm:$0xff] }
 0x107   :  { %6726 = vst [vmem:[#allocation37_spill] sm:$0xff] %v3673_v3  ;;  %v3692_v3 = vadd.f32 %v125_v10, %v55_v53  ;;  %v3721_v53 = vld [vmem:[%s6681_s0 + $0x7a] ss:$0 sm:$0xff]  ;;  %v3727_v10 = vadd.f32 %v124_v59, %v54_v51  ;;  %v117_v51 = vadd.f32 %v113_v11, %v42_v60  ;;  %v238_v45 = vsel %vm34_vm0, %v3264_v4, %v3401_v26  ;;  %v3782_v11 = vld [vmem:[%s6680_s2 + $0x82] sm:$0xff] }
 0x108   :  { %v127_v0 = vadd.f32 %v123_v42, %v53_v62  ;;  %v181_v4 = vmul.f32 %v3688_v48, %v175_v17  ;;  %v191_v26 = vmul.f32 %v3698_v33, %v175_v17  ;;  %v201_v56 = vmul.f32 %v3703_v39, %v175_v17 }
 0x109   :  { %v137_v24 = vadd.f32 %v133_v54, %v64_v16  ;;  %v211_v60 = vmul.f32 %v3721_v53, %v175_v17  ;;  %v180_v12 = vmul.f32 %v3688_v48, %v174_v35  ;;  %v190_v42 = vmul.f32 %v3698_v33, %v174_v35 }
 0x10a   :  { %1027 = vrot.lane.b32.xlu1 %v3681_v1, %s3180_s16  ;;  %v147_v62 = vadd.f32 %v143_v19, %v75_v14  ;;  %v200_v59 = vmul.f32 %v3703_v39, %v174_v35  ;;  %v210_v9 = vmul.f32 %v3721_v53, %v174_v35  ;;  %v244_v25 = vmul.f32 %v3736_v23, %v238_v45  ;;  %v3795_v19 = vld [vmem:[%s6680_s2 + $0x7a] sm:$0xff] }
 0x10b   :  { %969 = vrot.lane.b32.xlu0 %v3540_v61, %s3184_s24  ;;  %1029 = vrot.lane.b32.xlu2 %v3708_v34, %s3180_s16  ;;  %v254_v16 = vmul.f32 %v3750_v28, %v238_v45  ;;  %v264_v54 = vmul.f32 %v3755_v30, %v238_v45  ;;  %v177_v17 = vsel %vm34_vm0, %v3423_v31, %v3448_v36 }
 0x10c   :  { %v3757_v61 = vpop.permute.xlu1 %566  ;;  %v241_v14 = vsel %vm34_vm0, %v3285_v7, %v3413_v29  ;;  %v3797_v35 = vadd.f32 %v181_v4, %v117_v51  ;;  %v3804_v21 = vadd.f32 %v211_v60, %v147_v62  ;;  %v184_v31 = vadd.f32 %v180_v12, %v3647_v15 }
 0x10d   :  { %6727 = vst [vmem:[#allocation38_spill] sm:$0xff] %v3757_v61  ;;  %v3759_v52 = vpop.permute.xlu0 %564  ;;  %v3771_v22 = vpop.permute.xlu2 %695  ;;  %v274_v61 = vmul.f32 %v3769_v57, %v238_v45  ;;  %v194_v36 = vadd.f32 %v190_v42, %v3649_v32  ;;  %v176_v7 = vsel %vm34_vm0, %v3377_v20, %v3450_v37  ;;  %v204_v29 = vadd.f32 %v200_v59, %v3651_v13 }
 0x10e   :  { %6728 = vst [vmem:[#allocation39_spill] sm:$0xff] %v3759_v52  ;;  %v3801_v52 = vadd.f32 %v201_v56, %v137_v24  ;;  %v214_v51 = vadd.f32 %v210_v9, %v3655_v2  ;;  %v247_v45 = vmul.f32 %v3736_v23, %v241_v14  ;;  %v193_v32 = vmul.f32 %v3698_v33, %v177_v17 }
 0x10f   :  { %6729 = vst [vmem:[#allocation40_spill] sm:$0xff] %v3771_v22  ;;  %v3799_v22 = vadd.f32 %v191_v26, %v127_v0  ;;  %v183_v0 = vmul.f32 %v3688_v48, %v177_v17  ;;  %v203_v15 = vmul.f32 %v3703_v39, %v177_v17  ;;  %v213_v20 = vmul.f32 %v3721_v53, %v177_v17 }
 0x110   :  { %v257_v37 = vmul.f32 %v3750_v28, %v241_v14  ;;  %v267_v13 = vmul.f32 %v3755_v30, %v241_v14  ;;  %v182_v2 = vmul.f32 %v3688_v48, %v176_v7  ;;  %v192_v26 = vmul.f32 %v3698_v33, %v176_v7 }
 0x111   :  { %v202_v56 = vmul.f32 %v3703_v39, %v176_v7  ;;  %v3835_v12 = vadd.f32 %v244_v25, %v184_v31  ;;  %v3837_v42 = vadd.f32 %v254_v16, %v194_v36  ;;  %v277_v62 = vmul.f32 %v3769_v57, %v241_v14  ;;  %v2975_v31 = vld [vmem:[%s6681_s0 + $0x54] ss:$0 sm:$0xff] }
 0x112   :  { %1033 = vrot.lane.b32.xlu1 %v3782_v11, %s3180_s16  ;;  %v240_v59 = vsel %vm34_vm0, %v3275_v5, %v3462_v40  ;;  %v3843_v9 = vadd.f32 %v264_v54, %v204_v29  ;;  %v3845_v48 = vadd.f32 %v274_v61, %v214_v51  ;;  %v187_v33 = vadd.f32 %v183_v0, %v3690_v58 }
 0x113   :  { %1031 = vrot.lane.b32.xlu0 %v3795_v19, %s3180_s16  ;;  %1083 = vrot.lane.b32.xlu2 %v3681_v1, %s3181_s17  ;;  %v212_v39 = vmul.f32 %v3721_v53, %v176_v7  ;;  %v197_v17 = vadd.f32 %v193_v32, %v3692_v3  ;;  %v207_v25 = vadd.f32 %v203_v15, %v3710_v18  ;;  %v2973_v3 = vld [vmem:[%s6681_s0 + $0x4] ss:$0 sm:$0xff] }
 0x114   :  { %v3823_v4 = vpop.permute.xlu1 %629  ;;  %v217_v16 = vadd.f32 %v213_v20, %v3712_v63  ;;  %v239_v14 = vsel %vm34_vm0, %v3280_v6, %v3464_v41  ;;  %v186_v5 = vadd.f32 %v182_v2, %v3725_v55  ;;  %v196_v40 = vadd.f32 %v192_v26, %v3727_v10  ;;  %v2974_v41 = vld [vmem:[%s6681_s0 + $0x2c] ss:$0 sm:$0xff] }
 0x115   :  { %v3831_v24 = vpop.permute.xlu0 %627  ;;  %v3833_v60 = vpop.permute.xlu2 %701  ;;  %v206_v61 = vadd.f32 %v202_v56, %v3740_v27  ;;  %v246_v58 = vmul.f32 %v3736_v23, %v240_v59  ;;  %v256_v18 = vmul.f32 %v3750_v28, %v240_v59  ;;  %v266_v63 = vmul.f32 %v3755_v30, %v240_v59 }
 0x116   :  { %v276_v53 = vmul.f32 %v3769_v57, %v240_v59  ;;  %v307_v6 = vsel %vm34_vm0, %v3473_v43, %v3452_v38  ;;  %v251_v55 = vadd.f32 %v247_v45, %v187_v33  ;;  %v216_v10 = vadd.f32 %v212_v39, %v3742_v8  ;;  %v2976_v8 = vld [vmem:[%s6681_s0 + $0x7c] ss:$0 sm:$0xff] }
 0x117   :  { %v245_v27 = vmul.f32 %v3736_v23, %v239_v14  ;;  %v255_v54 = vmul.f32 %v3750_v28, %v239_v14  ;;  %v261_v38 = vadd.f32 %v257_v37, %v197_v17  ;;  %v271_v43 = vadd.f32 %v267_v13, %v207_v25 }
 0x118   :  { %v281_v36 = vadd.f32 %v277_v62, %v217_v16  ;;  %v265_v7 = vmul.f32 %v3755_v30, %v239_v14  ;;  %v250_v23 = vadd.f32 %v246_v58, %v186_v5  ;;  %v275_v28 = vmul.f32 %v3769_v57, %v239_v14  ;;  %v6731_v62 = vld [vmem:[#allocation6_spill] sm:$0xff] }
 0x119   :  { %v313_v51 = vmul.f32 %v2973_v3, %v307_v6  ;;  %v306_v0 = vsel %vm34_vm0, %v3475_v44, %v3484_v46  ;;  %v260_v32 = vadd.f32 %v256_v18, %v196_v40  ;;  %v270_v15 = vadd.f32 %v266_v63, %v206_v61  ;;  %v3925_v58 = vld [vmem:[%s6681_s0 + $0x5] ss:$0 sm:$0xff] }
 0x11a   :  { %1087 = vrot.lane.b32.xlu1 %v3795_v19, %s3181_s17  ;;  %v280_v20 = vadd.f32 %v276_v53, %v216_v10  ;;  %v323_v37 = vmul.f32 %v2974_v41, %v307_v6  ;;  %v249_v13 = vadd.f32 %v245_v27, %v3797_v35  ;;  %v259_v2 = vadd.f32 %v255_v54, %v3799_v22  ;;  %v3939_v10 = vld [vmem:[%s6681_s0 + $0x2d] ss:$0 sm:$0xff]  ;;  %v3944_v27 = vld [vmem:[%s6681_s0 + $0x55] ss:$0 sm:$0xff] }
 0x11b   :  { %1085 = vrot.lane.b32.xlu0 %v3708_v34, %s3181_s17  ;;  %1089 = vrot.lane.b32.xlu2 %v3782_v11, %s3181_s17  ;;  %v333_v26 = vmul.f32 %v2975_v31, %v307_v6  ;;  %v309_v57 = vsel %vm34_vm0, %v3486_v47, %v3496_v49  ;;  %v269_v56 = vadd.f32 %v265_v7, %v3801_v52 }
 0x11c   :  { %v3885_v29 = vpop.permute.xlu1 %683  ;;  %v343_v44 = vmul.f32 %v2976_v8, %v307_v6  ;;  %v312_v46 = vmul.f32 %v2973_v3, %v306_v0  ;;  %v308_v59 = vsel %vm34_vm0, %v6731_v62, %v3498_v50  ;;  %v279_v33 = vadd.f32 %v275_v28, %v3804_v21  ;;  %v6732_v6 = vld [vmem:[#allocation12_spill] sm:$0xff]  ;;  %v6735_v28 = vld [vmem:[#allocation3_spill] sm:$0xff]  ;;  %v6740_v62 = vld [vmem:[#allocation10_spill] sm:$0xff] }
 0x11d   :  { %v3893_v45 = vpop.permute.xlu0 %633  ;;  %v3895_v30 = vpop.permute.xlu2 %755  ;;  %v3907_v39 = vadd.f32 %v313_v51, %v249_v13  ;;  %v322_v35 = vmul.f32 %v2974_v41, %v306_v0  ;;  %v332_v17 = vmul.f32 %v2975_v31, %v306_v0  ;;  %v3909_v22 = vadd.f32 %v323_v37, %v259_v2 }
 0x11e   :  { %6730 = vst [vmem:[#allocation41_spill] sm:$0xff] %v3895_v30  ;;  %v342_v25 = vmul.f32 %v2976_v8, %v306_v0  ;;  %v315_v16 = vmul.f32 %v2973_v3, %v309_v57  ;;  %v325_v14 = vmul.f32 %v2974_v41, %v309_v57  ;;  %v3913_v47 = vadd.f32 %v333_v26, %v269_v56  ;;  %v3964_v0 = vld [vmem:[%s6681_s0 + $0x2e] ss:$0 sm:$0xff] }
 0x11f   :  { %v335_v49 = vmul.f32 %v2975_v31, %v309_v57  ;;  %v345_v52 = vmul.f32 %v2976_v8, %v309_v57  ;;  %v314_v5 = vmul.f32 %v2973_v3, %v308_v59  ;;  %v3917_v50 = vadd.f32 %v343_v44, %v279_v33  ;;  %v6738_v26 = vld [vmem:[#allocation15_spill] sm:$0xff] }
 0x120   :  { %v3920_v21 = vadd.f32 %v312_v46, %v3835_v12  ;;  %v324_v40 = vmul.f32 %v2974_v41, %v308_v59  ;;  %v334_v61 = vmul.f32 %v2975_v31, %v308_v59  ;;  %v326_v3 = vadd.f32 %v322_v35, %v3837_v42  ;;  %v6733_v12 = vld [vmem:[#allocation14_spill] sm:$0xff]  ;;  %v6744_v30 = vld [vmem:[#allocation11_spill] sm:$0xff] }
 0x121   :  { %v336_v63 = vadd.f32 %v332_v17, %v3843_v9  ;;  %v344_v53 = vmul.f32 %v2976_v8, %v308_v59  ;;  %v376_v41 = vsel %vm34_vm0, %v6733_v12, %v6732_v6  ;;  %v3949_v42 = vld [vmem:[%s6681_s0 + $0x6] ss:$0 sm:$0xff]  ;;  %v346_v54 = vadd.f32 %v342_v25, %v3845_v48  ;;  %v6734_v8 = vld [vmem:[#allocation13_spill] sm:$0xff] }
 0x122   :  { %1097 = vrot.lane.b32.xlu1 %v3708_v34, %s3182_s22  ;;  %v3954_v31 = vadd.f32 %v315_v16, %v251_v55  ;;  %v3956_v7 = vadd.f32 %v325_v14, %v261_v38  ;;  %v439_v51 = vsel %vm34_vm0, %v6735_v28, %v6734_v8  ;;  %v3968_v13 = vadd.f32 %v335_v49, %v271_v43  ;;  %v2980_v55 = vld [vmem:[%s6681_s0 + $0x7d] ss:$0 sm:$0xff]  ;;  %v3982_v43 = vld [vmem:[%s6681_s0 + $0x56] ss:$0 sm:$0xff] }
 0x123   :  { %1095 = vrot.lane.b32.xlu0 %v3681_v1, %s3182_s22  ;;  %1099 = vrot.lane.b32.xlu2 %v3795_v19, %s3182_s22  ;;  %v3970_v2 = vadd.f32 %v345_v52, %v281_v36  ;;  %v318_v48 = vadd.f32 %v314_v5, %v250_v23  ;;  %v6737_v38 = vld [vmem:[#allocation17_spill] sm:$0xff]  ;;  %v328_v56 = vadd.f32 %v324_v40, %v260_v32  ;;  %v6739_v23 = vld [vmem:[#allocation18_spill] sm:$0xff] }
 0x124   :  { %v3927_v18 = vpop.permute.xlu1 %689  ;;  %v375_v57 = vsel %vm34_vm0, %v6738_v26, %v6737_v38  ;;  %v338_v44 = vadd.f32 %v334_v61, %v270_v15  ;;  %v382_v46 = vmul.f32 %v3925_v58, %v376_v41  ;;  %v3987_v36 = vld [vmem:[%s6681_s0 + $0x7e] ss:$0 sm:$0xff]  ;;  %v374_v59 = vsel %vm34_vm0, %v6740_v62, %v6739_v23  ;;  %v6741_v38 = vld [vmem:[#allocation20_spill] sm:$0xff]  ;;  %v6742_v26 = vld [vmem:[#allocation2_spill] sm:$0xff] }
 0x125   :  { %v3951_v9 = vpop.permute.xlu0 %687  ;;  %v3966_v37 = vpop.permute.xlu2 %765  ;;  %v348_v33 = vadd.f32 %v344_v53, %v280_v20  ;;  %v392_v32 = vmul.f32 %v3939_v10, %v376_v41  ;;  %v402_v15 = vmul.f32 %v3944_v27, %v376_v41  ;;  %v445_v35 = vmul.f32 %v3949_v42, %v439_v51  ;;  %v6743_v62 = vld [vmem:[#allocation21_spill] sm:$0xff] }
 0x126   :  { %6736 = vst [vmem:[#allocation6_spill] sm:$0xff] %v3966_v37  ;;  %v381_v17 = vmul.f32 %v3925_v58, %v375_v57  ;;  %v391_v25 = vmul.f32 %v3939_v10, %v375_v57  ;;  %v401_v16 = vmul.f32 %v3944_v27, %v375_v57  ;;  %v455_v14 = vmul.f32 %v3964_v0, %v439_v51 }
 0x127   :  { %v412_v49 = vmul.f32 %v2980_v55, %v376_v41  ;;  %v411_v52 = vmul.f32 %v2980_v55, %v375_v57  ;;  %v380_v20 = vmul.f32 %v3925_v58, %v374_v59  ;;  %v390_v5 = vmul.f32 %v3939_v10, %v374_v59 }
 0x128   :  { %v4005_v40 = vadd.f32 %v382_v46, %v318_v48  ;;  %v465_v61 = vmul.f32 %v3982_v43, %v439_v51  ;;  %v475_v53 = vmul.f32 %v3987_v36, %v439_v51  ;;  %v400_v6 = vmul.f32 %v3944_v27, %v374_v59 }
 0x129   :  { %v4014_v41 = vadd.f32 %v392_v32, %v328_v56  ;;  %v4016_v8 = vadd.f32 %v402_v15, %v338_v44  ;;  %v410_v28 = vmul.f32 %v2980_v55, %v374_v59  ;;  %v438_v48 = vsel %vm34_vm0, %v6742_v26, %v6741_v38 }
 0x12a   :  { %1151 = vrot.lane.b32.xlu1 %v3681_v1, %s3183_s23  ;;  %v385_v51 = vadd.f32 %v381_v17, %v3907_v39  ;;  %v395_v46 = vadd.f32 %v391_v25, %v3909_v22  ;;  %v405_v23 = vadd.f32 %v401_v16, %v3913_v47  ;;  %v377_v56 = vsel %vm34_vm0, %v6744_v30, %v6743_v62  ;;  %v6745_v25 = vld [vmem:[#allocation23_spill] sm:$0xff]  ;;  %v6746_v16 = vld [vmem:[#allocation4_spill] sm:$0xff] }
 0x12b   :  { %1101 = vrot.lane.b32.xlu0 %v3782_v11, %s3182_s22  ;;  %1153 = vrot.lane.b32.xlu2 %v3708_v34, %s3183_s23  ;;  %v416_v44 = vadd.f32 %v412_v49, %v348_v33  ;;  %v415_v59 = vadd.f32 %v411_v52, %v3917_v50  ;;  %v384_v15 = vadd.f32 %v380_v20, %v3920_v21  ;;  %v6747_v52 = vld [vmem:[#allocation24_spill] sm:$0xff]  ;;  %v6748_v20 = vld [vmem:[#allocation5_spill] sm:$0xff] }
 0x12c   :  { %v4010_v12 = vpop.permute.xlu1 %699  ;;  %v394_v38 = vadd.f32 %v390_v5, %v326_v3  ;;  %v404_v26 = vadd.f32 %v400_v6, %v336_v63  ;;  %v444_v37 = vmul.f32 %v3949_v42, %v438_v48  ;;  %v454_v39 = vmul.f32 %v3964_v0, %v438_v48 }
 0x12d   :  { %v4021_v57 = vpop.permute.xlu0 %697  ;;  %v4029_v32 = vpop.permute.xlu2 %827  ;;  %v464_v22 = vmul.f32 %v3982_v43, %v438_v48  ;;  %v414_v47 = vadd.f32 %v410_v28, %v346_v54  ;;  %v474_v17 = vmul.f32 %v3987_v36, %v438_v48  ;;  %v383_v30 = vmul.f32 %v3925_v58, %v377_v56  ;;  %v6749_v28 = vld [vmem:[#allocation22_spill] sm:$0xff] }
 0x12e   :  { %v441_v33 = vsel %vm34_vm0, %v6746_v16, %v6745_v25  ;;  %v4041_v50 = vadd.f32 %v445_v35, %v385_v51  ;;  %v4043_v21 = vadd.f32 %v455_v14, %v395_v46  ;;  %v4045_v3 = vadd.f32 %v465_v61, %v405_v23  ;;  %v6750_v48 = vld [vmem:[#allocation26_spill] sm:$0xff]  ;;  %v4084_v46 = vld [vmem:[%s6681_s0 + $0x2f] ss:$0 sm:$0xff]  ;;  %v4089_v23 = vld [vmem:[%s6681_s0 + $0x57] ss:$0 sm:$0xff] }
 0x12f   :  { %v393_v63 = vmul.f32 %v3939_v10, %v377_v56  ;;  %v4050_v54 = vadd.f32 %v475_v53, %v415_v59  ;;  %v403_v49 = vmul.f32 %v3944_v27, %v377_v56  ;;  %v413_v58 = vmul.f32 %v2980_v55, %v377_v56  ;;  %v4068_v27 = vld [vmem:[%s6681_s0 + $0x7] ss:$0 sm:$0xff]  ;;  %v6752_v25 = vld [vmem:[#allocation29_spill] sm:$0xff] }
 0x130   :  { %v440_v5 = vsel %vm34_vm0, %v6748_v20, %v6747_v52  ;;  %v4058_v35 = vadd.f32 %v444_v37, %v384_v15  ;;  %v4060_v14 = vadd.f32 %v454_v39, %v394_v38  ;;  %v4062_v10 = vadd.f32 %v464_v22, %v404_v26 }
 0x131   :  { %v447_v61 = vmul.f32 %v3949_v42, %v441_v33  ;;  %v4074_v53 = vadd.f32 %v474_v17, %v414_v47  ;;  %v387_v37 = vadd.f32 %v383_v30, %v3954_v31  ;;  %v457_v6 = vmul.f32 %v3964_v0, %v441_v33 }
 0x132   :  { %1157 = vrot.lane.b32.xlu1 %v3782_v11, %s3183_s23  ;;  %v508_v51 = vsel %vm34_vm0, %v6750_v48, %v6749_v28  ;;  %v397_v62 = vadd.f32 %v393_v63, %v3956_v7  ;;  %v467_v56 = vmul.f32 %v3982_v43, %v441_v33  ;;  %v446_v59 = vmul.f32 %v3949_v42, %v440_v5  ;;  %v6753_v42 = vld [vmem:[#allocation27_spill] sm:$0xff]  ;;  %v6756_v28 = vld [vmem:[#allocation28_spill] sm:$0xff] }
 0x133   :  { %1155 = vrot.lane.b32.xlu0 %v3795_v19, %s3183_s23  ;;  %1163 = vrot.lane.b32.xlu2 %v3681_v1, %s3184_s24  ;;  %v4094_v1 = vld [vmem:[%s6681_s0 + $0x7f] ss:$0 sm:$0xff]  ;;  %v456_v15 = vmul.f32 %v3964_v0, %v440_v5  ;;  %v407_v26 = vadd.f32 %v403_v49, %v3968_v13  ;;  %v417_v39 = vadd.f32 %v413_v58, %v3970_v2  ;;  %v6755_v58 = vld [vmem:[#allocation16_spill] sm:$0xff] }
 0x134   :  { %v4070_v55 = vpop.permute.xlu1 %753  ;;  %v466_v22 = vmul.f32 %v3982_v43, %v440_v5  ;;  %v476_v47 = vmul.f32 %v3987_v36, %v440_v5  ;;  %v4108_v17 = vadd.f32 %v447_v61, %v387_v37  ;;  %v477_v7 = vmul.f32 %v3987_v36, %v441_v33  ;;  %v6754_v33 = vld [vmem:[#allocation30_spill] sm:$0xff]  ;;  %v4148_v48 = vld [vmem:[%s6681_s0 + $0x30] ss:$0 sm:$0xff] }
 0x135   :  { %v4096_v31 = vpop.permute.xlu0 %751  ;;  %v4102_v38 = vpop.permute.xlu2 %833  ;;  %v514_v30 = vmul.f32 %v4068_v27, %v508_v51  ;;  %v507_v0 = vsel %vm34_vm0, %v6753_v42, %v6752_v25  ;;  %v4115_v16 = vadd.f32 %v457_v6, %v397_v62  ;;  %v524_v13 = vmul.f32 %v4084_v46, %v508_v51  ;;  %v6760_v25 = vld [vmem:[#allocation19_spill] sm:$0xff] }
 0x136   :  { %6751 = vst [vmem:[#allocation12_spill] sm:$0xff] %v4102_v38  ;;  %v534_v2 = vmul.f32 %v4089_v23, %v508_v51  ;;  %v544_v43 = vmul.f32 %v4094_v1, %v508_v51  ;;  %v4120_v63 = vadd.f32 %v467_v56, %v407_v26  ;;  %v450_v49 = vadd.f32 %v446_v59, %v4005_v40  ;;  %v4135_v40 = vld [vmem:[%s6681_s0 + $0x8] ss:$0 sm:$0xff]  ;;  %v4153_v51 = vld [vmem:[%s6681_s0 + $0x58] ss:$0 sm:$0xff] }
 0x137   :  { %v460_v36 = vadd.f32 %v456_v15, %v4014_v41  ;;  %v506_v52 = vsel %vm34_vm0, %v6755_v58, %v6754_v33  ;;  %v470_v20 = vadd.f32 %v466_v22, %v4016_v8  ;;  %v480_v5 = vadd.f32 %v476_v47, %v416_v44  ;;  %v6757_v8 = vld [vmem:[#allocation32_spill] sm:$0xff] }
 0x138   :  { %v513_v61 = vmul.f32 %v4068_v27, %v507_v0  ;;  %v523_v37 = vmul.f32 %v4084_v46, %v507_v0  ;;  %v481_v41 = vadd.f32 %v477_v7, %v417_v39  ;;  %v4139_v6 = vadd.f32 %v514_v30, %v450_v49  ;;  %v6759_v30 = vld [vmem:[#allocation33_spill] sm:$0xff] }
 0x139   :  { %v574_v44 = vsel %vm34_vm0, %v6757_v8, %v6756_v28  ;;  %v4164_v56 = vadd.f32 %v524_v13, %v460_v36  ;;  %v4166_v59 = vadd.f32 %v534_v2, %v470_v20  ;;  %v4168_v15 = vadd.f32 %v544_v43, %v480_v5  ;;  %v4192_v36 = vld [vmem:[%s6680_s2 + $0x38] sm:$0xff] }
 0x13a   :  { %1167 = vrot.lane.b32.xlu1 %v3795_v19, %s3184_s24  ;;  %v533_v19 = vmul.f32 %v4089_v23, %v507_v0  ;;  %v512_v26 = vmul.f32 %v4068_v27, %v506_v52  ;;  %v522_v22 = vmul.f32 %v4084_v46, %v506_v52  ;;  %v532_v47 = vmul.f32 %v4089_v23, %v506_v52 }
 0x13b   :  { %1165 = vrot.lane.b32.xlu0 %v3708_v34, %s3184_s24  ;;  %v4158_v34 = vld [vmem:[%s6681_s0 + $0x80] ss:$0 sm:$0xff]  ;;  %1169 = vrot.lane.b32.xlu2 %v3782_v11, %s3184_s24  ;;  %v542_v7 = vmul.f32 %v4094_v1, %v506_v52  ;;  %v509_v11 = vsel %vm34_vm0, %v6760_v25, %v6759_v30  ;;  %v4182_v13 = vadd.f32 %v513_v61, %v4041_v50  ;;  %v4212_v61 = vld [vmem:[%s6680_s2 + $0x90] sm:$0xff] }
 0x13c   :  { %v4160_v62 = vpop.permute.xlu1 %763  ;;  %v4185_v2 = vadd.f32 %v523_v37, %v4043_v21  ;;  %v543_v43 = vmul.f32 %v4094_v1, %v507_v0  ;;  %v580_v49 = vmul.f32 %v4135_v40, %v574_v44  ;;  %v4195_v33 = vadd.f32 %v533_v19, %v4045_v3  ;;  %v4203_v21 = vld [vmem:[%s6680_s2 + $0x30] sm:$0xff] }
 0x13d   :  { %v4171_v39 = vpop.permute.xlu0 %757  ;;  %v4179_v42 = vpop.permute.xlu2 %887  ;;  %v590_v58 = vmul.f32 %v4148_v48, %v574_v44  ;;  %v600_v50 = vmul.f32 %v4153_v51, %v574_v44  ;;  %v610_v52 = vmul.f32 %v4158_v34, %v574_v44  ;;  %v516_v0 = vadd.f32 %v512_v26, %v4058_v35  ;;  %v4221_v35 = vld [vmem:[%s6681_s0 + $0x9] ss:$0 sm:$0xff]  ;;  %v6764_v44 = vld [vmem:[#allocation34_spill] sm:$0xff]  ;;  %v4248_v25 = vld [vmem:[%s6681_s0 + $0x31] ss:$0 sm:$0xff] }
 0x13e   :  { %6758 = vst [vmem:[#allocation14_spill] sm:$0xff] %v4171_v39  ;;  %v515_v20 = vmul.f32 %v4068_v27, %v509_v11  ;;  %v525_v5 = vmul.f32 %v4084_v46, %v509_v11  ;;  %v535_v3 = vmul.f32 %v4089_v23, %v509_v11  ;;  %v526_v37 = vadd.f32 %v522_v22, %v4060_v14  ;;  %v6762_v23 = vld [vmem:[#allocation31_spill] sm:$0xff] }
 0x13f   :  { %6761 = vst [vmem:[#allocation13_spill] sm:$0xff] %v4179_v42  ;;  %v536_v19 = vadd.f32 %v532_v47, %v4062_v10  ;;  %v546_v28 = vadd.f32 %v542_v7, %v4074_v53  ;;  %v545_v8 = vmul.f32 %v4094_v1, %v509_v11  ;;  %v547_v27 = vadd.f32 %v543_v43, %v4050_v54  ;;  %v6763_v14 = vld [vmem:[#allocation35_spill] sm:$0xff]  ;;  %v6765_v53 = vld [vmem:[#allocation9_spill] sm:$0xff]  ;;  %v6766_v54 = vld [vmem:[#allocation38_spill] sm:$0xff] }
 0x140   :  { %v4226_v46 = vadd.f32 %v580_v49, %v516_v0  ;;  %v577_v10 = vsel %vm34_vm0, %v6763_v14, %v6762_v23  ;;  %v641_v1 = vsel %vm34_vm0, %v6765_v53, %v6764_v44  ;;  %v4236_v26 = vadd.f32 %v590_v58, %v526_v37  ;;  %v6767_v7 = vld [vmem:[#allocation36_spill] sm:$0xff]  ;;  %v6768_v0 = vld [vmem:[#allocation39_spill] sm:$0xff]  ;;  %v6769_v37 = vld [vmem:[#allocation25_spill] sm:$0xff] }
 0x141   :  { %v4238_v22 = vadd.f32 %v600_v50, %v536_v19  ;;  %v4240_v47 = vadd.f32 %v610_v52, %v546_v28  ;;  %v576_v30 = vsel %vm34_vm0, %v6767_v7, %v6766_v54  ;;  %v519_v43 = vadd.f32 %v515_v20, %v4108_v17  ;;  %v4260_v50 = vld [vmem:[%s6681_s0 + $0x59] ss:$0 sm:$0xff]  ;;  %v4265_v52 = vld [vmem:[%s6681_s0 + $0x81] ss:$0 sm:$0xff] }
 0x142   :  { %1230 = vrot.lane.b32.xlu1 %v4192_v36, %s3180_s16  ;;  %v529_v49 = vadd.f32 %v525_v5, %v4115_v16  ;;  %v539_v58 = vadd.f32 %v535_v3, %v4120_v63  ;;  %v575_v19 = vsel %vm34_vm0, %v6769_v37, %v6768_v0  ;;  %v549_v17 = vadd.f32 %v545_v8, %v481_v41  ;;  %v4288_v7 = vld [vmem:[%s6680_s2 + $0x98] sm:$0xff] }
 0x143   :  { %1228 = vrot.lane.b32.xlu0 %v4203_v21, %s3180_s16  ;;  %1232 = vrot.lane.b32.xlu2 %v4212_v61, %s3180_s16  ;;  %v583_v16 = vmul.f32 %v4135_v40, %v577_v10  ;;  %v593_v63 = vmul.f32 %v4148_v48, %v577_v10  ;;  %v647_v20 = vmul.f32 %v4221_v35, %v641_v1 }
 0x144   :  { %v4250_v11 = vpop.permute.xlu1 %769  ;;  %v603_v3 = vmul.f32 %v4153_v51, %v577_v10  ;;  %v613_v23 = vmul.f32 %v4158_v34, %v577_v10  ;;  %v582_v14 = vmul.f32 %v4135_v40, %v576_v30  ;;  %v592_v44 = vmul.f32 %v4148_v48, %v576_v30 }
 0x145   :  { %v4270_v28 = vpop.permute.xlu0 %767  ;;  %v4275_v5 = vpop.permute.xlu2 %897  ;;  %v602_v53 = vmul.f32 %v4153_v51, %v576_v30  ;;  %v612_v41 = vmul.f32 %v4158_v34, %v576_v30  ;;  %v657_v8 = vmul.f32 %v4248_v25, %v641_v1  ;;  %v581_v54 = vmul.f32 %v4135_v40, %v575_v19  ;;  %v6772_v40 = vld [vmem:[#allocation7_spill] sm:$0xff] }
 0x146   :  { %6770 = vst [vmem:[#allocation3_spill] sm:$0xff] %v4270_v28  ;;  %v667_v0 = vmul.f32 %v4260_v50, %v641_v1  ;;  %v677_v10 = vmul.f32 %v4265_v52, %v641_v1  ;;  %v591_v37 = vmul.f32 %v4148_v48, %v575_v19  ;;  %v601_v42 = vmul.f32 %v4153_v51, %v575_v19 }
 0x147   :  { %6771 = vst [vmem:[#allocation17_spill] sm:$0xff] %v4275_v5  ;;  %v4294_v5 = vadd.f32 %v583_v16, %v519_v43  ;;  %v4296_v30 = vadd.f32 %v593_v63, %v529_v49  ;;  %v611_v28 = vmul.f32 %v4158_v34, %v575_v19  ;;  %v640_v38 = vsel %vm34_vm0, %v6772_v40, %v3823_v4  ;;  %v6773_v49 = vld [vmem:[#allocation8_spill] sm:$0xff]  ;;  %v4370_v40 = vld [vmem:[%s6681_s0 + $0x82] ss:$0 sm:$0xff] }
 0x148   :  { %v4304_v39 = vadd.f32 %v603_v3, %v539_v58  ;;  %v4306_v1 = vadd.f32 %v613_v23, %v549_v17  ;;  %v586_v48 = vadd.f32 %v582_v14, %v4139_v6  ;;  %v596_v51 = vadd.f32 %v592_v44, %v4164_v56  ;;  %v6774_v3 = vld [vmem:[#allocation40_spill] sm:$0xff] }
 0x149   :  { %v606_v34 = vadd.f32 %v602_v53, %v4166_v59  ;;  %v616_v43 = vadd.f32 %v612_v41, %v4168_v15  ;;  %v585_v4 = vadd.f32 %v581_v54, %v4182_v13  ;;  %v639_v58 = vsel %vm34_vm0, %v6773_v49, %v3831_v24  ;;  %v4329_v15 = vld [vmem:[%s6681_s0 + $0xa] ss:$0 sm:$0xff] }
 0x14a   :  { %1284 = vrot.lane.b32.xlu1 %v4203_v21, %s3181_s17  ;;  %v595_v6 = vadd.f32 %v591_v37, %v4185_v2  ;;  %v605_v56 = vadd.f32 %v601_v42, %v4195_v33  ;;  %v646_v17 = vmul.f32 %v4221_v35, %v640_v38  ;;  %v656_v59 = vmul.f32 %v4248_v25, %v640_v38  ;;  %v4341_v2 = vld [vmem:[%s6681_s0 + $0x32] ss:$0 sm:$0xff]  ;;  %v4346_v33 = vld [vmem:[%s6681_s0 + $0x5a] ss:$0 sm:$0xff] }
 0x14b   :  { %1234 = vrot.lane.b32.xlu0 %v4288_v7, %s3180_s16  ;;  %1286 = vrot.lane.b32.xlu2 %v4192_v36, %s3181_s17  ;;  %v615_v24 = vadd.f32 %v611_v28, %v547_v27  ;;  %v666_v16 = vmul.f32 %v4260_v50, %v640_v38  ;;  %v676_v63 = vmul.f32 %v4265_v52, %v640_v38 }
 0x14c   :  { %v4318_v19 = vpop.permute.xlu1 %831  ;;  %v707_v42 = vsel %vm34_vm0, %v3885_v29, %v6774_v3  ;;  %v4350_v27 = vadd.f32 %v647_v20, %v586_v48  ;;  %v645_v38 = vmul.f32 %v4221_v35, %v639_v58  ;;  %v655_v28 = vmul.f32 %v4248_v25, %v639_v58 }
 0x14d   :  { %v4331_v13 = vpop.permute.xlu0 %829  ;;  %v4348_v23 = vpop.permute.xlu2 %951  ;;  %v665_v29 = vmul.f32 %v4260_v50, %v639_v58  ;;  %v4355_v14 = vadd.f32 %v657_v8, %v596_v51  ;;  %v4357_v44 = vadd.f32 %v667_v0, %v606_v34  ;;  %v4359_v53 = vadd.f32 %v677_v10, %v616_v43  ;;  %v3169_v8 = vld [vmem:[%s6680_s2 + $0x80] sm:$0xff] }
 0x14e   :  { %6775 = vst [vmem:[#allocation15_spill] sm:$0xff] %v4348_v23  ;;  %v675_v41 = vmul.f32 %v4265_v52, %v639_v58  ;;  %v4362_v54 = vadd.f32 %v646_v17, %v585_v4  ;;  %v4364_v37 = vadd.f32 %v656_v59, %v595_v6  ;;  %v713_v20 = vmul.f32 %v4329_v15, %v707_v42 }
 0x14f   :  { %v642_v0 = vsel %vm34_vm0, %v3169_v8, %v3893_v45  ;;  %v4377_v10 = vadd.f32 %v666_v16, %v605_v56  ;;  %v4379_v48 = vadd.f32 %v676_v63, %v615_v24  ;;  %v723_v51 = vmul.f32 %v4341_v2, %v707_v42 }
 0x150   :  { %v733_v34 = vmul.f32 %v4346_v33, %v707_v42  ;;  %v649_v43 = vadd.f32 %v645_v38, %v4226_v46  ;;  %v659_v4 = vadd.f32 %v655_v28, %v4236_v26  ;;  %v669_v49 = vadd.f32 %v665_v29, %v4238_v22 }
 0x151   :  { %v710_v45 = vsel %vm34_vm0, %v3927_v18, %v3833_v60  ;;  %v679_v58 = vadd.f32 %v675_v41, %v4240_v47  ;;  %v648_v6 = vmul.f32 %v4221_v35, %v642_v0  ;;  %v658_v56 = vmul.f32 %v4248_v25, %v642_v0 }
 0x152   :  { %1290 = vrot.lane.b32.xlu1 %v4288_v7, %s3181_s17  ;;  %v709_v46 = vsel %vm34_vm0, %v3951_v9, %v4010_v12  ;;  %v4403_v22 = vadd.f32 %v713_v20, %v649_v43  ;;  %v743_v60 = vmul.f32 %v4370_v40, %v707_v42  ;;  %v668_v18 = vmul.f32 %v4260_v50, %v642_v0 }
 0x153   :  { %1288 = vrot.lane.b32.xlu0 %v4212_v61, %s3181_s17  ;;  %1296 = vrot.lane.b32.xlu2 %v4203_v21, %s3182_s22  ;;  %v678_v47 = vmul.f32 %v4265_v52, %v642_v0  ;;  %v4410_v25 = vadd.f32 %v723_v51, %v659_v4  ;;  %v4412_v17 = vadd.f32 %v733_v34, %v669_v49  ;;  %v6777_v52 = vld [vmem:[#allocation37_spill] sm:$0xff] }
 0x154   :  { %v4399_v26 = vpop.permute.xlu1 %885  ;;  %v716_v9 = vmul.f32 %v4329_v15, %v710_v45  ;;  %v726_v12 = vmul.f32 %v4341_v2, %v710_v45  ;;  %v736_v24 = vmul.f32 %v4346_v33, %v710_v45  ;;  %v746_v16 = vmul.f32 %v4370_v40, %v710_v45  ;;  %v3170_v51 = vld [vmem:[%s6680_s2 + $0x19] sm:$0xff]  ;;  %v3001_v45 = vld [vmem:[%s6681_s0 + $0xb] ss:$0 sm:$0xff] }
 0x155   :  { %v4408_v35 = vpop.permute.xlu0 %883  ;;  %v4416_v59 = vpop.permute.xlu2 %957  ;;  %v715_v50 = vmul.f32 %v4329_v15, %v709_v46  ;;  %v708_v63 = vsel %vm34_vm0, %v6777_v52, %v4021_v57  ;;  %v652_v3 = vadd.f32 %v648_v6, %v4294_v5  ;;  %v662_v42 = vadd.f32 %v658_v56, %v4296_v30  ;;  %v4436_v57 = vld [vmem:[%s6681_s0 + $0xc] ss:$0 sm:$0xff]  ;;  %v4456_v34 = vld [vmem:[%s6681_s0 + $0x5c] ss:$0 sm:$0xff] }
 0x156   :  { %6776 = vst [vmem:[#allocation18_spill] sm:$0xff] %v4416_v59  ;;  %v725_v38 = vmul.f32 %v4341_v2, %v709_v46  ;;  %v735_v28 = vmul.f32 %v4346_v33, %v709_v46  ;;  %v4428_v29 = vadd.f32 %v743_v60, %v679_v58  ;;  %v672_v41 = vadd.f32 %v668_v18, %v4304_v39  ;;  %v3002_v58 = vld [vmem:[%s6681_s0 + $0x33] ss:$0 sm:$0xff] }
 0x157   :  { %v682_v20 = vadd.f32 %v678_v47, %v4306_v1  ;;  %v745_v8 = vmul.f32 %v4370_v40, %v709_v46  ;;  %v4438_v5 = vadd.f32 %v716_v9, %v652_v3  ;;  %v4440_v30 = vadd.f32 %v726_v12, %v662_v42  ;;  %v4451_v1 = vld [vmem:[%s6681_s0 + $0x34] ss:$0 sm:$0xff] }
 0x158   :  { %v714_v0 = vmul.f32 %v4329_v15, %v708_v63  ;;  %v839_v39 = vsel %vm34_vm0, %v3170_v51, %v4029_v32  ;;  %v4461_v15 = vld [vmem:[%s6681_s0 + $0x84] ss:$0 sm:$0xff]  ;;  %v740_v43 = vadd.f32 %v736_v24, %v672_v41  ;;  %v4466_v4 = vadd.f32 %v715_v50, %v4350_v27 }
 0x159   :  { %v750_v32 = vadd.f32 %v746_v16, %v682_v20  ;;  %v724_v49 = vmul.f32 %v4341_v2, %v708_v63  ;;  %v4478_v6 = vadd.f32 %v725_v38, %v4355_v14  ;;  %v4481_v56 = vadd.f32 %v735_v28, %v4357_v44  ;;  %v6778_v2 = vld [vmem:[#allocation6_spill] sm:$0xff]  ;;  %v3003_v44 = vld [vmem:[%s6681_s0 + $0x5b] ss:$0 sm:$0xff]  ;;  %v6781_v28 = vld [vmem:[#allocation12_spill] sm:$0xff] }
 0x15a   :  { %1300 = vrot.lane.b32.xlu1 %v4212_v61, %s3182_s22  ;;  %v734_v27 = vmul.f32 %v4346_v33, %v708_v63  ;;  %v776_v46 = vsel %vm34_vm0, %v4070_v55, %v6778_v2  ;;  %v4492_v18 = vadd.f32 %v745_v8, %v4359_v53  ;;  %v744_v14 = vmul.f32 %v4370_v40, %v708_v63  ;;  %v3171_v38 = vld [vmem:[%s6680_s2 + $0x81] sm:$0xff] }
 0x15b   :  { %1298 = vrot.lane.b32.xlu0 %v4192_v36, %s3182_s22  ;;  %1302 = vrot.lane.b32.xlu2 %v4288_v7, %s3182_s22  ;;  %v775_v33 = vsel %vm34_vm0, %v4096_v31, %v4160_v62  ;;  %v845_v55 = vmul.f32 %v4436_v57, %v839_v39  ;;  %v718_v9 = vadd.f32 %v714_v0, %v4362_v54  ;;  %v3004_v31 = vld [vmem:[%s6681_s0 + $0x83] ss:$0 sm:$0xff] }
 0x15c   :  { %v4487_v60 = vpop.permute.xlu1 %895  ;;  %v855_v12 = vmul.f32 %v4451_v1, %v839_v39  ;;  %v865_v53 = vmul.f32 %v4456_v34, %v839_v39  ;;  %v875_v40 = vmul.f32 %v4461_v15, %v839_v39  ;;  %v728_v16 = vadd.f32 %v724_v49, %v4364_v37  ;;  %v6780_v62 = vld [vmem:[#allocation14_spill] sm:$0xff] }
 0x15d   :  { %v4502_v47 = vpop.permute.xlu0 %889  ;;  %v4508_v24 = vpop.permute.xlu2 %967  ;;  %v782_v50 = vmul.f32 %v3001_v45, %v776_v46  ;;  %v792_v52 = vmul.f32 %v3002_v58, %v776_v46  ;;  %v778_v54 = vsel %vm34_vm0, %v6780_v62, %v4250_v11  ;;  %v738_v63 = vadd.f32 %v734_v27, %v4377_v10 }
 0x15e   :  { %6779 = vst [vmem:[#allocation10_spill] sm:$0xff] %v4502_v47  ;;  %v781_v3 = vmul.f32 %v3001_v45, %v775_v33  ;;  %v791_v42 = vmul.f32 %v3002_v58, %v775_v33  ;;  %v842_v37 = vsel %vm34_vm0, %v3171_v38, %v6781_v28  ;;  %v748_v41 = vadd.f32 %v744_v14, %v4379_v48  ;;  %v6783_v38 = vld [vmem:[#allocation41_spill] sm:$0xff] }
 0x15f   :  { %v802_v20 = vmul.f32 %v3003_v44, %v776_v46  ;;  %v801_v8 = vmul.f32 %v3003_v44, %v775_v33  ;;  %v811_v0 = vmul.f32 %v3004_v31, %v775_v33  ;;  %v784_v51 = vmul.f32 %v3001_v45, %v778_v54 }
 0x160   :  { %v794_v39 = vmul.f32 %v3002_v58, %v778_v54  ;;  %v804_v49 = vmul.f32 %v3003_v44, %v778_v54  ;;  %v814_v11 = vmul.f32 %v3004_v31, %v778_v54  ;;  %v4526_v10 = vadd.f32 %v782_v50, %v718_v9  ;;  %v6782_v54 = vld [vmem:[#allocation3_spill] sm:$0xff] }
 0x161   :  { %v4528_v27 = vadd.f32 %v792_v52, %v728_v16  ;;  %v812_v2 = vmul.f32 %v3004_v31, %v776_v46  ;;  %v848_v62 = vmul.f32 %v4436_v57, %v842_v37  ;;  %v785_v48 = vadd.f32 %v781_v3, %v4403_v22 }
 0x162   :  { %1354 = vrot.lane.b32.xlu1 %v4192_v36, %s3183_s23  ;;  %v795_v14 = vadd.f32 %v791_v42, %v4410_v25  ;;  %v858_v33 = vmul.f32 %v4451_v1, %v842_v37  ;;  %v777_v28 = vsel %vm34_vm0, %v6783_v38, %v6782_v54  ;;  %v805_v46 = vadd.f32 %v801_v8, %v4412_v17 }
 0x163   :  { %1352 = vrot.lane.b32.xlu0 %v4203_v21, %s3183_s23  ;;  %1356 = vrot.lane.b32.xlu2 %v4212_v61, %s3183_s23  ;;  %v815_v16 = vadd.f32 %v811_v0, %v4428_v29  ;;  %v868_v50 = vmul.f32 %v4456_v34, %v842_v37  ;;  %v878_v22 = vmul.f32 %v4461_v15, %v842_v37  ;;  %v3172_v37 = vld [vmem:[%s6680_s2 + $0x79] sm:$0xff] }
 0x164   :  { %v4539_v9 = vpop.permute.xlu1 %901  ;;  %v788_v52 = vadd.f32 %v784_v51, %v4438_v5  ;;  %v798_v3 = vadd.f32 %v794_v39, %v4440_v30  ;;  %v808_v42 = vadd.f32 %v804_v49, %v740_v43  ;;  %v818_v54 = vadd.f32 %v814_v11, %v750_v32  ;;  %v4598_v0 = vld [vmem:[%s6681_s0 + $0x5d] ss:$0 sm:$0xff]  ;;  %v4603_v51 = vld [vmem:[%s6681_s0 + $0x85] ss:$0 sm:$0xff] }
 0x165   :  { %6784 = vst [vmem:[#allocation20_spill] sm:$0xff] %v4539_v9  ;;  %v4547_v25 = vpop.permute.xlu0 %899  ;;  %v1030_v38 = vpop.permute.xlu2 %1029  ;;  %v806_v59 = vadd.f32 %v802_v20, %v738_v63  ;;  %v816_v23 = vadd.f32 %v812_v2, %v748_v41  ;;  %v783_v47 = vmul.f32 %v3001_v45, %v777_v28  ;;  %v793_v9 = vmul.f32 %v3002_v58, %v777_v28  ;;  %v3173_v45 = vld [vmem:[%s6680_s2 + $0x21] sm:$0xff]  ;;  %v6785_v41 = vld [vmem:[#allocation17_spill] sm:$0xff] }
 0x166   :  { %v4551_v17 = vadd.f32 %v845_v55, %v785_v48  ;;  %v4553_v29 = vadd.f32 %v855_v12, %v795_v14  ;;  %v803_v8 = vmul.f32 %v3003_v44, %v777_v28  ;;  %v841_v5 = vsel %vm34_vm0, %v3172_v37, %v4318_v19  ;;  %v4580_v19 = vld [vmem:[%s6681_s0 + $0xd] ss:$0 sm:$0xff] }
 0x167   :  { %v4560_v30 = vadd.f32 %v865_v53, %v805_v46  ;;  %v4562_v43 = vadd.f32 %v875_v40, %v815_v16  ;;  %v813_v32 = vmul.f32 %v3004_v31, %v777_v28  ;;  %v840_v58 = vsel %vm34_vm0, %v3173_v45, %v4331_v13  ;;  %v4585_v53 = vld [vmem:[%s6681_s0 + $0x35] ss:$0 sm:$0xff] }
 0x168   :  { %v4569_v44 = vadd.f32 %v848_v62, %v788_v52  ;;  %v4571_v55 = vadd.f32 %v858_v33, %v798_v3  ;;  %v4573_v12 = vadd.f32 %v868_v50, %v808_v42  ;;  %v4575_v63 = vadd.f32 %v878_v22, %v818_v54  ;;  %v4656_v22 = vld [vmem:[%s6681_s0 + $0x5f] ss:$0 sm:$0xff]  ;;  %v4661_v52 = vld [vmem:[%s6681_s0 + $0x87] ss:$0 sm:$0xff] }
 0x169   :  { %v787_v13 = vadd.f32 %v783_v47, %v4466_v4  ;;  %v797_v40 = vadd.f32 %v793_v9, %v4478_v6  ;;  %v847_v31 = vmul.f32 %v4436_v57, %v841_v5  ;;  %v908_v20 = vsel %vm34_vm0, %v4399_v26, %v6785_v41  ;;  %v4640_v9 = vld [vmem:[%s6681_s0 + $0xf] ss:$0 sm:$0xff]  ;;  %v4691_v41 = vld [vmem:[%s6681_s0 + $0x36] ss:$0 sm:$0xff] }
 0x16a   :  { %1364 = vrot.lane.b32.xlu1 %v4203_v21, %s3184_s24  ;;  %v807_v21 = vadd.f32 %v803_v8, %v4481_v56  ;;  %v857_v4 = vmul.f32 %v4451_v1, %v841_v5  ;;  %v846_v6 = vmul.f32 %v4436_v57, %v840_v58  ;;  %v856_v26 = vmul.f32 %v4451_v1, %v840_v58 }
 0x16b   :  { %1358 = vrot.lane.b32.xlu0 %v4288_v7, %s3183_s23  ;;  %1366 = vrot.lane.b32.xlu2 %v4192_v36, %s3184_s24  ;;  %v866_v39 = vmul.f32 %v4456_v34, %v840_v58  ;;  %v876_v49 = vmul.f32 %v4461_v15, %v840_v58  ;;  %v907_v11 = vsel %vm34_vm0, %v4408_v35, %v4487_v60 }
 0x16c   :  { %v956_v47 = vpop.permute.xlu1 %955  ;;  %v867_v57 = vmul.f32 %v4456_v34, %v841_v5  ;;  %v877_v1 = vmul.f32 %v4461_v15, %v841_v5  ;;  %v914_v62 = vmul.f32 %v4580_v19, %v908_v20  ;;  %v924_v36 = vmul.f32 %v4585_v53, %v908_v20 }
 0x16d   :  { %v4620_v56 = vsel %vm34_vm0, %v956_v47, %v4508_v24  ;;  %v954_v2 = vpop.permute.xlu0 %953  ;;  %v4626_v48 = vpop.permute.xlu2 %1083  ;;  %v817_v14 = vadd.f32 %v813_v32, %v4492_v18  ;;  %v4629_v33 = vadd.f32 %v847_v31, %v787_v13  ;;  %v934_v35 = vmul.f32 %v4598_v0, %v908_v20  ;;  %v4645_v18 = vld [vmem:[%s6681_s0 + $0x37] ss:$0 sm:$0xff]  ;;  %v4679_v32 = vld [vmem:[%s6681_s0 + $0xe] ss:$0 sm:$0xff] }
 0x16e   :  { %v944_v60 = vmul.f32 %v4603_v51, %v908_v20  ;;  %v850_v24 = vadd.f32 %v846_v6, %v4526_v10  ;;  %v860_v34 = vadd.f32 %v856_v26, %v4528_v27  ;;  %v913_v15 = vmul.f32 %v4580_v19, %v907_v11  ;;  %v3174_v27 = vld [vmem:[%s6680_s2 + $0x22] sm:$0xff]  ;;  %v6786_v13 = vld [vmem:[#allocation20_spill] sm:$0xff]  ;;  %v4696_v20 = vld [vmem:[%s6681_s0 + $0x5e] ss:$0 sm:$0xff] }
 0x16f   :  { %v923_v28 = vmul.f32 %v4585_v53, %v907_v11  ;;  %v4647_v46 = vadd.f32 %v857_v4, %v797_v40  ;;  %v870_v16 = vadd.f32 %v866_v39, %v806_v59  ;;  %v880_v10 = vadd.f32 %v876_v49, %v816_v23  ;;  %v4666_v23 = vld [vmem:[%s6680_s2 + $0x31] sm:$0xff]  ;;  %v6787_v40 = vld [vmem:[#allocation10_spill] sm:$0xff] }
 0x170   :  { %v1040_v50 = vsel %vm34_vm0, %v3174_v27, %v1030_v38  ;;  %v4668_v59 = vadd.f32 %v867_v57, %v807_v21  ;;  %v4670_v3 = vadd.f32 %v877_v1, %v817_v14  ;;  %v918_v42 = vadd.f32 %v914_v62, %v850_v24  ;;  %v6788_v14 = vld [vmem:[#allocation13_spill] sm:$0xff] }
 0x171   :  { %v928_v54 = vadd.f32 %v924_v36, %v860_v34  ;;  %v938_v38 = vadd.f32 %v934_v35, %v870_v16  ;;  %v948_v8 = vadd.f32 %v944_v60, %v880_v10  ;;  %v933_v37 = vmul.f32 %v4598_v0, %v907_v11  ;;  %v6789_v60 = vld [vmem:[#allocation15_spill] sm:$0xff]  ;;  %v4726_v34 = vld [vmem:[%s6680_s2 + $0x91] sm:$0xff] }
 0x172   :  { %1370 = vrot.lane.b32.xlu1 %v4288_v7, %s3184_s24  ;;  %v943_v5 = vmul.f32 %v4603_v51, %v907_v11  ;;  %v917_v45 = vadd.f32 %v913_v15, %v4551_v17  ;;  %v927_v58 = vadd.f32 %v923_v28, %v4553_v29  ;;  %v910_v31 = vsel %vm34_vm0, %v6787_v40, %v6786_v13  ;;  %v4701_v17 = vld [vmem:[%s6681_s0 + $0x86] ss:$0 sm:$0xff] }
 0x173   :  { %1368 = vrot.lane.b32.xlu0 %v4212_v61, %s3184_s24  ;;  %v1046_v21 = vmul.f32 %v4640_v9, %v1040_v50  ;;  %1428 = vrot.lane.b32.xlu2 %v4666_v23, %s3180_s16  ;;  %v1056_v6 = vmul.f32 %v4645_v18, %v1040_v50  ;;  %v1066_v26 = vmul.f32 %v4656_v22, %v1040_v50 }
 0x174   :  { %v966_v29 = vpop.permute.xlu1 %965  ;;  %v1076_v47 = vmul.f32 %v4661_v52, %v1040_v50  ;;  %v937_v36 = vadd.f32 %v933_v37, %v4560_v30  ;;  %v909_v35 = vsel %vm34_vm0, %v6788_v14, %v4547_v25  ;;  %v4731_v30 = vld [vmem:[%s6680_s2 + $0x39] sm:$0xff]  ;;  %v947_v40 = vadd.f32 %v943_v5, %v4562_v43 }
 0x175   :  { %v976_v4 = vsel %vm34_vm0, %v954_v2, %v966_v29  ;;  %v964_v39 = vpop.permute.xlu0 %963  ;;  %v4714_v62 = vpop.permute.xlu2 %1089  ;;  %v916_v2 = vmul.f32 %v4580_v19, %v910_v31  ;;  %v926_v29 = vmul.f32 %v4585_v53, %v910_v31  ;;  %v983_v14 = vmul.f32 %v4679_v32, %v4620_v56 }
 0x176   :  { %v982_v49 = vmul.f32 %v4679_v32, %v976_v4  ;;  %v992_v11 = vmul.f32 %v4691_v41, %v976_v4  ;;  %v1002_v57 = vmul.f32 %v4696_v20, %v976_v4  ;;  %v1012_v1 = vmul.f32 %v4701_v17, %v976_v4 }
 0x177   :  { %v975_v24 = vsel %vm34_vm0, %v6789_v60, %v964_v39  ;;  %v936_v4 = vmul.f32 %v4598_v0, %v910_v31  ;;  %v946_v39 = vmul.f32 %v4603_v51, %v910_v31  ;;  %v3175_v31 = vld [vmem:[%s6680_s2 + $0x1a] sm:$0xff] }
 0x178   :  { %v986_v15 = vadd.f32 %v982_v49, %v918_v42  ;;  %v996_v28 = vadd.f32 %v992_v11, %v928_v54  ;;  %v1006_v16 = vadd.f32 %v1002_v57, %v938_v38  ;;  %v1016_v10 = vadd.f32 %v1012_v1, %v948_v8  ;;  %v4740_v42 = vld [vmem:[%s6680_s2 + $0x99] sm:$0xff] }
 0x179   :  { %v981_v27 = vmul.f32 %v4679_v32, %v975_v24  ;;  %v991_v25 = vmul.f32 %v4691_v41, %v975_v24  ;;  %v1001_v50 = vmul.f32 %v4696_v20, %v975_v24  ;;  %v1011_v37 = vmul.f32 %v4701_v17, %v975_v24  ;;  %v6790_v60 = vld [vmem:[#allocation18_spill] sm:$0xff] }
 0x17a   :  { %v4742_v54 = vadd.f32 %v1046_v21, %v986_v15  ;;  %v4744_v38 = vadd.f32 %v1056_v6, %v996_v28  ;;  %v4746_v8 = vadd.f32 %v1066_v26, %v1006_v16  ;;  %v4748_v13 = vadd.f32 %v1076_v47, %v1016_v10  ;;  %1432 = vrot.lane.b32.xlu1 %v4726_v34, %s3180_s16 }
 0x17b   :  { %1430 = vrot.lane.b32.xlu0 %v4731_v30, %s3180_s16  ;;  %v920_v21 = vadd.f32 %v916_v2, %v4569_v44  ;;  %v915_v6 = vmul.f32 %v4580_v19, %v909_v35  ;;  %v925_v26 = vmul.f32 %v4585_v53, %v909_v35  ;;  %v985_v47 = vadd.f32 %v981_v27, %v917_v45 }
 0x17c   :  { %v1028_v49 = vpop.permute.xlu1 %1027  ;;  %1434 = vrot.lane.b32.xlu2 %v4740_v42, %s3180_s16  ;;  %v995_v43 = vadd.f32 %v991_v25, %v927_v58  ;;  %v1005_v5 = vadd.f32 %v1001_v50, %v937_v36  ;;  %v1015_v11 = vadd.f32 %v1011_v37, %v947_v40  ;;  %v935_v58 = vmul.f32 %v4598_v0, %v909_v35 }
 0x17d   :  { %v1039_v57 = vsel %vm34_vm0, %v3175_v31, %v1028_v49  ;;  %v970_v1 = vpop.permute.xlu0 %969  ;;  %v4771_v2 = vpop.permute.xlu2 %1099  ;;  %v945_v36 = vmul.f32 %v4603_v51, %v909_v35  ;;  %v930_v25 = vadd.f32 %v926_v29, %v4571_v55  ;;  %v940_v50 = vadd.f32 %v936_v4, %v4573_v12  ;;  %v3177_v31 = vld [vmem:[%s6680_s2 + $0x7a] sm:$0xff] }
 0x17e   :  { %v1045_v44 = vmul.f32 %v4640_v9, %v1039_v57  ;;  %v1055_v19 = vmul.f32 %v4645_v18, %v1039_v57  ;;  %v1065_v53 = vmul.f32 %v4656_v22, %v1039_v57  ;;  %v1075_v45 = vmul.f32 %v4661_v52, %v1039_v57 }
 0x17f   :  { %v978_v24 = vsel %vm34_vm0, %v6790_v60, %v970_v1  ;;  %v950_v37 = vadd.f32 %v946_v39, %v4575_v63  ;;  %v919_v40 = vadd.f32 %v915_v6, %v4629_v33  ;;  %v1003_v49 = vmul.f32 %v4696_v20, %v4620_v56  ;;  %v4839_v60 = vld [vmem:[%s6681_s0 + $0x10] ss:$0 sm:$0xff] }
 0x180   :  { %v4779_v15 = vadd.f32 %v1045_v44, %v985_v47  ;;  %v4781_v28 = vadd.f32 %v1055_v19, %v995_v43  ;;  %v4783_v16 = vadd.f32 %v1065_v53, %v1005_v5  ;;  %v4785_v10 = vadd.f32 %v1075_v45, %v1015_v11 }
 0x181   :  { %v984_v27 = vmul.f32 %v4679_v32, %v978_v24  ;;  %v994_v0 = vmul.f32 %v4691_v41, %v978_v24  ;;  %v1004_v51 = vmul.f32 %v4696_v20, %v978_v24  ;;  %v1014_v35 = vmul.f32 %v4701_v17, %v978_v24  ;;  %v4846_v24 = vld [vmem:[%s6681_s0 + $0x38] ss:$0 sm:$0xff] }
 0x182   :  { %1486 = vrot.lane.b32.xlu1 %v4731_v30, %s3181_s17  ;;  %v929_v47 = vadd.f32 %v925_v26, %v4647_v46  ;;  %v993_v32 = vmul.f32 %v4691_v41, %v4620_v56  ;;  %v1013_v55 = vmul.f32 %v4701_v17, %v4620_v56  ;;  %v939_v12 = vadd.f32 %v935_v58, %v4668_v59  ;;  %v3176_v56 = vld [vmem:[%s6680_s2 + $0x82] sm:$0xff] }
 0x183   :  { %1484 = vrot.lane.b32.xlu0 %v4666_v23, %s3181_s17  ;;  %v949_v63 = vadd.f32 %v945_v36, %v4670_v3  ;;  %v987_v33 = vadd.f32 %v983_v14, %v919_v40  ;;  %v988_v29 = vadd.f32 %v984_v27, %v920_v21  ;;  %v998_v46 = vadd.f32 %v994_v0, %v930_v25 }
 0x184   :  { %v1034_v4 = vpop.permute.xlu1 %1033  ;;  %1488 = vrot.lane.b32.xlu2 %v4726_v34, %s3181_s17  ;;  %v1008_v41 = vadd.f32 %v1004_v51, %v940_v50  ;;  %v1018_v39 = vadd.f32 %v1014_v35, %v950_v37  ;;  %v997_v43 = vadd.f32 %v993_v32, %v929_v47  ;;  %v1007_v5 = vadd.f32 %v1003_v49, %v939_v12 }
 0x185   :  { %v1042_v20 = vsel %vm34_vm0, %v3176_v56, %v1034_v4  ;;  %v1032_v17 = vpop.permute.xlu0 %1031  ;;  %v4818_v26 = vpop.permute.xlu2 %1153  ;;  %v1017_v11 = vadd.f32 %v1013_v55, %v949_v63 }
 0x186   :  { %v1048_v59 = vmul.f32 %v4640_v9, %v1042_v20  ;;  %v1058_v3 = vmul.f32 %v4645_v18, %v1042_v20  ;;  %v1068_v21 = vmul.f32 %v4656_v22, %v1042_v20  ;;  %v1078_v6 = vmul.f32 %v4661_v52, %v1042_v20 }
 0x187   :  { %v1041_v57 = vsel %vm34_vm0, %v3177_v31, %v1032_v17 }
 0x188   :  { %v4824_v1 = vadd.f32 %v1048_v59, %v988_v29  ;;  %v4826_v44 = vadd.f32 %v1058_v3, %v998_v46  ;;  %v4828_v19 = vadd.f32 %v1068_v21, %v1008_v41  ;;  %v4830_v53 = vadd.f32 %v1078_v6, %v1018_v39 }
 0x189   :  { %v1047_v45 = vmul.f32 %v4640_v9, %v1041_v57  ;;  %v1057_v58 = vmul.f32 %v4645_v18, %v1041_v57  ;;  %v1067_v36 = vmul.f32 %v4656_v22, %v1041_v57  ;;  %v1077_v14 = vmul.f32 %v4661_v52, %v1041_v57  ;;  %v4851_v9 = vld [vmem:[%s6681_s0 + $0x60] ss:$0 sm:$0xff]  ;;  %v4856_v18 = vld [vmem:[%s6681_s0 + $0x88] ss:$0 sm:$0xff] }
 0x18a   :  { %1496 = vrot.lane.b32.xlu1 %v4666_v23, %s3182_s22 }
 0x18b   :  { %v1051_v22 = vadd.f32 %v1047_v45, %v987_v33  ;;  %v1061_v52 = vadd.f32 %v1057_v58, %v997_v43  ;;  %v1071_v27 = vadd.f32 %v1067_v36, %v1007_v5  ;;  %v1081_v0 = vadd.f32 %v1077_v14, %v1017_v11  ;;  %1490 = vrot.lane.b32.xlu0 %v4740_v42, %s3181_s17 }
 0x18c   :  { %v1088_v51 = vpop.permute.xlu1 %1087  ;;  %1498 = vrot.lane.b32.xlu2 %v4731_v30, %s3182_s22 }
 0x18d   :  { %v1109_v35 = vsel %vm34_vm0, %v1088_v51, %v4771_v2  ;;  %v1086_v25 = vpop.permute.xlu0 %1085  ;;  %v1164_v32 = vpop.permute.xlu2 %1163 }
 0x18e   :  { %v1115_v50 = vmul.f32 %v4839_v60, %v1109_v35  ;;  %v1125_v37 = vmul.f32 %v4846_v24, %v1109_v35  ;;  %v1135_v40 = vmul.f32 %v4851_v9, %v1109_v35  ;;  %v1145_v47 = vmul.f32 %v4856_v18, %v1109_v35 }
 0x190   :  { %v4868_v49 = vadd.f32 %v1115_v50, %v1051_v22  ;;  %v4870_v55 = vadd.f32 %v1125_v37, %v1061_v52  ;;  %v4872_v12 = vadd.f32 %v1135_v40, %v1071_v27  ;;  %v4874_v63 = vadd.f32 %v1145_v47, %v1081_v0 }
 0x192   :  { %1502 = vrot.lane.b32.xlu1 %v4740_v42, %s3182_s22 }
 0x193   :  { %1500 = vrot.lane.b32.xlu0 %v4726_v34, %s3182_s22 }
 0x194   :  { %v1098_v2 = vpop.permute.xlu1 %1097  ;;  %1552 = vrot.lane.b32.xlu2 %v4666_v23, %s3183_s23 }
 0x195   :  { %v1108_v33 = vsel %vm34_vm0, %v1086_v25, %v1098_v2  ;;  %v1096_v29 = vpop.permute.xlu0 %1095  ;;  %v1170_v56 = vpop.permute.xlu2 %1169 }
 0x196   :  { %v1114_v4 = vmul.f32 %v4839_v60, %v1108_v33  ;;  %v1124_v46 = vmul.f32 %v4846_v24, %v1108_v33  ;;  %v1134_v41 = vmul.f32 %v4851_v9, %v1108_v33  ;;  %v1144_v39 = vmul.f32 %v4856_v18, %v1108_v33 }
 0x197   :  { %v1107_v20 = vsel %vm34_vm0, %v4626_v48, %v1096_v29 }
 0x198   :  { %v4890_v17 = vadd.f32 %v1114_v4, %v4742_v54  ;;  %v4893_v59 = vadd.f32 %v1124_v46, %v4744_v38  ;;  %v4896_v3 = vadd.f32 %v1134_v41, %v4746_v8  ;;  %v4899_v21 = vadd.f32 %v1144_v39, %v4748_v13  ;;  %v4908_v54 = vld [vmem:[%s6681_s0 + $0x11] ss:$0 sm:$0xff]  ;;  %v4915_v38 = vld [vmem:[%s6681_s0 + $0x39] ss:$0 sm:$0xff]  ;;  %v4920_v8 = vld [vmem:[%s6681_s0 + $0x61] ss:$0 sm:$0xff] }
 0x199   :  { %v1113_v6 = vmul.f32 %v4839_v60, %v1107_v20  ;;  %v1123_v43 = vmul.f32 %v4846_v24, %v1107_v20  ;;  %v1133_v5 = vmul.f32 %v4851_v9, %v1107_v20  ;;  %v1143_v48 = vmul.f32 %v4856_v18, %v1107_v20  ;;  %v4925_v13 = vld [vmem:[%s6681_s0 + $0x89] ss:$0 sm:$0xff]  ;;  %v4987_v39 = vld [vmem:[%s6681_s0 + $0x12] ss:$0 sm:$0xff] }
 0x19a   :  { %1556 = vrot.lane.b32.xlu1 %v4726_v34, %s3183_s23 }
 0x19b   :  { %v1117_v11 = vadd.f32 %v1113_v6, %v4779_v15  ;;  %v1127_v31 = vadd.f32 %v1123_v43, %v4781_v28  ;;  %v1137_v57 = vadd.f32 %v1133_v5, %v4783_v16  ;;  %v1147_v45 = vadd.f32 %v1143_v48, %v4785_v10  ;;  %1554 = vrot.lane.b32.xlu0 %v4731_v30, %s3183_s23  ;;  %v4999_v6 = vld [vmem:[%s6681_s0 + $0x62] ss:$0 sm:$0xff]  ;;  %v5004_v43 = vld [vmem:[%s6681_s0 + $0x8a] ss:$0 sm:$0xff]  ;;  %v5009_v5 = vld [vmem:[%s6680_s2 + $0x3a] sm:$0xff] }
 0x19c   :  { %v1152_v58 = vpop.permute.xlu1 %1151  ;;  %1558 = vrot.lane.b32.xlu2 %v4740_v42, %s3183_s23 }
 0x19d   :  { %v1175_v36 = vsel %vm34_vm0, %v1152_v58, %v1164_v32  ;;  %v1102_v14 = vpop.permute.xlu0 %1101  ;;  %v1233_v52 = vpop.permute.xlu2 %1232 }
 0x19e   :  { %v1181_v22 = vmul.f32 %v4908_v54, %v1175_v36  ;;  %v1191_v15 = vmul.f32 %v4915_v38, %v1175_v36  ;;  %v1201_v28 = vmul.f32 %v4920_v8, %v1175_v36  ;;  %v1211_v16 = vmul.f32 %v4925_v13, %v1175_v36 }
 0x19f   :  { %v1110_v10 = vsel %vm34_vm0, %v4714_v62, %v1102_v14  ;;  %v1242_v20 = vsel %vm34_vm0, %v4212_v61, %v1233_v52  ;;  %v5031_v52 = vld [vmem:[%s6680_s2 + $0x9a] sm:$0xff] }
 0x1a0   :  { %v4942_v27 = vadd.f32 %v1181_v22, %v1117_v11  ;;  %v4944_v0 = vadd.f32 %v1191_v15, %v1127_v31  ;;  %v4946_v51 = vadd.f32 %v1201_v28, %v1137_v57  ;;  %v4948_v35 = vadd.f32 %v1211_v16, %v1147_v45 }
 0x1a1   :  { %v1116_v25 = vmul.f32 %v4839_v60, %v1110_v10  ;;  %v1126_v50 = vmul.f32 %v4846_v24, %v1110_v10  ;;  %v1136_v37 = vmul.f32 %v4851_v9, %v1110_v10  ;;  %v1146_v40 = vmul.f32 %v4856_v18, %v1110_v10 }
 0x1a2   :  { %1566 = vrot.lane.b32.xlu1 %v4731_v30, %s3184_s24  ;;  %v1248_v48 = vmul.f32 %v4987_v39, %v1242_v20  ;;  %v1268_v57 = vmul.f32 %v4999_v6, %v1242_v20  ;;  %v1278_v45 = vmul.f32 %v5004_v43, %v1242_v20 }
 0x1a3   :  { %v1120_v62 = vadd.f32 %v1116_v25, %v4824_v1  ;;  %v1130_v47 = vadd.f32 %v1126_v50, %v4826_v44  ;;  %v1140_v32 = vadd.f32 %v1136_v37, %v4828_v19  ;;  %v1150_v2 = vadd.f32 %v1146_v40, %v4830_v53  ;;  %1564 = vrot.lane.b32.xlu0 %v4666_v23, %s3184_s24  ;;  %v4974_v53 = vld [vmem:[%s6680_s2 + $0x32] sm:$0xff] }
 0x1a4   :  { %v1158_v60 = vpop.permute.xlu1 %1157  ;;  %1568 = vrot.lane.b32.xlu2 %v4726_v34, %s3184_s24  ;;  %v5040_v40 = vld [vmem:[%s6680_s2 + $0x92] sm:$0xff] }
 0x1a5   :  { %v1178_v24 = vsel %vm34_vm0, %v1158_v60, %v1170_v56  ;;  %v1156_v9 = vpop.permute.xlu0 %1155  ;;  %v4969_v33 = vpop.permute.xlu2 %1286  ;;  %v4992_v56 = vld [vmem:[%s6681_s0 + $0x3a] ss:$0 sm:$0xff] }
 0x1a6   :  { %v1184_v18 = vmul.f32 %v4908_v54, %v1178_v24  ;;  %v1194_v1 = vmul.f32 %v4915_v38, %v1178_v24  ;;  %v1204_v44 = vmul.f32 %v4920_v8, %v1178_v24  ;;  %v1214_v19 = vmul.f32 %v4925_v13, %v1178_v24  ;;  %v3178_v60 = vld [vmem:[%s6680_s2 + $0x38] sm:$0xff] }
 0x1a7   :  { %v1258_v31 = vmul.f32 %v4992_v56, %v1242_v20 }
 0x1a8   :  { %v4976_v29 = vadd.f32 %v1184_v18, %v1120_v62  ;;  %v4978_v4 = vadd.f32 %v1194_v1, %v1130_v47  ;;  %v4980_v46 = vadd.f32 %v1204_v44, %v1140_v32  ;;  %v4982_v41 = vadd.f32 %v1214_v19, %v1150_v2  ;;  %v3179_v1 = vld [vmem:[%s6680_s2 + $0x30] sm:$0xff] }
 0x1aa   :  { %1628 = vrot.lane.b32.xlu1 %v4974_v53, %s3180_s16 }
 0x1ab   :  { %1570 = vrot.lane.b32.xlu0 %v4740_v42, %s3184_s24 }
 0x1ac   :  { %v1168_v61 = vpop.permute.xlu1 %1167  ;;  %1630 = vrot.lane.b32.xlu2 %v5009_v5, %s3180_s16 }
 0x1ad   :  { %v1177_v11 = vsel %vm34_vm0, %v1156_v9, %v1168_v61  ;;  %v1166_v58 = vpop.permute.xlu0 %1165  ;;  %v1297_v28 = vpop.permute.xlu2 %1296 }
 0x1ae   :  { %v1183_v36 = vmul.f32 %v4908_v54, %v1177_v11  ;;  %v1193_v14 = vmul.f32 %v4915_v38, %v1177_v11  ;;  %v1203_v22 = vmul.f32 %v4920_v8, %v1177_v11  ;;  %v1213_v15 = vmul.f32 %v4925_v13, %v1177_v11 }
 0x1af   :  { %v1176_v16 = vsel %vm34_vm0, %v4818_v26, %v1166_v58  ;;  %v5091_v58 = vld [vmem:[%s6681_s0 + $0x13] ss:$0 sm:$0xff] }
 0x1b0   :  { %v1187_v10 = vadd.f32 %v1183_v36, %v4868_v49  ;;  %v1197_v25 = vadd.f32 %v1193_v14, %v4870_v55  ;;  %v1207_v50 = vadd.f32 %v1203_v22, %v4872_v12  ;;  %v1217_v37 = vadd.f32 %v1213_v15, %v4874_v63  ;;  %v3034_v36 = vld [vmem:[%s6681_s0 + $0x3b] ss:$0 sm:$0xff]  ;;  %v3035_v14 = vld [vmem:[%s6681_s0 + $0x63] ss:$0 sm:$0xff]  ;;  %v3036_v22 = vld [vmem:[%s6681_s0 + $0x8b] ss:$0 sm:$0xff] }
 0x1b1   :  { %v1182_v26 = vmul.f32 %v4908_v54, %v1176_v16  ;;  %v1192_v62 = vmul.f32 %v4915_v38, %v1176_v16  ;;  %v1202_v47 = vmul.f32 %v4920_v8, %v1176_v16  ;;  %v1212_v32 = vmul.f32 %v4925_v13, %v1176_v16 }
 0x1b2   :  { %v5046_v49 = vadd.f32 %v1248_v48, %v1187_v10  ;;  %v5048_v55 = vadd.f32 %v1258_v31, %v1197_v25  ;;  %v5050_v12 = vadd.f32 %v1268_v57, %v1207_v50  ;;  %v5052_v63 = vadd.f32 %v1278_v45, %v1217_v37  ;;  %1634 = vrot.lane.b32.xlu1 %v5031_v52, %s3180_s16 }
 0x1b3   :  { %v1186_v2 = vadd.f32 %v1182_v26, %v4890_v17  ;;  %v1196_v54 = vadd.f32 %v1192_v62, %v4893_v59  ;;  %v1206_v38 = vadd.f32 %v1202_v47, %v4896_v3  ;;  %v1216_v8 = vadd.f32 %v1212_v32, %v4899_v21  ;;  %1632 = vrot.lane.b32.xlu0 %v5040_v40, %s3180_s16 }
 0x1b4   :  { %v1231_v13 = vpop.permute.xlu1 %1230  ;;  %1684 = vrot.lane.b32.xlu2 %v4974_v53, %s3181_s17 }
 0x1b5   :  { %v1241_v24 = vsel %vm34_vm0, %v3178_v60, %v1231_v13  ;;  %v1229_v17 = vpop.permute.xlu0 %1228  ;;  %v1303_v18 = vpop.permute.xlu2 %1302 }
 0x1b6   :  { %v1247_v59 = vmul.f32 %v4987_v39, %v1241_v24  ;;  %v1257_v3 = vmul.f32 %v4992_v56, %v1241_v24  ;;  %v1267_v21 = vmul.f32 %v4999_v6, %v1241_v24  ;;  %v1277_v9 = vmul.f32 %v5004_v43, %v1241_v24 }
 0x1b7   :  { %v1240_v44 = vsel %vm34_vm0, %v3179_v1, %v1229_v17 }
 0x1b8   :  { %v5076_v19 = vadd.f32 %v1247_v59, %v1186_v2  ;;  %v5078_v20 = vadd.f32 %v1257_v3, %v1196_v54  ;;  %v5080_v61 = vadd.f32 %v1267_v21, %v1206_v38  ;;  %v5082_v48 = vadd.f32 %v1277_v9, %v1216_v8 }
 0x1b9   :  { %v1246_v11 = vmul.f32 %v4987_v39, %v1240_v44  ;;  %v1256_v31 = vmul.f32 %v4992_v56, %v1240_v44  ;;  %v1266_v57 = vmul.f32 %v4999_v6, %v1240_v44  ;;  %v1276_v45 = vmul.f32 %v5004_v43, %v1240_v44 }
 0x1ba   :  { %1688 = vrot.lane.b32.xlu1 %v5040_v40, %s3181_s17 }
 0x1bb   :  { %v1250_v15 = vadd.f32 %v1246_v11, %v4942_v27  ;;  %v1260_v16 = vadd.f32 %v1256_v31, %v4944_v0  ;;  %v1270_v10 = vadd.f32 %v1266_v57, %v4946_v51  ;;  %v1280_v25 = vadd.f32 %v1276_v45, %v4948_v35  ;;  %1686 = vrot.lane.b32.xlu0 %v5009_v5, %s3181_s17 }
 0x1bc   :  { %v1285_v50 = vpop.permute.xlu1 %1284  ;;  %1690 = vrot.lane.b32.xlu2 %v5031_v52, %s3181_s17 }
 0x1bd   :  { %v1308_v37 = vsel %vm34_vm0, %v1285_v50, %v1297_v28  ;;  %v1235_v26 = vpop.permute.xlu0 %1234  ;;  %v5114_v0 = vpop.permute.xlu2 %1356 }
 0x1be   :  { %v1314_v62 = vmul.f32 %v5091_v58, %v1308_v37  ;;  %v1324_v47 = vmul.f32 %v3034_v36, %v1308_v37  ;;  %v1334_v27 = vmul.f32 %v3035_v14, %v1308_v37  ;;  %v1344_v32 = vmul.f32 %v3036_v22, %v1308_v37 }
 0x1bf   :  { %v1243_v51 = vsel %vm34_vm0, %v4288_v7, %v1235_v26 }
 0x1c0   :  { %v5118_v35 = vadd.f32 %v1314_v62, %v1250_v15  ;;  %v5120_v2 = vadd.f32 %v1324_v47, %v1260_v16  ;;  %v5122_v54 = vadd.f32 %v1334_v27, %v1270_v10  ;;  %v5124_v38 = vadd.f32 %v1344_v32, %v1280_v25 }
 0x1c1   :  { %v1249_v28 = vmul.f32 %v4987_v39, %v1243_v51  ;;  %v1259_v8 = vmul.f32 %v4992_v56, %v1243_v51  ;;  %v1269_v13 = vmul.f32 %v4999_v6, %v1243_v51  ;;  %v1279_v60 = vmul.f32 %v5004_v43, %v1243_v51 }
 0x1c2   :  { %1698 = vrot.lane.b32.xlu1 %v5009_v5, %s3182_s22 }
 0x1c3   :  { %v1253_v7 = vadd.f32 %v1249_v28, %v4976_v29  ;;  %v1263_v24 = vadd.f32 %v1259_v8, %v4978_v4  ;;  %v1273_v17 = vadd.f32 %v1269_v13, %v4980_v46  ;;  %v1283_v59 = vadd.f32 %v1279_v60, %v4982_v41  ;;  %1696 = vrot.lane.b32.xlu0 %v4974_v53, %s3182_s22 }
 0x1c4   :  { %v1291_v39 = vpop.permute.xlu1 %1290  ;;  %1700 = vrot.lane.b32.xlu2 %v5040_v40, %s3182_s22 }
 0x1c5   :  { %v1311_v56 = vsel %vm34_vm0, %v1291_v39, %v1303_v18  ;;  %v1289_v6 = vpop.permute.xlu0 %1288  ;;  %v1367_v4 = vpop.permute.xlu2 %1366  ;;  %v5226_v39 = vld [vmem:[%s6681_s0 + $0x3d] ss:$0 sm:$0xff] }
 0x1c6   :  { %v1317_v43 = vmul.f32 %v5091_v58, %v1311_v56  ;;  %v1327_v3 = vmul.f32 %v3034_v36, %v1311_v56  ;;  %v1337_v29 = vmul.f32 %v3035_v14, %v1311_v56  ;;  %v1347_v21 = vmul.f32 %v3036_v22, %v1311_v56  ;;  %v5231_v56 = vld [vmem:[%s6681_s0 + $0x65] ss:$0 sm:$0xff] }
 0x1c8   :  { %v5142_v9 = vadd.f32 %v1317_v43, %v1253_v7  ;;  %v5144_v46 = vadd.f32 %v1327_v3, %v1263_v24  ;;  %v5146_v41 = vadd.f32 %v1337_v29, %v1273_v17  ;;  %v5148_v1 = vadd.f32 %v1347_v21, %v1283_v59  ;;  %v5219_v17 = vld [vmem:[%s6681_s0 + $0x15] ss:$0 sm:$0xff] }
 0x1ca   :  { %1752 = vrot.lane.b32.xlu1 %v4974_v53, %s3183_s23 }
 0x1cb   :  { %1702 = vrot.lane.b32.xlu0 %v5031_v52, %s3182_s22 }
 0x1cc   :  { %v1301_v18 = vpop.permute.xlu1 %1300  ;;  %1754 = vrot.lane.b32.xlu2 %v5009_v5, %s3183_s23 }
 0x1cd   :  { %v1310_v44 = vsel %vm34_vm0, %v1289_v6, %v1301_v18  ;;  %v1299_v11 = vpop.permute.xlu0 %1298  ;;  %v1429_v16 = vpop.permute.xlu2 %1428  ;;  %v5236_v6 = vld [vmem:[%s6681_s0 + $0x8d] ss:$0 sm:$0xff] }
 0x1ce   :  { %v1316_v31 = vmul.f32 %v5091_v58, %v1310_v44  ;;  %v1326_v57 = vmul.f32 %v3034_v36, %v1310_v44  ;;  %v1336_v45 = vmul.f32 %v3035_v14, %v1310_v44  ;;  %v1346_v15 = vmul.f32 %v3036_v22, %v1310_v44 }
 0x1cf   :  { %v1309_v10 = vsel %vm34_vm0, %v4969_v33, %v1299_v11  ;;  %v5176_v33 = vld [vmem:[%s6681_s0 + $0x14] ss:$0 sm:$0xff]  ;;  %v1440_v59 = vsel %vm34_vm0, %v4666_v23, %v1429_v16 }
 0x1d0   :  { %v5161_v25 = vadd.f32 %v1316_v31, %v5046_v49  ;;  %v5164_v50 = vadd.f32 %v1326_v57, %v5048_v55  ;;  %v5167_v37 = vadd.f32 %v1336_v45, %v5050_v12  ;;  %v5170_v26 = vadd.f32 %v1346_v15, %v5052_v63  ;;  %v5183_v49 = vld [vmem:[%s6681_s0 + $0x3c] ss:$0 sm:$0xff]  ;;  %v5188_v55 = vld [vmem:[%s6681_s0 + $0x64] ss:$0 sm:$0xff]  ;;  %v5193_v12 = vld [vmem:[%s6681_s0 + $0x8c] ss:$0 sm:$0xff] }
 0x1d1   :  { %v1315_v62 = vmul.f32 %v5091_v58, %v1309_v10  ;;  %v1325_v47 = vmul.f32 %v3034_v36, %v1309_v10  ;;  %v1335_v27 = vmul.f32 %v3035_v14, %v1309_v10  ;;  %v1345_v32 = vmul.f32 %v3036_v22, %v1309_v10  ;;  %v5258_v15 = vld [vmem:[%s6680_s2 + $0x50] sm:$0xff] }
 0x1d2   :  { %1758 = vrot.lane.b32.xlu1 %v5031_v52, %s3183_s23  ;;  %v1446_v43 = vmul.f32 %v5219_v17, %v1440_v59  ;;  %v1456_v29 = vmul.f32 %v5226_v39, %v1440_v59  ;;  %v1466_v21 = vmul.f32 %v5231_v56, %v1440_v59 }
 0x1d3   :  { %v1319_v63 = vadd.f32 %v1315_v62, %v5076_v19  ;;  %v1329_v58 = vadd.f32 %v1325_v47, %v5078_v20  ;;  %v1339_v36 = vadd.f32 %v1335_v27, %v5080_v61  ;;  %v1349_v14 = vadd.f32 %v1345_v32, %v5082_v48  ;;  %1756 = vrot.lane.b32.xlu0 %v5040_v40, %s3183_s23  ;;  %v5267_v27 = vld [vmem:[%s6680_s2 + $0x48] sm:$0xff] }
 0x1d4   :  { %v1355_v22 = vpop.permute.xlu1 %1354  ;;  %1764 = vrot.lane.b32.xlu2 %v4974_v53, %s3184_s24 }
 0x1d5   :  { %v1377_v51 = vsel %vm34_vm0, %v1355_v22, %v1367_v4  ;;  %v1353_v28 = vpop.permute.xlu0 %1352  ;;  %v1476_v4 = vmul.f32 %v5236_v6, %v1440_v59 }
 0x1d6   :  { %v1383_v8 = vmul.f32 %v5176_v33, %v1377_v51  ;;  %v1393_v19 = vmul.f32 %v5183_v49, %v1377_v51  ;;  %v1403_v20 = vmul.f32 %v5188_v55, %v1377_v51  ;;  %v1413_v61 = vmul.f32 %v5193_v12, %v1377_v51  ;;  %v1435_v13 = vpop.permute.xlu2 %1434 }
 0x1d7   :  { %v1443_v32 = vsel %vm34_vm0, %v4740_v42, %v1435_v13 }
 0x1d8   :  { %v5208_v48 = vadd.f32 %v1383_v8, %v1319_v63  ;;  %v5210_v60 = vadd.f32 %v1393_v19, %v1329_v58  ;;  %v5212_v7 = vadd.f32 %v1403_v20, %v1339_v36  ;;  %v5214_v24 = vadd.f32 %v1413_v61, %v1349_v14  ;;  %v5274_v63 = vld [vmem:[%s6680_s2 + $0xa8] sm:$0xff] }
 0x1d9   :  { %v1449_v58 = vmul.f32 %v5219_v17, %v1443_v32  ;;  %v1459_v14 = vmul.f32 %v5226_v39, %v1443_v32  ;;  %v1469_v22 = vmul.f32 %v5231_v56, %v1443_v32  ;;  %v1479_v51 = vmul.f32 %v5236_v6, %v1443_v32 }
 0x1da   :  { %1768 = vrot.lane.b32.xlu1 %v5040_v40, %s3184_s24 }
 0x1db   :  { %1766 = vrot.lane.b32.xlu0 %v5009_v5, %s3184_s24 }
 0x1dc   :  { %v1365_v23 = vpop.permute.xlu1 %1364  ;;  %1770 = vrot.lane.b32.xlu2 %v5031_v52, %s3184_s24 }
 0x1dd   :  { %v1376_v3 = vsel %vm34_vm0, %v1353_v28, %v1365_v23  ;;  %v1359_v18 = vpop.permute.xlu0 %1358 }
 0x1de   :  { %v1382_v44 = vmul.f32 %v5176_v33, %v1376_v3  ;;  %v1392_v11 = vmul.f32 %v5183_v49, %v1376_v3  ;;  %v1402_v31 = vmul.f32 %v5188_v55, %v1376_v3  ;;  %v1412_v57 = vmul.f32 %v5193_v12, %v1376_v3  ;;  %v5253_v45 = vpop.permute.xlu2 %1488 }
 0x1e0   :  { %v1386_v16 = vadd.f32 %v1382_v44, %v5118_v35  ;;  %v1396_v10 = vadd.f32 %v1392_v11, %v5120_v2  ;;  %v1406_v62 = vadd.f32 %v1402_v31, %v5122_v54  ;;  %v1416_v47 = vadd.f32 %v1412_v57, %v5124_v38 }
 0x1e2   :  { %v5276_v35 = vadd.f32 %v1446_v43, %v1386_v16  ;;  %v5278_v2 = vadd.f32 %v1456_v29, %v1396_v10  ;;  %v5280_v54 = vadd.f32 %v1466_v21, %v1406_v62  ;;  %v5282_v38 = vadd.f32 %v1476_v4, %v1416_v47  ;;  %1831 = vrot.lane.b32.xlu1 %v5258_v15, %s3180_s16  ;;  %v5308_v21 = vld [vmem:[%s6680_s2 + $0xb0] sm:$0xff] }
 0x1e3   :  { %1829 = vrot.lane.b32.xlu0 %v5267_v27, %s3180_s16 }
 0x1e4   :  { %v1371_v42 = vpop.permute.xlu1 %1370  ;;  %1833 = vrot.lane.b32.xlu2 %v5274_v63, %s3180_s16 }
 0x1e5   :  { %v1379_v36 = vsel %vm34_vm0, %v1359_v18, %v1371_v42  ;;  %v1369_v28 = vpop.permute.xlu0 %1368 }
 0x1e6   :  { %v1385_v8 = vmul.f32 %v5176_v33, %v1379_v36  ;;  %v1395_v19 = vmul.f32 %v5183_v49, %v1379_v36  ;;  %v1405_v20 = vmul.f32 %v5188_v55, %v1379_v36  ;;  %v1415_v61 = vmul.f32 %v5193_v12, %v1379_v36  ;;  %v1499_v13 = vpop.permute.xlu2 %1498 }
 0x1e7   :  { %v1378_v59 = vsel %vm34_vm0, %v5114_v0, %v1369_v28 }
 0x1e8   :  { %v1389_v23 = vadd.f32 %v1385_v8, %v5142_v9  ;;  %v1399_v43 = vadd.f32 %v1395_v19, %v5144_v46  ;;  %v1409_v3 = vadd.f32 %v1405_v20, %v5146_v41  ;;  %v1419_v29 = vadd.f32 %v1415_v61, %v5148_v1 }
 0x1e9   :  { %v1384_v4 = vmul.f32 %v5176_v33, %v1378_v59  ;;  %v1394_v18 = vmul.f32 %v5183_v49, %v1378_v59  ;;  %v1404_v44 = vmul.f32 %v5188_v55, %v1378_v59  ;;  %v1414_v0 = vmul.f32 %v5193_v12, %v1378_v59 }
 0x1ea   :  { %v5314_v9 = vadd.f32 %v1449_v58, %v1389_v23  ;;  %v5316_v46 = vadd.f32 %v1459_v14, %v1399_v43  ;;  %v5318_v41 = vadd.f32 %v1469_v22, %v1409_v3  ;;  %v5320_v1 = vadd.f32 %v1479_v51, %v1419_v29  ;;  %1885 = vrot.lane.b32.xlu1 %v5267_v27, %s3181_s17  ;;  %v3046_v22 = vld [vmem:[%s6681_s0 + $0x3e] ss:$0 sm:$0xff] }
 0x1eb   :  { %v1388_v11 = vadd.f32 %v1384_v4, %v5161_v25  ;;  %v1398_v33 = vadd.f32 %v1394_v18, %v5164_v50  ;;  %v1408_v49 = vadd.f32 %v1404_v44, %v5167_v37  ;;  %v1418_v55 = vadd.f32 %v1414_v0, %v5170_v26  ;;  %1835 = vrot.lane.b32.xlu0 %v5308_v21, %s3180_s16 }
 0x1ec   :  { %v1433_v12 = vpop.permute.xlu1 %1432  ;;  %1887 = vrot.lane.b32.xlu2 %v5258_v15, %s3181_s17 }
 0x1ed   :  { %v1442_v31 = vsel %vm34_vm0, %v4726_v34, %v1433_v12  ;;  %v1431_v57 = vpop.permute.xlu0 %1430 }
 0x1ee   :  { %v1448_v16 = vmul.f32 %v5219_v17, %v1442_v31  ;;  %v1458_v25 = vmul.f32 %v5226_v39, %v1442_v31  ;;  %v1468_v50 = vmul.f32 %v5231_v56, %v1442_v31  ;;  %v1478_v37 = vmul.f32 %v5236_v6, %v1442_v31  ;;  %v5338_v26 = vpop.permute.xlu2 %1552 }
 0x1ef   :  { %v1441_v10 = vsel %vm34_vm0, %v4731_v30, %v1431_v57  ;;  %v3045_v30 = vld [vmem:[%s6681_s0 + $0x16] ss:$0 sm:$0xff] }
 0x1f0   :  { %v5342_v62 = vadd.f32 %v1448_v16, %v1388_v11  ;;  %v5344_v47 = vadd.f32 %v1458_v25, %v1398_v33  ;;  %v5346_v32 = vadd.f32 %v1468_v50, %v1408_v49  ;;  %v5348_v34 = vadd.f32 %v1478_v37, %v1418_v55 }
 0x1f1   :  { %v1447_v42 = vmul.f32 %v5219_v17, %v1441_v10  ;;  %v1457_v58 = vmul.f32 %v5226_v39, %v1441_v10  ;;  %v1467_v36 = vmul.f32 %v5231_v56, %v1441_v10  ;;  %v1477_v14 = vmul.f32 %v5236_v6, %v1441_v10  ;;  %v3047_v17 = vld [vmem:[%s6681_s0 + $0x66] ss:$0 sm:$0xff]  ;;  %v3048_v39 = vld [vmem:[%s6681_s0 + $0x8e] ss:$0 sm:$0xff] }
 0x1f2   :  { %1891 = vrot.lane.b32.xlu1 %v5308_v21, %s3181_s17 }
 0x1f3   :  { %v1451_v56 = vadd.f32 %v1447_v42, %v5208_v48  ;;  %v1461_v6 = vadd.f32 %v1457_v58, %v5210_v60  ;;  %v1471_v51 = vadd.f32 %v1467_v36, %v5212_v7  ;;  %v1481_v28 = vadd.f32 %v1477_v14, %v5214_v24  ;;  %1889 = vrot.lane.b32.xlu0 %v5274_v63, %s3181_s17 }
 0x1f4   :  { %v1487_v8 = vpop.permute.xlu1 %1486  ;;  %1897 = vrot.lane.b32.xlu2 %v5267_v27, %s3182_s22 }
 0x1f5   :  { %v1509_v19 = vsel %vm34_vm0, %v1487_v8, %v1499_v13  ;;  %v1485_v20 = vpop.permute.xlu0 %1484 }
 0x1f6   :  { %v1515_v61 = vmul.f32 %v3045_v30, %v1509_v19  ;;  %v1525_v59 = vmul.f32 %v3046_v22, %v1509_v19  ;;  %v1535_v23 = vmul.f32 %v3047_v17, %v1509_v19  ;;  %v1545_v48 = vmul.f32 %v3048_v39, %v1509_v19  ;;  %v5377_v43 = vpop.permute.xlu2 %1558 }
 0x1f8   :  { %v5379_v60 = vadd.f32 %v1515_v61, %v1451_v56  ;;  %v5381_v7 = vadd.f32 %v1525_v59, %v1461_v6  ;;  %v5383_v24 = vadd.f32 %v1535_v23, %v1471_v51  ;;  %v5385_v3 = vadd.f32 %v1545_v48, %v1481_v28  ;;  %v5475_v48 = vld [vmem:[%s6681_s0 + $0x18] ss:$0 sm:$0xff] }
 0x1fa   :  { %1901 = vrot.lane.b32.xlu1 %v5274_v63, %s3182_s22 }
 0x1fb   :  { %1899 = vrot.lane.b32.xlu0 %v5258_v15, %s3182_s22 }
 0x1fc   :  { %v1497_v13 = vpop.permute.xlu1 %1496  ;;  %1903 = vrot.lane.b32.xlu2 %v5308_v21, %s3182_s22 }
 0x1fd   :  { %v1508_v29 = vsel %vm34_vm0, %v1485_v20, %v1497_v13  ;;  %v1491_v4 = vpop.permute.xlu0 %1490  ;;  %v5480_v13 = vld [vmem:[%s6681_s0 + $0x40] ss:$0 sm:$0xff] }
 0x1fe   :  { %v1514_v18 = vmul.f32 %v3045_v30, %v1508_v29  ;;  %v1524_v44 = vmul.f32 %v3046_v22, %v1508_v29  ;;  %v1534_v0 = vmul.f32 %v3047_v17, %v1508_v29  ;;  %v1544_v11 = vmul.f32 %v3048_v39, %v1508_v29  ;;  %v1569_v33 = vpop.permute.xlu2 %1568 }
 0x200   :  { %v5395_v49 = vadd.f32 %v1514_v18, %v5276_v35  ;;  %v5398_v55 = vadd.f32 %v1524_v44, %v5278_v2  ;;  %v5401_v12 = vadd.f32 %v1534_v0, %v5280_v54  ;;  %v5404_v31 = vadd.f32 %v1544_v11, %v5282_v38  ;;  %v5492_v18 = vld [vmem:[%s6681_s0 + $0x90] ss:$0 sm:$0xff] }
 0x201   :  { %v5497_v44 = vld [vmem:[%s6680_s2 + $0x49] sm:$0xff] }
 0x202   :  { %1955 = vrot.lane.b32.xlu1 %v5258_v15, %s3183_s23 }
 0x203   :  { %1953 = vrot.lane.b32.xlu0 %v5267_v27, %s3183_s23 }
 0x204   :  { %v1503_v57 = vpop.permute.xlu1 %1502  ;;  %1957 = vrot.lane.b32.xlu2 %v5274_v63, %s3183_s23 }
 0x205   :  { %v1511_v35 = vsel %vm34_vm0, %v1491_v4, %v1503_v57  ;;  %v1501_v2 = vpop.permute.xlu0 %1500  ;;  %v5487_v4 = vld [vmem:[%s6681_s0 + $0x68] ss:$0 sm:$0xff] }
 0x206   :  { %v1517_v16 = vmul.f32 %v3045_v30, %v1511_v35  ;;  %v1527_v25 = vmul.f32 %v3046_v22, %v1511_v35  ;;  %v1537_v54 = vmul.f32 %v3047_v17, %v1511_v35  ;;  %v1547_v50 = vmul.f32 %v3048_v39, %v1511_v35  ;;  %v1631_v37 = vpop.permute.xlu2 %1630 }
 0x207   :  { %v1510_v38 = vsel %vm34_vm0, %v5253_v45, %v1501_v2  ;;  %v5430_v45 = vld [vmem:[%s6681_s0 + $0x17] ss:$0 sm:$0xff]  ;;  %v1641_v29 = vsel %vm34_vm0, %v5009_v5, %v1631_v37 }
 0x208   :  { %v5416_v10 = vadd.f32 %v1517_v16, %v5314_v9  ;;  %v5419_v42 = vadd.f32 %v1527_v25, %v5316_v46  ;;  %v5422_v58 = vadd.f32 %v1537_v54, %v5318_v41  ;;  %v5425_v36 = vadd.f32 %v1547_v50, %v5320_v1  ;;  %v5437_v9 = vld [vmem:[%s6681_s0 + $0x3f] ss:$0 sm:$0xff]  ;;  %v5442_v46 = vld [vmem:[%s6681_s0 + $0x67] ss:$0 sm:$0xff]  ;;  %v5447_v41 = vld [vmem:[%s6681_s0 + $0x8f] ss:$0 sm:$0xff] }
 0x209   :  { %v1516_v14 = vmul.f32 %v3045_v30, %v1510_v38  ;;  %v1526_v56 = vmul.f32 %v3046_v22, %v1510_v38  ;;  %v1536_v6 = vmul.f32 %v3047_v17, %v1510_v38  ;;  %v1546_v51 = vmul.f32 %v3048_v39, %v1510_v38 }
 0x20a   :  { %1965 = vrot.lane.b32.xlu1 %v5267_v27, %s3184_s24  ;;  %v1647_v0 = vmul.f32 %v5475_v48, %v1641_v29  ;;  %v1667_v57 = vmul.f32 %v5487_v4, %v1641_v29  ;;  %v1677_v35 = vmul.f32 %v5492_v18, %v1641_v29 }
 0x20b   :  { %v1520_v1 = vadd.f32 %v1516_v14, %v5342_v62  ;;  %v1530_v30 = vadd.f32 %v1526_v56, %v5344_v47  ;;  %v1540_v22 = vadd.f32 %v1536_v6, %v5346_v32  ;;  %v1550_v17 = vadd.f32 %v1546_v51, %v5348_v34  ;;  %1959 = vrot.lane.b32.xlu0 %v5308_v21, %s3183_s23  ;;  %v5521_v14 = vld [vmem:[%s6680_s2 + $0xa9] sm:$0xff] }
 0x20c   :  { %v1557_v39 = vpop.permute.xlu1 %1556  ;;  %1967 = vrot.lane.b32.xlu2 %v5258_v15, %s3184_s24 }
 0x20d   :  { %v1578_v28 = vsel %vm34_vm0, %v1557_v39, %v1569_v33  ;;  %v1555_v8 = vpop.permute.xlu0 %1554  ;;  %v1657_v33 = vmul.f32 %v5480_v13, %v1641_v29 }
 0x20e   :  { %v1584_v19 = vmul.f32 %v5430_v45, %v1578_v28  ;;  %v1594_v62 = vmul.f32 %v5437_v9, %v1578_v28  ;;  %v1604_v47 = vmul.f32 %v5442_v46, %v1578_v28  ;;  %v1614_v32 = vmul.f32 %v5447_v41, %v1578_v28  ;;  %v5462_v20 = vpop.permute.xlu2 %1684 }
 0x210   :  { %v5464_v34 = vadd.f32 %v1584_v19, %v1520_v1  ;;  %v5466_v61 = vadd.f32 %v1594_v62, %v1530_v30  ;;  %v5468_v59 = vadd.f32 %v1604_v47, %v1540_v22  ;;  %v5470_v23 = vadd.f32 %v1614_v32, %v1550_v17  ;;  %v5530_v30 = vld [vmem:[%s6680_s2 + $0x51] sm:$0xff] }
 0x212   :  { %1971 = vrot.lane.b32.xlu1 %v5308_v21, %s3184_s24 }
 0x213   :  { %1969 = vrot.lane.b32.xlu0 %v5274_v63, %s3184_s24 }
 0x214   :  { %v1567_v5 = vpop.permute.xlu1 %1566  ;;  %2029 = vrot.lane.b32.xlu2 %v5497_v44, %s3180_s16 }
 0x215   :  { %v1577_v11 = vsel %vm34_vm0, %v1555_v8, %v1567_v5  ;;  %v1565_v2 = vpop.permute.xlu0 %1564 }
 0x216   :  { %v1583_v16 = vmul.f32 %v5430_v45, %v1577_v11  ;;  %v1593_v25 = vmul.f32 %v5437_v9, %v1577_v11  ;;  %v1603_v54 = vmul.f32 %v5442_v46, %v1577_v11  ;;  %v1613_v50 = vmul.f32 %v5447_v41, %v1577_v11  ;;  %v5514_v37 = vpop.permute.xlu2 %1690 }
 0x217   :  { %v1576_v38 = vsel %vm34_vm0, %v5338_v26, %v1565_v2 }
 0x218   :  { %v1587_v56 = vadd.f32 %v1583_v16, %v5379_v60  ;;  %v1597_v6 = vadd.f32 %v1593_v25, %v5381_v7  ;;  %v1607_v51 = vadd.f32 %v1603_v54, %v5383_v24  ;;  %v1617_v1 = vadd.f32 %v1613_v50, %v5385_v3  ;;  %v5539_v60 = vld [vmem:[%s6680_s2 + $0xb1] sm:$0xff] }
 0x219   :  { %v1582_v26 = vmul.f32 %v5430_v45, %v1576_v38  ;;  %v1592_v22 = vmul.f32 %v5437_v9, %v1576_v38  ;;  %v1602_v17 = vmul.f32 %v5442_v46, %v1576_v38  ;;  %v1612_v39 = vmul.f32 %v5447_v41, %v1576_v38 }
 0x21a   :  { %v5541_v7 = vadd.f32 %v1647_v0, %v1587_v56  ;;  %v5543_v24 = vadd.f32 %v1657_v33, %v1597_v6  ;;  %v5545_v3 = vadd.f32 %v1667_v57, %v1607_v51  ;;  %v5547_v28 = vadd.f32 %v1677_v35, %v1617_v1  ;;  %2033 = vrot.lane.b32.xlu1 %v5521_v14, %s3180_s16 }
 0x21b   :  { %v1586_v8 = vadd.f32 %v1582_v26, %v5395_v49  ;;  %v1596_v19 = vadd.f32 %v1592_v22, %v5398_v55  ;;  %v1606_v62 = vadd.f32 %v1602_v17, %v5401_v12  ;;  %v1616_v47 = vadd.f32 %v1612_v39, %v5404_v31  ;;  %2031 = vrot.lane.b32.xlu0 %v5530_v30, %s3180_s16 }
 0x21c   :  { %v1629_v32 = vpop.permute.xlu1 %1628  ;;  %2035 = vrot.lane.b32.xlu2 %v5539_v60, %s3180_s16 }
 0x21d   :  { %v1640_v29 = vsel %vm34_vm0, %v4974_v53, %v1629_v32  ;;  %v1571_v5 = vpop.permute.xlu0 %1570 }
 0x21e   :  { %v1646_v0 = vmul.f32 %v5475_v48, %v1640_v29  ;;  %v1656_v49 = vmul.f32 %v5480_v13, %v1640_v29  ;;  %v1666_v55 = vmul.f32 %v5487_v4, %v1640_v29  ;;  %v1676_v12 = vmul.f32 %v5492_v18, %v1640_v29  ;;  %v1701_v31 = vpop.permute.xlu2 %1700 }
 0x21f   :  { %v1579_v11 = vsel %vm34_vm0, %v5377_v43, %v1571_v5 }
 0x220   :  { %v5567_v33 = vadd.f32 %v1646_v0, %v1586_v8  ;;  %v5569_v57 = vadd.f32 %v1656_v49, %v1596_v19  ;;  %v5571_v35 = vadd.f32 %v1666_v55, %v1606_v62  ;;  %v5573_v53 = vadd.f32 %v1676_v12, %v1616_v47  ;;  %v5621_v19 = vld [vmem:[%s6681_s0 + $0x41] ss:$0 sm:$0xff] }
 0x221   :  { %v1585_v2 = vmul.f32 %v5430_v45, %v1579_v11  ;;  %v1595_v16 = vmul.f32 %v5437_v9, %v1579_v11  ;;  %v1605_v25 = vmul.f32 %v5442_v46, %v1579_v11  ;;  %v1615_v54 = vmul.f32 %v5447_v41, %v1579_v11 }
 0x222   :  { %2087 = vrot.lane.b32.xlu1 %v5530_v30, %s3181_s17 }
 0x223   :  { %v1589_v43 = vadd.f32 %v1585_v2, %v5416_v10  ;;  %v1599_v50 = vadd.f32 %v1595_v16, %v5419_v42  ;;  %v1609_v38 = vadd.f32 %v1605_v25, %v5422_v58  ;;  %v1619_v56 = vadd.f32 %v1615_v54, %v5425_v36  ;;  %2085 = vrot.lane.b32.xlu0 %v5497_v44, %s3181_s17 }
 0x224   :  { %v1635_v45 = vpop.permute.xlu1 %1634  ;;  %2089 = vrot.lane.b32.xlu2 %v5521_v14, %s3181_s17 }
 0x225   :  { %v1643_v9 = vsel %vm34_vm0, %v5031_v52, %v1635_v45  ;;  %v1633_v46 = vpop.permute.xlu0 %1632 }
 0x226   :  { %v1649_v41 = vmul.f32 %v5475_v48, %v1643_v9  ;;  %v1659_v10 = vmul.f32 %v5480_v13, %v1643_v9  ;;  %v1669_v42 = vmul.f32 %v5487_v4, %v1643_v9  ;;  %v1679_v58 = vmul.f32 %v5492_v18, %v1643_v9  ;;  %v5595_v36 = vpop.permute.xlu2 %1754 }
 0x227   :  { %v1642_v6 = vsel %vm34_vm0, %v5040_v40, %v1633_v46  ;;  %v5614_v40 = vld [vmem:[%s6681_s0 + $0x19] ss:$0 sm:$0xff] }
 0x228   :  { %v5599_v51 = vadd.f32 %v1649_v41, %v1589_v43  ;;  %v5601_v1 = vadd.f32 %v1659_v10, %v1599_v50  ;;  %v5603_v26 = vadd.f32 %v1669_v42, %v1609_v38  ;;  %v5605_v52 = vadd.f32 %v1679_v58, %v1619_v56 }
 0x229   :  { %v1648_v22 = vmul.f32 %v5475_v48, %v1642_v6  ;;  %v1658_v17 = vmul.f32 %v5480_v13, %v1642_v6  ;;  %v1668_v39 = vmul.f32 %v5487_v4, %v1642_v6  ;;  %v1678_v8 = vmul.f32 %v5492_v18, %v1642_v6  ;;  %v5626_v48 = vld [vmem:[%s6681_s0 + $0x69] ss:$0 sm:$0xff]  ;;  %v5631_v13 = vld [vmem:[%s6681_s0 + $0x91] ss:$0 sm:$0xff] }
 0x22a   :  { %2097 = vrot.lane.b32.xlu1 %v5497_v44, %s3182_s22 }
 0x22b   :  { %v1652_v4 = vadd.f32 %v1648_v22, %v5464_v34  ;;  %v1662_v18 = vadd.f32 %v1658_v17, %v5466_v61  ;;  %v1672_v62 = vadd.f32 %v1668_v39, %v5468_v59  ;;  %v1682_v47 = vadd.f32 %v1678_v8, %v5470_v23  ;;  %2091 = vrot.lane.b32.xlu0 %v5539_v60, %s3181_s17 }
 0x22c   :  { %v1689_v32 = vpop.permute.xlu1 %1688  ;;  %2099 = vrot.lane.b32.xlu2 %v5530_v30, %s3182_s22 }
 0x22d   :  { %v1710_v29 = vsel %vm34_vm0, %v1689_v32, %v1701_v31  ;;  %v1687_v5 = vpop.permute.xlu0 %1686 }
 0x22e   :  { %v1716_v0 = vmul.f32 %v5614_v40, %v1710_v29  ;;  %v1726_v34 = vmul.f32 %v5621_v19, %v1710_v29  ;;  %v1736_v61 = vmul.f32 %v5626_v48, %v1710_v29  ;;  %v1746_v59 = vmul.f32 %v5631_v13, %v1710_v29  ;;  %v1765_v49 = vpop.permute.xlu2 %1764 }
 0x230   :  { %v5646_v23 = vadd.f32 %v1716_v0, %v1652_v4  ;;  %v5648_v55 = vadd.f32 %v1726_v34, %v1662_v18  ;;  %v5650_v12 = vadd.f32 %v1736_v61, %v1672_v62  ;;  %v5652_v11 = vadd.f32 %v1746_v59, %v1682_v47 }
 0x232   :  { %2103 = vrot.lane.b32.xlu1 %v5539_v60, %s3182_s22 }
 0x233   :  { %2101 = vrot.lane.b32.xlu0 %v5521_v14, %s3182_s22 }
 0x234   :  { %v1699_v31 = vpop.permute.xlu1 %1698  ;;  %2153 = vrot.lane.b32.xlu2 %v5497_v44, %s3183_s23 }
 0x235   :  { %v1709_v2 = vsel %vm34_vm0, %v1687_v5, %v1699_v31  ;;  %v1697_v16 = vpop.permute.xlu0 %1696 }
 0x236   :  { %v1715_v25 = vmul.f32 %v5614_v40, %v1709_v2  ;;  %v1725_v54 = vmul.f32 %v5621_v19, %v1709_v2  ;;  %v1735_v43 = vmul.f32 %v5626_v48, %v1709_v2  ;;  %v1745_v50 = vmul.f32 %v5631_v13, %v1709_v2  ;;  %v1771_v38 = vpop.permute.xlu2 %1770 }
 0x237   :  { %v1708_v56 = vsel %vm34_vm0, %v5462_v20, %v1697_v16 }
 0x238   :  { %v5668_v45 = vadd.f32 %v1715_v25, %v5541_v7  ;;  %v5671_v9 = vadd.f32 %v1725_v54, %v5543_v24  ;;  %v5674_v46 = vadd.f32 %v1735_v43, %v5545_v3  ;;  %v5677_v41 = vadd.f32 %v1745_v50, %v5547_v28  ;;  %v5686_v7 = vld [vmem:[%s6681_s0 + $0x1a] ss:$0 sm:$0xff]  ;;  %v5693_v24 = vld [vmem:[%s6681_s0 + $0x42] ss:$0 sm:$0xff]  ;;  %v5698_v3 = vld [vmem:[%s6681_s0 + $0x6a] ss:$0 sm:$0xff] }
 0x239   :  { %v1714_v10 = vmul.f32 %v5614_v40, %v1708_v56  ;;  %v1724_v42 = vmul.f32 %v5621_v19, %v1708_v56  ;;  %v1734_v58 = vmul.f32 %v5626_v48, %v1708_v56  ;;  %v1744_v20 = vmul.f32 %v5631_v13, %v1708_v56  ;;  %v5703_v28 = vld [vmem:[%s6681_s0 + $0x92] ss:$0 sm:$0xff]  ;;  %v5765_v56 = vld [vmem:[%s6681_s0 + $0x1b] ss:$0 sm:$0xff] }
 0x23a   :  { %2157 = vrot.lane.b32.xlu1 %v5521_v14, %s3183_s23 }
 0x23b   :  { %v1718_v6 = vadd.f32 %v1714_v10, %v5567_v33  ;;  %v1728_v22 = vadd.f32 %v1724_v42, %v5569_v57  ;;  %v1738_v17 = vadd.f32 %v1734_v58, %v5571_v35  ;;  %v1748_v39 = vadd.f32 %v1744_v20, %v5573_v53  ;;  %2155 = vrot.lane.b32.xlu0 %v5530_v30, %s3183_s23  ;;  %v5770_v10 = vld [vmem:[%s6681_s0 + $0x43] ss:$0 sm:$0xff]  ;;  %v5777_v58 = vld [vmem:[%s6681_s0 + $0x6b] ss:$0 sm:$0xff]  ;;  %v5782_v20 = vld [vmem:[%s6681_s0 + $0x93] ss:$0 sm:$0xff] }
 0x23c   :  { %v1753_v8 = vpop.permute.xlu1 %1752  ;;  %2159 = vrot.lane.b32.xlu2 %v5539_v60, %s3183_s23 }
 0x23d   :  { %v1776_v4 = vsel %vm34_vm0, %v1753_v8, %v1765_v49  ;;  %v1703_v18 = vpop.permute.xlu0 %1702 }
 0x23e   :  { %v1782_v62 = vmul.f32 %v5686_v7, %v1776_v4  ;;  %v1792_v33 = vmul.f32 %v5693_v24, %v1776_v4  ;;  %v1802_v57 = vmul.f32 %v5698_v3, %v1776_v4  ;;  %v1812_v35 = vmul.f32 %v5703_v28, %v1776_v4  ;;  %v1834_v47 = vpop.permute.xlu2 %1833 }
 0x23f   :  { %v1711_v53 = vsel %vm34_vm0, %v5514_v37, %v1703_v18  ;;  %v1843_v42 = vsel %vm34_vm0, %v5274_v63, %v1834_v47 }
 0x240   :  { %v5720_v32 = vadd.f32 %v1782_v62, %v1718_v6  ;;  %v5722_v29 = vadd.f32 %v1792_v33, %v1728_v22  ;;  %v5724_v5 = vadd.f32 %v1802_v57, %v1738_v17  ;;  %v5726_v0 = vadd.f32 %v1812_v35, %v1748_v39  ;;  %v5787_v6 = vld [vmem:[%s6680_s2 + $0x52] sm:$0xff] }
 0x241   :  { %v1717_v34 = vmul.f32 %v5614_v40, %v1711_v53  ;;  %v1727_v61 = vmul.f32 %v5621_v19, %v1711_v53  ;;  %v1737_v59 = vmul.f32 %v5626_v48, %v1711_v53  ;;  %v1747_v49 = vmul.f32 %v5631_v13, %v1711_v53 }
 0x242   :  { %2167 = vrot.lane.b32.xlu1 %v5530_v30, %s3184_s24  ;;  %v1849_v22 = vmul.f32 %v5765_v56, %v1843_v42  ;;  %v1859_v39 = vmul.f32 %v5770_v10, %v1843_v42  ;;  %v1869_v8 = vmul.f32 %v5777_v58, %v1843_v42  ;;  %v1879_v4 = vmul.f32 %v5782_v20, %v1843_v42 }
 0x243   :  { %v1721_v37 = vadd.f32 %v1717_v34, %v5599_v51  ;;  %v1731_v31 = vadd.f32 %v1727_v61, %v5601_v1  ;;  %v1741_v2 = vadd.f32 %v1737_v59, %v5603_v26  ;;  %v1751_v16 = vadd.f32 %v1747_v49, %v5605_v52  ;;  %2165 = vrot.lane.b32.xlu0 %v5497_v44, %s3184_s24  ;;  %v5752_v52 = vld [vmem:[%s6680_s2 + $0x4a] sm:$0xff]  ;;  %v5809_v34 = vld [vmem:[%s6680_s2 + $0xb2] sm:$0xff] }
 0x244   :  { %v1759_v40 = vpop.permute.xlu1 %1758  ;;  %2169 = vrot.lane.b32.xlu2 %v5521_v14, %s3184_s24 }
 0x245   :  { %v1779_v19 = vsel %vm34_vm0, %v1759_v40, %v1771_v38  ;;  %v1757_v48 = vpop.permute.xlu0 %1756 }
 0x246   :  { %v1785_v13 = vmul.f32 %v5686_v7, %v1779_v19  ;;  %v1795_v51 = vmul.f32 %v5693_v24, %v1779_v19  ;;  %v1805_v1 = vmul.f32 %v5698_v3, %v1779_v19  ;;  %v1815_v26 = vmul.f32 %v5703_v28, %v1779_v19  ;;  %v5747_v25 = vpop.permute.xlu2 %1887 }
 0x248   :  { %v5754_v54 = vadd.f32 %v1785_v13, %v1721_v37  ;;  %v5756_v43 = vadd.f32 %v1795_v51, %v1731_v31  ;;  %v5758_v50 = vadd.f32 %v1805_v1, %v1741_v2  ;;  %v5760_v38 = vadd.f32 %v1815_v26, %v1751_v16  ;;  %v5818_v31 = vld [vmem:[%s6680_s2 + $0xaa] sm:$0xff] }
 0x24a   :  { %2229 = vrot.lane.b32.xlu1 %v5752_v52, %s3180_s16 }
 0x24b   :  { %2171 = vrot.lane.b32.xlu0 %v5539_v60, %s3184_s24 }
 0x24c   :  { %v1769_v63 = vpop.permute.xlu1 %1768  ;;  %2231 = vrot.lane.b32.xlu2 %v5787_v6, %s3180_s16 }
 0x24d   :  { %v1778_v17 = vsel %vm34_vm0, %v1757_v48, %v1769_v63  ;;  %v1767_v18 = vpop.permute.xlu0 %1766 }
 0x24e   :  { %v1784_v62 = vmul.f32 %v5686_v7, %v1778_v17  ;;  %v1794_v33 = vmul.f32 %v5693_v24, %v1778_v17  ;;  %v1804_v57 = vmul.f32 %v5698_v3, %v1778_v17  ;;  %v1814_v35 = vmul.f32 %v5703_v28, %v1778_v17  ;;  %v1898_v47 = vpop.permute.xlu2 %1897 }
 0x24f   :  { %v1777_v53 = vsel %vm34_vm0, %v5595_v36, %v1767_v18  ;;  %v5877_v18 = vld [vmem:[%s6681_s0 + $0x6c] ss:$0 sm:$0xff] }
 0x250   :  { %v1788_v61 = vadd.f32 %v1784_v62, %v5646_v23  ;;  %v1798_v59 = vadd.f32 %v1794_v33, %v5648_v55  ;;  %v1808_v49 = vadd.f32 %v1804_v57, %v5650_v12  ;;  %v1818_v37 = vadd.f32 %v1814_v35, %v5652_v11  ;;  %v5882_v62 = vld [vmem:[%s6681_s0 + $0x94] ss:$0 sm:$0xff] }
 0x251   :  { %v1783_v36 = vmul.f32 %v5686_v7, %v1777_v53  ;;  %v1793_v2 = vmul.f32 %v5693_v24, %v1777_v53  ;;  %v1803_v16 = vmul.f32 %v5698_v3, %v1777_v53  ;;  %v1813_v40 = vmul.f32 %v5703_v28, %v1777_v53 }
 0x252   :  { %v5824_v23 = vadd.f32 %v1849_v22, %v1788_v61  ;;  %v5826_v55 = vadd.f32 %v1859_v39, %v1798_v59  ;;  %v5828_v12 = vadd.f32 %v1869_v8, %v1808_v49  ;;  %v5830_v11 = vadd.f32 %v1879_v4, %v1818_v37  ;;  %2235 = vrot.lane.b32.xlu1 %v5809_v34, %s3180_s16  ;;  %v5872_v4 = vld [vmem:[%s6681_s0 + $0x44] ss:$0 sm:$0xff] }
 0x253   :  { %v1787_v19 = vadd.f32 %v1783_v36, %v5668_v45  ;;  %v1797_v7 = vadd.f32 %v1793_v2, %v5671_v9  ;;  %v1807_v24 = vadd.f32 %v1803_v16, %v5674_v46  ;;  %v1817_v3 = vadd.f32 %v1813_v40, %v5677_v41  ;;  %2233 = vrot.lane.b32.xlu0 %v5818_v31, %s3180_s16 }
 0x254   :  { %v1832_v28 = vpop.permute.xlu1 %1831  ;;  %2285 = vrot.lane.b32.xlu2 %v5752_v52, %s3181_s17 }
 0x255   :  { %v1842_v48 = vsel %vm34_vm0, %v5258_v15, %v1832_v28  ;;  %v1830_v13 = vpop.permute.xlu0 %1829 }
 0x256   :  { %v1848_v51 = vmul.f32 %v5765_v56, %v1842_v48  ;;  %v1858_v45 = vmul.f32 %v5770_v10, %v1842_v48  ;;  %v1868_v9 = vmul.f32 %v5777_v58, %v1842_v48  ;;  %v1878_v46 = vmul.f32 %v5782_v20, %v1842_v48  ;;  %v1904_v41 = vpop.permute.xlu2 %1903 }
 0x257   :  { %v1841_v1 = vsel %vm34_vm0, %v5267_v27, %v1830_v13  ;;  %v5865_v27 = vld [vmem:[%s6681_s0 + $0x1c] ss:$0 sm:$0xff] }
 0x258   :  { %v5850_v26 = vadd.f32 %v1848_v51, %v1787_v19  ;;  %v5852_v42 = vadd.f32 %v1858_v45, %v1797_v7  ;;  %v5854_v63 = vadd.f32 %v1868_v9, %v1807_v24  ;;  %v5856_v15 = vadd.f32 %v1878_v46, %v1817_v3 }
 0x259   :  { %v1847_v22 = vmul.f32 %v5765_v56, %v1841_v1  ;;  %v1857_v17 = vmul.f32 %v5770_v10, %v1841_v1  ;;  %v1867_v39 = vmul.f32 %v5777_v58, %v1841_v1  ;;  %v1877_v8 = vmul.f32 %v5782_v20, %v1841_v1 }
 0x25a   :  { %2289 = vrot.lane.b32.xlu1 %v5818_v31, %s3181_s17 }
 0x25b   :  { %v1851_v33 = vadd.f32 %v1847_v22, %v5720_v32  ;;  %v1861_v57 = vadd.f32 %v1857_v17, %v5722_v29  ;;  %v1871_v35 = vadd.f32 %v1867_v39, %v5724_v5  ;;  %v1881_v53 = vadd.f32 %v1877_v8, %v5726_v0  ;;  %2287 = vrot.lane.b32.xlu0 %v5787_v6, %s3181_s17 }
 0x25c   :  { %v1886_v61 = vpop.permute.xlu1 %1885  ;;  %2291 = vrot.lane.b32.xlu2 %v5809_v34, %s3181_s17 }
 0x25d   :  { %v1909_v59 = vsel %vm34_vm0, %v1886_v61, %v1898_v47  ;;  %v1836_v49 = vpop.permute.xlu0 %1835 }
 0x25e   :  { %v1915_v37 = vmul.f32 %v5865_v27, %v1909_v59  ;;  %v1925_v32 = vmul.f32 %v5872_v4, %v1909_v59  ;;  %v1935_v29 = vmul.f32 %v5877_v18, %v1909_v59  ;;  %v1945_v5 = vmul.f32 %v5882_v62, %v1909_v59  ;;  %v5897_v36 = vpop.permute.xlu2 %1957 }
 0x25f   :  { %v1844_v0 = vsel %vm34_vm0, %v5308_v21, %v1836_v49 }
 0x260   :  { %v5901_v2 = vadd.f32 %v1915_v37, %v1851_v33  ;;  %v5903_v16 = vadd.f32 %v1925_v32, %v1861_v57  ;;  %v5905_v40 = vadd.f32 %v1935_v29, %v1871_v35  ;;  %v5907_v47 = vadd.f32 %v1945_v5, %v1881_v53 }
 0x261   :  { %v1850_v19 = vmul.f32 %v5765_v56, %v1844_v0  ;;  %v1860_v7 = vmul.f32 %v5770_v10, %v1844_v0  ;;  %v1870_v24 = vmul.f32 %v5777_v58, %v1844_v0  ;;  %v1880_v3 = vmul.f32 %v5782_v20, %v1844_v0 }
 0x262   :  { %2299 = vrot.lane.b32.xlu1 %v5787_v6, %s3182_s22 }
 0x263   :  { %v1854_v21 = vadd.f32 %v1850_v19, %v5754_v54  ;;  %v1864_v28 = vadd.f32 %v1860_v7, %v5756_v43  ;;  %v1874_v48 = vadd.f32 %v1870_v24, %v5758_v50  ;;  %v1884_v13 = vadd.f32 %v1880_v3, %v5760_v38  ;;  %2297 = vrot.lane.b32.xlu0 %v5752_v52, %s3182_s22 }
 0x264   :  { %v1892_v56 = vpop.permute.xlu1 %1891  ;;  %2301 = vrot.lane.b32.xlu2 %v5818_v31, %s3182_s22 }
 0x265   :  { %v1912_v10 = vsel %vm34_vm0, %v1892_v56, %v1904_v41  ;;  %v1890_v58 = vpop.permute.xlu0 %1889  ;;  %v6018_v56 = vld [vmem:[%s6681_s0 + $0x46] ss:$0 sm:$0xff] }
 0x266   :  { %v1918_v20 = vmul.f32 %v5865_v27, %v1912_v10  ;;  %v1928_v54 = vmul.f32 %v5872_v4, %v1912_v10  ;;  %v1938_v43 = vmul.f32 %v5877_v18, %v1912_v10  ;;  %v1948_v50 = vmul.f32 %v5882_v62, %v1912_v10  ;;  %v1968_v51 = vpop.permute.xlu2 %1967  ;;  %v6023_v10 = vld [vmem:[%s6681_s0 + $0x6e] ss:$0 sm:$0xff] }
 0x268   :  { %v5928_v38 = vadd.f32 %v1918_v20, %v1854_v21  ;;  %v5930_v45 = vadd.f32 %v1928_v54, %v1864_v28  ;;  %v5932_v9 = vadd.f32 %v1938_v43, %v1874_v48  ;;  %v5934_v46 = vadd.f32 %v1948_v50, %v1884_v13  ;;  %v6011_v48 = vld [vmem:[%s6681_s0 + $0x1e] ss:$0 sm:$0xff] }
 0x26a   :  { %2353 = vrot.lane.b32.xlu1 %v5752_v52, %s3183_s23 }
 0x26b   :  { %2303 = vrot.lane.b32.xlu0 %v5809_v34, %s3182_s22 }
 0x26c   :  { %v1902_v41 = vpop.permute.xlu1 %1901  ;;  %2355 = vrot.lane.b32.xlu2 %v5787_v6, %s3183_s23 }
 0x26d   :  { %v1911_v1 = vsel %vm34_vm0, %v1890_v58, %v1902_v41  ;;  %v1900_v22 = vpop.permute.xlu0 %1899  ;;  %v6028_v58 = vld [vmem:[%s6681_s0 + $0x96] ss:$0 sm:$0xff] }
 0x26e   :  { %v1917_v17 = vmul.f32 %v5865_v27, %v1911_v1  ;;  %v1927_v39 = vmul.f32 %v5872_v4, %v1911_v1  ;;  %v1937_v8 = vmul.f32 %v5877_v18, %v1911_v1  ;;  %v1947_v33 = vmul.f32 %v5882_v62, %v1911_v1  ;;  %v2030_v57 = vpop.permute.xlu2 %2029 }
 0x26f   :  { %v1910_v35 = vsel %vm34_vm0, %v5747_v25, %v1900_v22  ;;  %v2041_v13 = vsel %vm34_vm0, %v5497_v44, %v2030_v57 }
 0x270   :  { %v5950_v53 = vadd.f32 %v1917_v17, %v5824_v23  ;;  %v5953_v61 = vadd.f32 %v1927_v39, %v5826_v55  ;;  %v5956_v59 = vadd.f32 %v1937_v8, %v5828_v12  ;;  %v5959_v49 = vadd.f32 %v1947_v33, %v5830_v11  ;;  %v5968_v23 = vld [vmem:[%s6681_s0 + $0x1d] ss:$0 sm:$0xff]  ;;  %v5975_v55 = vld [vmem:[%s6681_s0 + $0x45] ss:$0 sm:$0xff]  ;;  %v5980_v12 = vld [vmem:[%s6681_s0 + $0x6d] ss:$0 sm:$0xff] }
 0x271   :  { %v1916_v37 = vmul.f32 %v5865_v27, %v1910_v35  ;;  %v1926_v32 = vmul.f32 %v5872_v4, %v1910_v35  ;;  %v1936_v29 = vmul.f32 %v5877_v18, %v1910_v35  ;;  %v1946_v25 = vmul.f32 %v5882_v62, %v1910_v35  ;;  %v5985_v11 = vld [vmem:[%s6681_s0 + $0x95] ss:$0 sm:$0xff] }
 0x272   :  { %2359 = vrot.lane.b32.xlu1 %v5809_v34, %s3183_s23  ;;  %v2047_v20 = vmul.f32 %v6011_v48, %v2041_v13  ;;  %v2057_v43 = vmul.f32 %v6018_v56, %v2041_v13  ;;  %v2067_v50 = vmul.f32 %v6023_v10, %v2041_v13 }
 0x273   :  { %v1920_v27 = vadd.f32 %v1916_v37, %v5850_v26  ;;  %v1930_v4 = vadd.f32 %v1926_v32, %v5852_v42  ;;  %v1940_v18 = vadd.f32 %v1936_v29, %v5854_v63  ;;  %v1950_v62 = vadd.f32 %v1946_v25, %v5856_v15  ;;  %2357 = vrot.lane.b32.xlu0 %v5818_v31, %s3183_s23 }
 0x274   :  { %v1956_v5 = vpop.permute.xlu1 %1955  ;;  %2365 = vrot.lane.b32.xlu2 %v5752_v52, %s3184_s24 }
 0x275   :  { %v1978_v0 = vsel %vm34_vm0, %v1956_v5, %v1968_v51  ;;  %v1954_v19 = vpop.permute.xlu0 %1953  ;;  %v2077_v51 = vmul.f32 %v6028_v58, %v2041_v13 }
 0x276   :  { %v1984_v7 = vmul.f32 %v5968_v23, %v1978_v0  ;;  %v1994_v26 = vmul.f32 %v5975_v55, %v1978_v0  ;;  %v2004_v42 = vmul.f32 %v5980_v12, %v1978_v0  ;;  %v2014_v63 = vmul.f32 %v5985_v11, %v1978_v0  ;;  %v2036_v24 = vpop.permute.xlu2 %2035 }
 0x277   :  { %v2044_v32 = vsel %vm34_vm0, %v5539_v60, %v2036_v24 }
 0x278   :  { %v6000_v15 = vadd.f32 %v1984_v7, %v1920_v27  ;;  %v6002_v3 = vadd.f32 %v1994_v26, %v1930_v4  ;;  %v6004_v21 = vadd.f32 %v2004_v42, %v1940_v18  ;;  %v6006_v28 = vadd.f32 %v2014_v63, %v1950_v62 }
 0x279   :  { %v2080_v62 = vmul.f32 %v6028_v58, %v2044_v32 }
 0x27a   :  { %2369 = vrot.lane.b32.xlu1 %v5818_v31, %s3184_s24 }
 0x27b   :  { %2367 = vrot.lane.b32.xlu0 %v5787_v6, %s3184_s24 }
 0x27c   :  { %v1966_v44 = vpop.permute.xlu1 %1965  ;;  %2371 = vrot.lane.b32.xlu2 %v5809_v34, %s3184_s24 }
 0x27d   :  { %v1977_v54 = vsel %vm34_vm0, %v1954_v19, %v1966_v44  ;;  %v1960_v41 = vpop.permute.xlu0 %1959 }
 0x27e   :  { %v1983_v1 = vmul.f32 %v5968_v23, %v1977_v54  ;;  %v1993_v22 = vmul.f32 %v5975_v55, %v1977_v54  ;;  %v2003_v17 = vmul.f32 %v5980_v12, %v1977_v54  ;;  %v2013_v39 = vmul.f32 %v5985_v11, %v1977_v54  ;;  %v6045_v8 = vpop.permute.xlu2 %2089 }
 0x280   :  { %v1987_v33 = vadd.f32 %v1983_v1, %v5901_v2  ;;  %v1997_v57 = vadd.f32 %v1993_v22, %v5903_v16  ;;  %v2007_v35 = vadd.f32 %v2003_v17, %v5905_v40  ;;  %v2017_v37 = vadd.f32 %v2013_v39, %v5907_v47 }
 0x281   :  { %v2050_v2 = vmul.f32 %v6011_v48, %v2044_v32  ;;  %v2060_v40 = vmul.f32 %v6018_v56, %v2044_v32  ;;  %v2070_v47 = vmul.f32 %v6023_v10, %v2044_v32 }
 0x282   :  { %v6053_v29 = vadd.f32 %v2047_v20, %v1987_v33  ;;  %v6055_v25 = vadd.f32 %v2057_v43, %v1997_v57  ;;  %v6057_v27 = vadd.f32 %v2067_v50, %v2007_v35  ;;  %v6059_v4 = vadd.f32 %v2077_v51, %v2017_v37 }
 0x284   :  { %v1972_v18 = vpop.permute.xlu1 %1971 }
 0x285   :  { %v1980_v16 = vsel %vm34_vm0, %v1960_v41, %v1972_v18  ;;  %v1970_v60 = vpop.permute.xlu0 %1969  ;;  %v6109_v18 = vld [vmem:[%s6681_s0 + $0x1f] ss:$0 sm:$0xff] }
 0x286   :  { %v1986_v5 = vmul.f32 %v5968_v23, %v1980_v16  ;;  %v1996_v0 = vmul.f32 %v5975_v55, %v1980_v16  ;;  %v2006_v19 = vmul.f32 %v5980_v12, %v1980_v16  ;;  %v2016_v7 = vmul.f32 %v5985_v11, %v1980_v16  ;;  %v2100_v26 = vpop.permute.xlu2 %2099 }
 0x287   :  { %v1979_v42 = vsel %vm34_vm0, %v5897_v36, %v1970_v60 }
 0x288   :  { %v1990_v63 = vadd.f32 %v1986_v5, %v5928_v38  ;;  %v2000_v24 = vadd.f32 %v1996_v0, %v5930_v45  ;;  %v2010_v13 = vadd.f32 %v2006_v19, %v5932_v9  ;;  %v2020_v44 = vadd.f32 %v2016_v7, %v5934_v46 }
 0x289   :  { %v1985_v20 = vmul.f32 %v5968_v23, %v1979_v42  ;;  %v1995_v54 = vmul.f32 %v5975_v55, %v1979_v42  ;;  %v2005_v43 = vmul.f32 %v5980_v12, %v1979_v42  ;;  %v2015_v50 = vmul.f32 %v5985_v11, %v1979_v42 }
 0x28a   :  { %v6080_v51 = vadd.f32 %v2050_v2, %v1990_v63  ;;  %v6082_v41 = vadd.f32 %v2060_v40, %v2000_v24  ;;  %v6084_v36 = vadd.f32 %v2070_v47, %v2010_v13  ;;  %v6086_v38 = vadd.f32 %v2080_v62, %v2020_v44 }
 0x28b   :  { %v1989_v45 = vadd.f32 %v1985_v20, %v5950_v53  ;;  %v1999_v9 = vadd.f32 %v1995_v54, %v5953_v61  ;;  %v2009_v46 = vadd.f32 %v2005_v43, %v5956_v59  ;;  %v2019_v23 = vadd.f32 %v2015_v50, %v5959_v49 }
 0x28c   :  { %v2034_v55 = vpop.permute.xlu1 %2033 }
 0x28d   :  { %v2043_v12 = vsel %vm34_vm0, %v5521_v14, %v2034_v55  ;;  %v2032_v11 = vpop.permute.xlu0 %2031 }
 0x28e   :  { %v2049_v1 = vmul.f32 %v6011_v48, %v2043_v12  ;;  %v2059_v22 = vmul.f32 %v6018_v56, %v2043_v12  ;;  %v2069_v17 = vmul.f32 %v6023_v10, %v2043_v12  ;;  %v2079_v39 = vmul.f32 %v6028_v58, %v2043_v12  ;;  %v6098_v53 = vpop.permute.xlu2 %2153 }
 0x28f   :  { %v2042_v61 = vsel %vm34_vm0, %v5530_v30, %v2032_v11  ;;  %v6114_v30 = vld [vmem:[%s6681_s0 + $0x47] ss:$0 sm:$0xff] }
 0x290   :  { %v2053_v59 = vadd.f32 %v2049_v1, %v1989_v45  ;;  %v2063_v49 = vadd.f32 %v2059_v22, %v1999_v9  ;;  %v2073_v33 = vadd.f32 %v2069_v17, %v2009_v46  ;;  %v2083_v57 = vadd.f32 %v2079_v39, %v2019_v23  ;;  %v6148_v9 = vld [vmem:[%s6681_s0 + $0x20] ss:$0 sm:$0xff]  ;;  %v6153_v46 = vld [vmem:[%s6681_s0 + $0x48] ss:$0 sm:$0xff]  ;;  %v6163_v23 = vld [vmem:[%s6681_s0 + $0x98] ss:$0 sm:$0xff] }
 0x291   :  { %v2048_v14 = vmul.f32 %v6011_v48, %v2042_v61  ;;  %v2058_v35 = vmul.f32 %v6018_v56, %v2042_v61  ;;  %v2068_v37 = vmul.f32 %v6023_v10, %v2042_v61  ;;  %v2078_v32 = vmul.f32 %v6028_v58, %v2042_v61  ;;  %v6119_v48 = vld [vmem:[%s6681_s0 + $0x6f] ss:$0 sm:$0xff]  ;;  %v6124_v56 = vld [vmem:[%s6681_s0 + $0x97] ss:$0 sm:$0xff] }
 0x293   :  { %v2052_v10 = vadd.f32 %v2048_v14, %v6000_v15  ;;  %v2062_v58 = vadd.f32 %v2058_v35, %v6002_v3  ;;  %v2072_v2 = vadd.f32 %v2068_v37, %v6004_v21  ;;  %v2082_v16 = vadd.f32 %v2078_v32, %v6006_v28 }
 0x294   :  { %v2088_v40 = vpop.permute.xlu1 %2087 }
 0x295   :  { %v2110_v47 = vsel %vm34_vm0, %v2088_v40, %v2100_v26  ;;  %v6131_v62 = vpop.permute.xlu0 %2085  ;;  %v6200_v40 = vld [vmem:[%s6681_s0 + $0x99] ss:$0 sm:$0xff] }
 0x296   :  { %v2116_v60 = vmul.f32 %v6109_v18, %v2110_v47  ;;  %v2126_v5 = vmul.f32 %v6114_v30, %v2110_v47  ;;  %v2136_v0 = vmul.f32 %v6119_v48, %v2110_v47  ;;  %v2146_v19 = vmul.f32 %v6124_v56, %v2110_v47  ;;  %v6137_v15 = vpop.permute.xlu2 %2159 }
 0x298   :  { %v2120_v3 = vadd.f32 %v2116_v60, %v2052_v10  ;;  %v2130_v7 = vadd.f32 %v2126_v5, %v2062_v58  ;;  %v2140_v21 = vadd.f32 %v2136_v0, %v2072_v2  ;;  %v2150_v42 = vadd.f32 %v2146_v19, %v2082_v16  ;;  %v6190_v2 = vld [vmem:[%s6681_s0 + $0x49] ss:$0 sm:$0xff]  ;;  %v6195_v16 = vld [vmem:[%s6681_s0 + $0x71] ss:$0 sm:$0xff] }
 0x29c   :  { %v2098_v28 = vpop.permute.xlu1 %2097 }
 0x29d   :  { %v2092_v63 = vpop.permute.xlu0 %2091 }
 0x29e   :  { %v2170_v24 = vpop.permute.xlu2 %2169 }
 0x2a4   :  { %v2104_v26 = vpop.permute.xlu1 %2103 }
 0x2a5   :  { %v2102_v13 = vpop.permute.xlu0 %2101 }
 0x2a6   :  { %v2232_v44 = vpop.permute.xlu2 %2231  ;;  %v2111_v20 = vsel %vm34_vm0, %v6045_v8, %v2102_v13  ;;  %v6158_v8 = vld [vmem:[%s6681_s0 + $0x70] ss:$0 sm:$0xff] }
 0x2a7   :  { %v2117_v54 = vmul.f32 %v6109_v18, %v2111_v20  ;;  %v2127_v43 = vmul.f32 %v6114_v30, %v2111_v20  ;;  %v2137_v50 = vmul.f32 %v6119_v48, %v2111_v20  ;;  %v2147_v45 = vmul.f32 %v6124_v56, %v2111_v20 }
 0x2a8   :  { %v2242_v58 = vsel %vm34_vm0, %v5787_v6, %v2232_v44 }
 0x2a9   :  { %v2121_v55 = vadd.f32 %v2117_v54, %v2053_v59  ;;  %v2131_v12 = vadd.f32 %v2127_v43, %v2063_v49  ;;  %v2141_v11 = vadd.f32 %v2137_v50, %v2073_v33  ;;  %v2151_v1 = vadd.f32 %v2147_v45, %v2083_v57  ;;  %v6181_v33 = vld [vmem:[%s6681_s0 + $0x21] ss:$0 sm:$0xff] }
 0x2aa   :  { %v2248_v60 = vmul.f32 %v6181_v33, %v2242_v58  ;;  %v2258_v5 = vmul.f32 %v6190_v2, %v2242_v58  ;;  %v2268_v0 = vmul.f32 %v6195_v16, %v2242_v58  ;;  %v2278_v19 = vmul.f32 %v6200_v40, %v2242_v58 }
 0x2ac   :  { %v2158_v22 = vpop.permute.xlu1 %2157 }
 0x2ad   :  { %v2179_v17 = vsel %vm34_vm0, %v2158_v22, %v2170_v24  ;;  %v2156_v39 = vpop.permute.xlu0 %2155 }
 0x2ae   :  { %v2185_v61 = vmul.f32 %v6148_v9, %v2179_v17  ;;  %v2195_v14 = vmul.f32 %v6153_v46, %v2179_v17  ;;  %v2205_v35 = vmul.f32 %v6158_v8, %v2179_v17  ;;  %v2215_v37 = vmul.f32 %v6163_v23, %v2179_v17  ;;  %v6183_v57 = vpop.permute.xlu2 %2285 }
 0x2b0   :  { %v6170_v32 = vadd.f32 %v2185_v61, %v2121_v55  ;;  %v6172_v10 = vadd.f32 %v2195_v14, %v2131_v12  ;;  %v6174_v59 = vadd.f32 %v2205_v35, %v2141_v11  ;;  %v6176_v49 = vadd.f32 %v2215_v37, %v2151_v1 }
 0x2b4   :  { %v2168_v47 = vpop.permute.xlu1 %2167 }
 0x2b5   :  { %v2178_v6 = vsel %vm34_vm0, %v2156_v39, %v2168_v47  ;;  %v2166_v24 = vpop.permute.xlu0 %2165 }
 0x2b6   :  { %v2184_v13 = vmul.f32 %v6148_v9, %v2178_v6  ;;  %v2194_v44 = vmul.f32 %v6153_v46, %v2178_v6  ;;  %v2204_v20 = vmul.f32 %v6158_v8, %v2178_v6  ;;  %v2214_v54 = vmul.f32 %v6163_v23, %v2178_v6  ;;  %v6219_v17 = vpop.permute.xlu2 %2291 }
 0x2b8   :  { %v2188_v43 = vadd.f32 %v2184_v13, %v2120_v3  ;;  %v2198_v50 = vadd.f32 %v2194_v44, %v2130_v7  ;;  %v2208_v45 = vadd.f32 %v2204_v20, %v2140_v21  ;;  %v2218_v55 = vadd.f32 %v2214_v54, %v2150_v42 }
 0x2b9   :  { %v2109_v3 = vsel %vm34_vm0, %v6131_v62, %v2098_v28  ;;  %v2112_v7 = vsel %vm34_vm0, %v2092_v63, %v2104_v26 }
 0x2ba   :  { %v6211_v12 = vadd.f32 %v2248_v60, %v2188_v43  ;;  %v6213_v11 = vadd.f32 %v2258_v5, %v2198_v50  ;;  %v6215_v1 = vadd.f32 %v2268_v0, %v2208_v45  ;;  %v6217_v22 = vadd.f32 %v2278_v19, %v2218_v55 }
 0x2bb   :  { %v2115_v42 = vmul.f32 %v6109_v18, %v2109_v3  ;;  %v2125_v47 = vmul.f32 %v6114_v30, %v2109_v3  ;;  %v2135_v60 = vmul.f32 %v6119_v48, %v2109_v3  ;;  %v2145_v6 = vmul.f32 %v6124_v56, %v2109_v3 }
 0x2bc   :  { %v2230_v39 = vpop.permute.xlu1 %2229  ;;  %v2177_v5 = vsel %vm34_vm0, %v6098_v53, %v2166_v24  ;;  %v2118_v62 = vmul.f32 %v6109_v18, %v2112_v7  ;;  %v2128_v28 = vmul.f32 %v6114_v30, %v2112_v7  ;;  %v2138_v63 = vmul.f32 %v6119_v48, %v2112_v7 }
 0x2bd   :  { %v2172_v61 = vpop.permute.xlu0 %2171  ;;  %v2148_v26 = vmul.f32 %v6124_v56, %v2112_v7  ;;  %v2183_v19 = vmul.f32 %v6148_v9, %v2177_v5  ;;  %v2193_v13 = vmul.f32 %v6153_v46, %v2177_v5  ;;  %v2203_v44 = vmul.f32 %v6158_v8, %v2177_v5 }
 0x2be   :  { %v6221_v35 = vpop.permute.xlu2 %2301  ;;  %v2241_v20 = vsel %vm34_vm0, %v5752_v52, %v2230_v39  ;;  %v2119_v53 = vadd.f32 %v2115_v42, %v6053_v29  ;;  %v2129_v24 = vadd.f32 %v2125_v47, %v6055_v25  ;;  %v2139_v18 = vadd.f32 %v2135_v60, %v6057_v27 }
 0x2bf   :  { %v2149_v30 = vadd.f32 %v2145_v6, %v6059_v4  ;;  %v2122_v48 = vadd.f32 %v2118_v62, %v6080_v51  ;;  %v2132_v56 = vadd.f32 %v2128_v28, %v6082_v41  ;;  %v2213_v54 = vmul.f32 %v6163_v23, %v2177_v5 }
 0x2c0   :  { %v2180_v43 = vsel %vm34_vm0, %v6137_v15, %v2172_v61  ;;  %v2142_v50 = vadd.f32 %v2138_v63, %v6084_v36  ;;  %v2152_v52 = vadd.f32 %v2148_v26, %v6086_v38  ;;  %v2247_v29 = vmul.f32 %v6181_v33, %v2241_v20  ;;  %v6273_v61 = vld [vmem:[%s6681_s0 + $0x22] ss:$0 sm:$0xff]  ;;  %v6303_v26 = vld [vmem:[%s6681_s0 + $0x23] ss:$0 sm:$0xff] }
 0x2c1   :  { %v2257_v25 = vmul.f32 %v6190_v2, %v2241_v20  ;;  %v2187_v4 = vadd.f32 %v2183_v19, %v2119_v53  ;;  %v2197_v45 = vadd.f32 %v2193_v13, %v2129_v24  ;;  %v2207_v51 = vadd.f32 %v2203_v44, %v2139_v18  ;;  %v6313_v53 = vld [vmem:[%s6681_s0 + $0x73] ss:$0 sm:$0xff]  ;;  %v6318_v24 = vld [vmem:[%s6681_s0 + $0x9b] ss:$0 sm:$0xff] }
 0x2c2   :  { %v2267_v39 = vmul.f32 %v6195_v16, %v2241_v20  ;;  %v2277_v15 = vmul.f32 %v6200_v40, %v2241_v20  ;;  %v2186_v36 = vmul.f32 %v6148_v9, %v2180_v43  ;;  %v2196_v38 = vmul.f32 %v6153_v46, %v2180_v43  ;;  %v6285_v9 = vld [vmem:[%s6681_s0 + $0x72] ss:$0 sm:$0xff]  ;;  %v6290_v46 = vld [vmem:[%s6681_s0 + $0x9a] ss:$0 sm:$0xff]  ;;  %v6308_v20 = vld [vmem:[%s6681_s0 + $0x4b] ss:$0 sm:$0xff] }
 0x2c3   :  { %v2217_v3 = vadd.f32 %v2213_v54, %v2149_v30  ;;  %v2206_v7 = vmul.f32 %v6158_v8, %v2180_v43  ;;  %v2216_v42 = vmul.f32 %v6163_v23, %v2180_v43  ;;  %v2261_v23 = vadd.f32 %v2257_v25, %v2197_v45 }
 0x2c4   :  { %v2236_v14 = vpop.permute.xlu1 %2235  ;;  %v2190_v13 = vadd.f32 %v2186_v36, %v2122_v48  ;;  %v2200_v44 = vadd.f32 %v2196_v38, %v2132_v56  ;;  %v6343_v38 = vld [vmem:[%s6682_s1] ss:$0 sm:$0xff] }
 0x2c5   :  { %v6223_v37 = vpop.permute.xlu0 %2233  ;;  %v2244_v41 = vsel %vm34_vm0, %v5809_v34, %v2236_v14  ;;  %v6280_v34 = vld [vmem:[%s6681_s0 + $0x4a] ss:$0 sm:$0xff]  ;;  %v2251_v14 = vadd.f32 %v2247_v29, %v2187_v4  ;;  %v2281_v19 = vadd.f32 %v2277_v15, %v2217_v3  ;;  %v2210_v18 = vadd.f32 %v2206_v7, %v2142_v50  ;;  %v6329_v50 = vld [vmem:[%s6682_s1] ss:$0 sm:$0xff] }
 0x2c6   :  { %v6238_v0 = vpop.permute.xlu2 %2355  ;;  %v2250_v47 = vmul.f32 %v6181_v33, %v2244_v41  ;;  %v2260_v60 = vmul.f32 %v6190_v2, %v2244_v41  ;;  %v2220_v30 = vadd.f32 %v2216_v42, %v2152_v52  ;;  %v2270_v48 = vmul.f32 %v6195_v16, %v2244_v41  ;;  %v6348_v3 = vld [vmem:[%s6682_s1] ss:$0 sm:$0xff] }
 0x2c7   :  { %v2280_v56 = vmul.f32 %v6200_v40, %v2244_v41  ;;  %v2243_v29 = vsel %vm34_vm0, %v5818_v31, %v6223_v37  ;;  %v6338_v37 = vld [vmem:[%s6682_s1] ss:$0 sm:$0xff] }
 0x2c8   :  { %v2254_v54 = vadd.f32 %v2250_v47, %v2190_v13  ;;  %v2264_v43 = vadd.f32 %v2260_v60, %v2200_v44  ;;  %v2274_v7 = vadd.f32 %v2270_v48, %v2210_v18  ;;  %v2279_v18 = vmul.f32 %v6200_v40, %v2243_v29 }
 0x2c9   :  { %v2284_v42 = vadd.f32 %v2280_v56, %v2220_v30 }
 0x2cc   :  { %v6228_v21 = vpop.permute.xlu1 %2289 }
 0x2cd   :  { %v6231_v58 = vpop.permute.xlu0 %2287 }
 0x2ce   :  { %v2366_v6 = vpop.permute.xlu2 %2365 }
 0x2d4   :  { %v6262_v27 = vpop.permute.xlu1 %2299 }
 0x2d5   :  { %v2298_v55 = vpop.permute.xlu0 %2297 }
 0x2d6   :  { %v2309_v8 = vsel %vm34_vm0, %v6183_v57, %v2298_v55  ;;  %v2271_v57 = vadd.f32 %v2267_v39, %v2207_v51  ;;  %v2372_v13 = vpop.permute.xlu2 %2371 }
 0x2d7   :  { %v2315_v5 = vmul.f32 %v6273_v61, %v2309_v8  ;;  %v2325_v62 = vmul.f32 %v6280_v34, %v2309_v8  ;;  %v2335_v28 = vmul.f32 %v6285_v9, %v2309_v8  ;;  %v2345_v63 = vmul.f32 %v6290_v46, %v2309_v8 }
 0x2d8   :  { %v2249_v8 = vmul.f32 %v6181_v33, %v2243_v29 }
 0x2d9   :  { %v2319_v25 = vadd.f32 %v2315_v5, %v2251_v14  ;;  %v2329_v45 = vadd.f32 %v2325_v62, %v2261_v23  ;;  %v2339_v51 = vadd.f32 %v2335_v28, %v2271_v57  ;;  %v2349_v55 = vadd.f32 %v2345_v63, %v2281_v19 }
 0x2da   :  { %v2259_v5 = vmul.f32 %v6190_v2, %v2243_v29  ;;  %v2269_v62 = vmul.f32 %v6195_v16, %v2243_v29  ;;  %v2253_v44 = vadd.f32 %v2249_v8, %v6170_v32  ;;  %v2311_v2 = vsel %vm34_vm0, %v6228_v21, %v6221_v35 }
 0x2db   :  { %v2317_v29 = vmul.f32 %v6273_v61, %v2311_v2 }
 0x2dc   :  { %v2354_v4 = vpop.permute.xlu1 %2353  ;;  %v2263_v21 = vadd.f32 %v2259_v5, %v6172_v10  ;;  %v2273_v8 = vadd.f32 %v2269_v62, %v6174_v59 }
 0x2dd   :  { %v2377_v39 = vsel %vm34_vm0, %v2354_v4, %v2366_v6  ;;  %v2304_v52 = vpop.permute.xlu0 %2303  ;;  %v2321_v62 = vadd.f32 %v2317_v29, %v2253_v44 }
 0x2de   :  { %v2383_v41 = vmul.f32 %v6303_v26, %v2377_v39  ;;  %v2393_v15 = vmul.f32 %v6308_v20, %v2377_v39  ;;  %v2403_v36 = vmul.f32 %v6313_v53, %v2377_v39  ;;  %v2413_v31 = vmul.f32 %v6318_v24, %v2377_v39 }
 0x2df   :  { %v2312_v14 = vsel %vm34_vm0, %v6219_v17, %v2304_v52 }
 0x2e0   :  { %v2387_v23 = vadd.f32 %v2383_v41, %v2319_v25  ;;  %v2397_v47 = vadd.f32 %v2393_v15, %v2329_v45  ;;  %v2407_v60 = vadd.f32 %v2403_v36, %v2339_v51  ;;  %v2417_v6 = vadd.f32 %v2413_v31, %v2349_v55 }
 0x2e1   :  { %v2318_v28 = vmul.f32 %v6273_v61, %v2312_v14  ;;  %v2328_v63 = vmul.f32 %v6280_v34, %v2312_v14  ;;  %v2338_v16 = vmul.f32 %v6285_v9, %v2312_v14  ;;  %v2348_v25 = vmul.f32 %v6290_v46, %v2312_v14 }
 0x2e2   :  { %v2425_v57 = vadd.f32 %v6329_v50, %v2387_v23  ;;  %v2513_v19 = vadd.f32 %v6338_v37, %v2397_v47  ;;  %v2602_v33 = vadd.f32 %v6343_v38, %v2407_v60  ;;  %v2691_v17 = vadd.f32 %v6348_v3, %v2417_v6 }
 0x2e3   :  { %v2322_v51 = vadd.f32 %v2318_v28, %v2254_v54  ;;  %v2332_v55 = vadd.f32 %v2328_v63, %v2264_v43  ;;  %v2342_v41 = vadd.f32 %v2338_v16, %v2274_v7  ;;  %v2327_v15 = vmul.f32 %v6280_v34, %v2311_v2 }
 0x2e4   :  { %v2924_v30 = vmul.f32 -1.442695, %v2425_v57  ;;  %v2928_v48 = vmul.f32 -1.442695, %v2513_v19  ;;  %v2936_v56 = vmul.f32 -1.442695, %v2602_v33  ;;  %v2360_v4 = vpop.permute.xlu1 %2359  ;;  %v2310_v36 = vsel %vm34_vm0, %v6231_v58, %v6262_v27 }
 0x2e5   :  { %v2944_v45 = vmul.f32 -1.442695, %v2691_v17  ;;  %v2380_v39 = vsel %vm34_vm0, %v2360_v4, %v2372_v13  ;;  %v2352_v31 = vadd.f32 %v2348_v25, %v2284_v42  ;;  %v2283_v47 = vadd.f32 %v2279_v18, %v6176_v49 }
 0x2e6   :  { %3105 = vpow2.f32 %v2924_v30  ;;  %v2386_v32 = vmul.f32 %v6303_v26, %v2380_v39  ;;  %v2396_v40 = vmul.f32 %v6308_v20, %v2380_v39  ;;  %v2406_v35 = vmul.f32 %v6313_v53, %v2380_v39  ;;  %v2358_v30 = vpop.permute.xlu0 %2357 }
 0x2e7   :  { %3107 = vpow2.f32 %v2928_v48  ;;  %v2416_v52 = vmul.f32 %v6318_v24, %v2380_v39  ;;  %v2337_v7 = vmul.f32 %v6285_v9, %v2311_v2  ;;  %v2347_v60 = vmul.f32 %v6290_v46, %v2311_v2 }
 0x2e8   :  { %3109 = vpow2.f32 %v2936_v56  ;;  %v2390_v54 = vadd.f32 %v2386_v32, %v2322_v51  ;;  %v2400_v43 = vadd.f32 %v2396_v40, %v2332_v55  ;;  %v2410_v10 = vadd.f32 %v2406_v35, %v2342_v41 }
 0x2e9   :  { %3111 = vpow2.f32 %v2944_v45  ;;  %v2420_v6 = vadd.f32 %v2416_v52, %v2352_v31  ;;  %v2316_v28 = vmul.f32 %v6273_v61, %v2310_v36  ;;  %v2326_v58 = vmul.f32 %v6280_v34, %v2310_v36 }
 0x2ea   :  { %v2428_v14 = vadd.f32 %v6329_v50, %v2390_v54  ;;  %v2516_v23 = vadd.f32 %v6338_v37, %v2400_v43  ;;  %v2336_v27 = vmul.f32 %v6285_v9, %v2310_v36  ;;  %v6388_v63 = vadd.f32 %v2327_v15, %v2263_v21 }
 0x2eb   :  { %v2346_v57 = vmul.f32 %v6290_v46, %v2310_v36  ;;  %v2605_v61 = vadd.f32 %v6343_v38, %v2410_v10  ;;  %v6396_v18 = vadd.f32 %v2337_v7, %v2273_v8  ;;  %v6398_v9 = vadd.f32 %v2347_v60, %v2283_v47 }
 0x2ec   :  { %v3106_v5 = vpop.eup %3105  ;;  %v2927_v59 = vmul.f32 -1.442695, %v2428_v14  ;;  %v2931_v17 = vmul.f32 -1.442695, %v2516_v23  ;;  %v2370_v13 = vpop.permute.xlu1 %2369  ;;  %v2694_v44 = vadd.f32 %v6348_v3, %v2420_v6  ;;  %v6403_v46 = vadd.f32 %v2316_v28, %v6211_v12 }
 0x2ed   :  { %v3108_v42 = vpop.eup %3107  ;;  %v6391_v49 = vadd.f32 1.0, %v3106_v5  ;;  %v6406_v2 = vadd.f32 %v2326_v58, %v6213_v11  ;;  %v6409_v16 = vadd.f32 %v2336_v27, %v6215_v1  ;;  %v6418_v4 = vsel %vm34_vm0, %v2358_v30, %v2370_v13 }
 0x2ee   :  { %v3110_v19 = vpop.eup %3109  ;;  %v6393_v33 = vadd.f32 1.0, %v3108_v42  ;;  %3113 = vpow2.f32 %v2927_v59  ;;  %v6421_v12 = vadd.f32 %v2346_v57, %v6217_v22  ;;  %v2939_v1 = vmul.f32 -1.442695, %v2605_v61  ;;  %v2368_v59 = vpop.permute.xlu0 %2367 }
 0x2ef   :  { %v3112_v34 = vpop.eup %3111  ;;  %3115 = vrcp.f32 %v6391_v49  ;;  %v2456_v48 = vand.u32 2147483648, %v6391_v49  ;;  %v6413_v56 = vadd.f32 1.0, %v3110_v19  ;;  %v2454_v11 = vand.u32 2147483647, %v6391_v49 }
 0x2f0   :  { %3117 = vrcp.f32 %v6393_v33  ;;  %v6415_v25 = vadd.f32 1.0, %v3112_v34  ;;  %v2542_v45 = vand.u32 2147483647, %v6393_v33  ;;  %v2544_v51 = vand.u32 2147483648, %v6393_v33 }
 0x2f1   :  { %3119 = vpow2.f32 %v2931_v17  ;;  %v2947_v55 = vmul.f32 -1.442695, %v2694_v44  ;;  %vm2450_vm1 = vweird.f32 %v6391_v49  ;;  %v2385_v22 = vmul.f32 %v6303_v26, %v6418_v4 }
 0x2f2   :  { %3121 = vrcp.f32 %v6413_v56  ;;  %v2395_v32 = vmul.f32 %v6308_v20, %v6418_v4  ;;  %v2457_v35 = vor.u32 1.1754944e-38, %v2456_v48  ;;  %vm2538_vm2 = vweird.f32 %v6393_v33 }
 0x2f3   :  { %3123 = vrcp.f32 %v6415_v25  ;;  %v2633_v21 = vand.u32 2147483648, %v6413_v56  ;;  %vm6438_vm3 = vcmp.eq.f32.partialorder %v2454_v11, 8.507059e+37  ;;  %v2631_v43 = vand.u32 2147483647, %v6413_v56 }
 0x2f4   :  { %v3114_v39 = vpop.eup %3113  ;;  %v2722_v15 = vand.u32 2147483648, %v6415_v25  ;;  %3125 = vpow2.f32 %v2939_v1  ;;  %vm6445_vm4 = vcmp.eq.f32.partialorder %v2542_v45, 8.507059e+37  ;;  %v2545_v8 = vor.u32 1.1754944e-38, %v2544_v51 }
 0x2f5   :  { %v3116_v40 = vpop.eup %3115  ;;  %v6435_v29 = vadd.f32 1.0, %v3114_v39  ;;  %v2720_v10 = vand.u32 2147483647, %v6415_v25  ;;  %vm2627_vm5 = vweird.f32 %v6413_v56  ;;  %v6452_v47 = vadd.f32 %v2385_v22, %v2321_v62 }
 0x2f6   :  { %v3118_v52 = vpop.eup %3117  ;;  %v2446_v41 = vmul.f32 %v3116_v40, %v6391_v49  ;;  %v2634_v6 = vor.u32 1.1754944e-38, %v2633_v21  ;;  %vm2716_vm6 = vweird.f32 %v6415_v25  ;;  %vm2451_vm7 = vweird.f32 %v3116_v40 }
 0x2f7   :  { %v2534_v36 = vmul.f32 %v3118_v52, %v6393_v33  ;;  %3127 = vrcp.f32 %v6435_v29  ;;  %v3120_v14 = vpop.eup %3119  ;;  %vm6458_vm8 = vcmp.eq.f32.partialorder %v2631_v43, 8.507059e+37  ;;  %v2723_v42 = vor.u32 1.1754944e-38, %v2722_v15  ;;  %vm2452_vm12 = vmor %vm2450_vm1, %vm2451_vm7 }
 0x2f8   :  { %v2447_v23 = vsub.f32 1.0, %v2446_v41  ;;  %3129 = vpow2.f32 %v2947_v55  ;;  %v3122_v7 = vpop.eup %3121  ;;  %v6455_v5 = vadd.f32 1.0, %v3120_v14  ;;  %vm2539_vm9 = vweird.f32 %v3118_v52 }
 0x2f9   :  { %v2535_v60 = vsub.f32 1.0, %v2534_v36  ;;  %v3124_v28 = vpop.eup %3123  ;;  %v2623_v27 = vmul.f32 %v3122_v7, %v6413_v56  ;;  %vm6463_vm10 = vcmp.eq.f32.partialorder %v2720_v10, 8.507059e+37  ;;  %v2499_v17 = vand.u32 2147483647, %v6435_v29  ;;  %vm2540_vm13 = vmor %vm2538_vm2, %vm2539_vm9 }
 0x2fa   :  { %v2448_v58 = vmul.f32 %v3116_v40, %v2447_v23  ;;  %v2712_v62 = vmul.f32 %v3124_v28, %v6415_v25  ;;  %v3126_v61 = vpop.eup %3125  ;;  %vm2495_vm11 = vweird.f32 %v6435_v29  ;;  %v2501_v44 = vand.u32 2147483648, %v6435_v29 }
 0x2fb   :  { %v2536_v57 = vmul.f32 %v3118_v52, %v2535_v60  ;;  %v2624_v34 = vsub.f32 1.0, %v2623_v27  ;;  %3131 = vrcp.f32 %v6455_v5  ;;  %v2399_v1 = vadd.f32 %v2395_v32, %v6388_v63 }
 0x2fc   :  { %v2449_v13 = vadd.f32 %v3116_v40, %v2448_v58  ;;  %v2713_v11 = vsub.f32 1.0, %v2712_v62  ;;  %v2405_v45 = vmul.f32 %v6313_v53, %v6418_v4  ;;  %vm2628_vm14 = vweird.f32 %v3122_v7 }
 0x2fd   :  { %v3128_v30 = vpop.eup %3127  ;;  %v2537_v48 = vadd.f32 %v3118_v52, %v2536_v57  ;;  %v2625_v39 = vmul.f32 %v3122_v7, %v2624_v34  ;;  %vm2717_vm15 = vweird.f32 %v3124_v28  ;;  %vm6488_vm1 = vcmp.eq.f32.partialorder %v2499_v17, 8.507059e+37  ;;  %vm2629_vm2 = vmor %vm2627_vm5, %vm2628_vm14 }
 0x2fe   :  { %v3130_v51 = vpop.eup %3129  ;;  %v2453_v55 = vsel %vm2452_vm12, %v3116_v40, %v2449_v13  ;;  %v2491_v22 = vmul.f32 %v3128_v30, %v6435_v29  ;;  %v2714_v41 = vmul.f32 %v3124_v28, %v2713_v11  ;;  %v6498_v54 = vadd.f32 1.0, %v3126_v61 }
 0x2ff   :  { %v2458_v49 = vsel %vm6438_vm3, %v2457_v35, %v2453_v55  ;;  %v2541_v21 = vsel %vm2540_vm13, %v3118_v52, %v2537_v48  ;;  %v2626_v32 = vadd.f32 %v3122_v7, %v2625_v39  ;;  %v2587_v52 = vand.u32 2147483647, %v6455_v5  ;;  %vm2718_vm3 = vmor %vm2716_vm6, %vm2717_vm15 }
 0x300   :  { %2505 = vst [vmem:[%s6683_s3] sm:$0xff] %v2458_v49  ;;  %v2546_v63 = vsel %vm6445_vm4, %v2545_v8, %v2541_v21  ;;  %v2492_v33 = vsub.f32 1.0, %v2491_v22  ;;  %v2715_v35 = vadd.f32 %v3124_v28, %v2714_v41  ;;  %v6500_v43 = vadd.f32 1.0, %v3130_v51 }
 0x301   :  { %2932 = vst [vmem:[%s6683_s3 + $0x20] sm:$0xff] %v2546_v63  ;;  %v3132_v15 = vpop.eup %3131  ;;  %v2630_v36 = vsel %vm2629_vm2, %v3122_v7, %v2626_v32  ;;  %vm2496_vm4 = vweird.f32 %v3128_v30  ;;  %v2589_v8 = vand.u32 2147483648, %v6455_v5  ;;  %v2415_v23 = vmul.f32 %v6318_v24, %v6418_v4 }
 0x302   :  { %v2493_v31 = vmul.f32 %v3128_v30, %v2492_v33  ;;  %v2635_v56 = vsel %vm6458_vm8, %v2634_v6, %v2630_v36  ;;  %v2719_v10 = vsel %vm2718_vm3, %v3124_v28, %v2715_v35  ;;  %v2579_v14 = vmul.f32 %v3132_v15, %v6455_v5  ;;  %vm2497_vm5 = vmor %vm2495_vm11, %vm2496_vm4 }
 0x303   :  { %2940 = vst [vmem:[%s6683_s3 + $0x40] sm:$0xff] %v2635_v56  ;;  %v2724_v25 = vsel %vm6463_vm10, %v2723_v42, %v2719_v10  ;;  %3133 = vrcp.f32 %v6498_v54  ;;  %v2427_v60 = vadd.f32 %v6329_v50, %v6452_v47  ;;  %v2502_v4 = vor.u32 1.1754944e-38, %v2501_v44 }
 0x304   :  { %v2494_v7 = vadd.f32 %v3128_v30, %v2493_v31  ;;  %2948 = vst [vmem:[%s6683_s3 + $0x60] sm:$0xff] %v2724_v25  ;;  %v2580_v6 = vsub.f32 1.0, %v2579_v14  ;;  %3135 = vrcp.f32 %v6500_v43  ;;  %v2409_v28 = vadd.f32 %v2405_v45, %v6396_v18 }
 0x305   :  { %vm2583_vm6 = vweird.f32 %v6455_v5  ;;  %vm6526_vm7 = vcmp.eq.f32.partialorder %v2587_v52, 8.507059e+37  ;;  %v2590_v47 = vor.u32 1.1754944e-38, %v2589_v8  ;;  %vm2584_vm8 = vweird.f32 %v3132_v15 }
 0x306   :  { %v2498_v58 = vsel %vm2497_vm5, %v3128_v30, %v2494_v7  ;;  %v2581_v29 = vmul.f32 %v3132_v15, %v2580_v6  ;;  %v2676_v57 = vand.u32 2147483647, %v6498_v54  ;;  %v2678_v18 = vand.u32 2147483648, %v6498_v54  ;;  %vm2585_vm10 = vmor %vm2583_vm6, %vm2584_vm8 }
 0x307   :  { %v2503_v42 = vsel %vm6488_vm1, %v2502_v4, %v2498_v58  ;;  %v2765_v62 = vand.u32 2147483647, %v6500_v43  ;;  %v2419_v19 = vadd.f32 %v2415_v23, %v6398_v9  ;;  %v2926_v17 = vmul.f32 -1.442695, %v2427_v60 }
 0x308   :  { %2508 = vst [vmem:[%s6683_s3 + $0x18] sm:$0xff] %v2503_v42  ;;  %v2582_v61 = vadd.f32 %v3132_v15, %v2581_v29  ;;  %vm2672_vm9 = vweird.f32 %v6498_v54  ;;  %v2515_v13 = vadd.f32 %v6338_v37, %v2399_v1  ;;  %v2604_v34 = vadd.f32 %v6343_v38, %v2409_v28 }
 0x309   :  { %v2378_v44 = vsel %vm34_vm0, %v6238_v0, %v2368_v59  ;;  %v3134_v30 = vpop.eup %3133  ;;  %3137 = vpow2.f32 %v2926_v17  ;;  %v2693_v48 = vadd.f32 %v6348_v3, %v2419_v19  ;;  %v2767_v55 = vand.u32 2147483648, %v6500_v43 }
 0x30a   :  { %v2384_v9 = vmul.f32 %v6303_v26, %v2378_v44  ;;  %v2394_v11 = vmul.f32 %v6308_v20, %v2378_v44  ;;  %v3136_v45 = vpop.eup %3135  ;;  %v2586_v51 = vsel %vm2585_vm10, %v3132_v15, %v2582_v61  ;;  %v2668_v1 = vmul.f32 %v3134_v30, %v6498_v54 }
 0x30b   :  { %v2930_v39 = vmul.f32 -1.442695, %v2515_v13  ;;  %v2591_v0 = vsel %vm6526_vm7, %v2590_v47, %v2586_v51  ;;  %vm2673_vm0 = vweird.f32 %v3134_v30  ;;  %v2757_v5 = vmul.f32 %v3136_v45, %v6500_v43 }
 0x30c   :  { %v2938_v22 = vmul.f32 -1.442695, %v2604_v34  ;;  %2935 = vst [vmem:[%s6683_s3 + $0x38] sm:$0xff] %v2591_v0  ;;  %v2669_v26 = vsub.f32 1.0, %v2668_v1  ;;  %v2946_v20 = vmul.f32 -1.442695, %v2693_v48  ;;  %v2388_v49 = vadd.f32 %v2384_v9, %v6403_v46  ;;  %vm2674_vm13 = vmor %vm2672_vm9, %vm2673_vm0 }
 0x30d   :  { %3139 = vpow2.f32 %v2930_v39  ;;  %v2758_v21 = vsub.f32 1.0, %v2757_v5  ;;  %v2398_v41 = vadd.f32 %v2394_v11, %v6406_v2  ;;  %v2404_v63 = vmul.f32 %v6313_v53, %v2378_v44 }
 0x30e   :  { %3141 = vpow2.f32 %v2938_v22  ;;  %v2670_v32 = vmul.f32 %v3134_v30, %v2669_v26  ;;  %v2414_v33 = vmul.f32 %v6318_v24, %v2378_v44  ;;  %v2426_v40 = vadd.f32 %v6329_v50, %v2388_v49 }
 0x30f   :  { %3143 = vpow2.f32 %v2946_v20  ;;  %v3138_v35 = vpop.eup %3137  ;;  %v2759_v52 = vmul.f32 %v3136_v45, %v2758_v21  ;;  %vm2761_vm11 = vweird.f32 %v6500_v43  ;;  %vm2762_vm12 = vweird.f32 %v3136_v45 }
 0x310   :  { %v2514_v15 = vadd.f32 %v6338_v37, %v2398_v41  ;;  %v2671_v46 = vadd.f32 %v3134_v30, %v2670_v32  ;;  %v6564_v36 = vadd.f32 1.0, %v3138_v35  ;;  %v2408_v2 = vadd.f32 %v2404_v63, %v6409_v16  ;;  %vm2763_vm1 = vmor %vm2761_vm11, %vm2762_vm12 }
 0x311   :  { %v2925_v31 = vmul.f32 -1.442695, %v2426_v40  ;;  %vm2677_vm14 = vcmp.eq.f32.partialorder %v2676_v57, 8.507059e+37  ;;  %v2679_v53 = vor.u32 1.1754944e-38, %v2678_v18  ;;  %v2760_v24 = vadd.f32 %v3136_v45, %v2759_v52 }
 0x312   :  { %vm2766_vm15 = vcmp.eq.f32.partialorder %v2765_v62, 8.507059e+37  ;;  %v2675_v8 = vsel %vm2674_vm13, %v3134_v30, %v2671_v46  ;;  %v2768_v43 = vor.u32 1.1754944e-38, %v2767_v55  ;;  %3145 = vrcp.f32 %v6564_v36 }
 0x313   :  { %v3140_v50 = vpop.eup %3139  ;;  %v2418_v37 = vadd.f32 %v2414_v33, %v6421_v12  ;;  %v2680_v10 = vsel %vm2677_vm14, %v2679_v53, %v2675_v8  ;;  %v2764_v16 = vsel %vm2763_vm1, %v3136_v45, %v2760_v24  ;;  %v2929_v23 = vmul.f32 -1.442695, %v2514_v15 }
 0x314   :  { %v3142_v56 = vpop.eup %3141  ;;  %v6572_v14 = vadd.f32 1.0, %v3140_v50  ;;  %2943 = vst [vmem:[%s6683_s3 + $0x58] sm:$0xff] %v2680_v10  ;;  %v2769_v25 = vsel %vm2766_vm15, %v2768_v43, %v2764_v16  ;;  %3147 = vpow2.f32 %v2925_v31  ;;  %v2603_v60 = vadd.f32 %v6343_v38, %v2408_v2 }
 0x315   :  { %v3144_v54 = vpop.eup %3143  ;;  %v6577_v7 = vadd.f32 1.0, %v3142_v56  ;;  %2951 = vst [vmem:[%s6683_s3 + $0x78] sm:$0xff] %v2769_v25  ;;  %v2484_v12 = vand.u32 2147483647, %v6564_v36  ;;  %v2486_v4 = vand.u32 2147483648, %v6564_v36  ;;  %v2692_v27 = vadd.f32 %v6348_v3, %v2418_v37 }
 0x316   :  { %3149 = vrcp.f32 %v6572_v14  ;;  %v6587_v6 = vadd.f32 1.0, %v3144_v54  ;;  %v2937_v58 = vmul.f32 -1.442695, %v2603_v60  ;;  %vm2480_vm2 = vweird.f32 %v6564_v36 }
 0x317   :  { %3151 = vrcp.f32 %v6577_v7  ;;  %vm6593_vm3 = vcmp.eq.f32.partialorder %v2484_v12, 8.507059e+37  ;;  %v2572_v42 = vand.u32 2147483647, %v6572_v14  ;;  %v2574_v29 = vand.u32 2147483648, %v6572_v14 }
 0x318   :  { %3153 = vpow2.f32 %v2929_v23  ;;  %v3146_v28 = vpop.eup %3145  ;;  %v2487_v62 = vor.u32 1.1754944e-38, %v2486_v4  ;;  %v2945_v19 = vmul.f32 -1.442695, %v2692_v27  ;;  %vm2568_vm4 = vweird.f32 %v6572_v14 }
 0x319   :  { %v2476_v38 = vmul.f32 %v3146_v28, %v6564_v36  ;;  %3155 = vrcp.f32 %v6587_v6  ;;  %vm2657_vm5 = vweird.f32 %v6577_v7  ;;  %v2661_v13 = vand.u32 2147483647, %v6577_v7 }
 0x31a   :  { %v3148_v47 = vpop.eup %3147  ;;  %3157 = vpow2.f32 %v2937_v58  ;;  %vm2481_vm6 = vweird.f32 %v3146_v28  ;;  %vm6607_vm7 = vcmp.eq.f32.partialorder %v2572_v42, 8.507059e+37  ;;  %v2575_v11 = vor.u32 1.1754944e-38, %v2574_v29 }
 0x31b   :  { %v2477_v18 = vsub.f32 1.0, %v2476_v38  ;;  %v6599_v3 = vadd.f32 1.0, %v3148_v47  ;;  %v2663_v45 = vand.u32 2147483648, %v6577_v7  ;;  %vm2482_vm8 = vmor %vm2480_vm2, %vm2481_vm6  ;;  %v2750_v26 = vand.u32 2147483647, %v6587_v6 }
 0x31c   :  { %v3150_v57 = vpop.eup %3149  ;;  %vm6621_vm0 = vcmp.eq.f32.partialorder %v2661_v13, 8.507059e+37  ;;  %v2752_v52 = vand.u32 2147483648, %v6587_v6  ;;  %vm2746_vm14 = vweird.f32 %v6587_v6 }
 0x31d   :  { %v3152_v17 = vpop.eup %3151  ;;  %v2564_v61 = vmul.f32 %v3150_v57, %v6572_v14  ;;  %v2478_v44 = vmul.f32 %v3146_v28, %v2477_v18  ;;  %3159 = vrcp.f32 %v6599_v3  ;;  %vm2569_vm9 = vweird.f32 %v3150_v57 }
 0x31e   :  { %v3154_v34 = vpop.eup %3153  ;;  %v2653_v30 = vmul.f32 %v3152_v17, %v6577_v7  ;;  %3161 = vpow2.f32 %v2945_v19  ;;  %vm2658_vm10 = vweird.f32 %v3152_v17  ;;  %vm2570_vm11 = vmor %vm2568_vm4, %vm2569_vm9  ;;  %v2664_v35 = vor.u32 1.1754944e-38, %v2663_v45 }
 0x31f   :  { %v2565_v48 = vsub.f32 1.0, %v2564_v61  ;;  %v3156_v51 = vpop.eup %3155  ;;  %v2479_v1 = vadd.f32 %v3146_v28, %v2478_v44  ;;  %v6612_v39 = vadd.f32 1.0, %v3154_v34  ;;  %vm2659_vm12 = vmor %vm2657_vm5, %vm2658_vm10  ;;  %vm6639_vm15 = vcmp.eq.f32.partialorder %v2750_v26, 8.507059e+37 }
 0x320   :  { %v2654_v55 = vsub.f32 1.0, %v2653_v30  ;;  %v3158_v0 = vpop.eup %3157  ;;  %v2742_v22 = vmul.f32 %v3156_v51, %v6587_v6  ;;  %vm2747_vm13 = vweird.f32 %v3156_v51  ;;  %v2753_v10 = vor.u32 1.1754944e-38, %v2752_v52 }
 0x321   :  { %v2566_v5 = vmul.f32 %v3150_v57, %v2565_v48  ;;  %v2483_v20 = vsel %vm2482_vm8, %v3146_v28, %v2479_v1  ;;  %3163 = vrcp.f32 %v6612_v39  ;;  %v6631_v15 = vadd.f32 1.0, %v3158_v0  ;;  %vm2748_vm1 = vmor %vm2746_vm14, %vm2747_vm13 }
 0x322   :  { %v2655_v49 = vmul.f32 %v3152_v17, %v2654_v55  ;;  %v2488_v21 = vsel %vm6593_vm3, %v2487_v62, %v2483_v20  ;;  %v2743_v32 = vsub.f32 1.0, %v2742_v22  ;;  %v2469_v16 = vand.u32 2147483647, %v6599_v3 }
 0x323   :  { %v2567_v41 = vadd.f32 %v3150_v57, %v2566_v5  ;;  %v3160_v33 = vpop.eup %3159  ;;  %2507 = vst [vmem:[%s6683_s3 + $0x10] sm:$0xff] %v2488_v21  ;;  %3165 = vrcp.f32 %v6631_v15  ;;  %v2471_v14 = vand.u32 2147483648, %v6599_v3  ;;  %vm2465_vm3 = vweird.f32 %v6599_v3 }
 0x324   :  { %v2656_v40 = vadd.f32 %v3152_v17, %v2655_v49  ;;  %v2744_v36 = vmul.f32 %v3156_v51, %v2743_v32  ;;  %v2461_v2 = vmul.f32 %v3160_v33, %v6599_v3  ;;  %v3162_v31 = vpop.eup %3161  ;;  %vm2466_vm2 = vweird.f32 %v3160_v33 }
 0x325   :  { %v2571_v46 = vsel %vm2570_vm11, %v3150_v57, %v2567_v41  ;;  %v2708_v23 = vadd.f32 1.0, %v3162_v31  ;;  %vm2467_vm4 = vmor %vm2465_vm3, %vm2466_vm2  ;;  %vm2470_vm5 = vcmp.eq.f32.partialorder %v2469_v16, 8.507059e+37  ;;  %v2472_v6 = vor.u32 1.1754944e-38, %v2471_v14 }
 0x326   :  { %v2576_v53 = vsel %vm6607_vm7, %v2575_v11, %v2571_v46  ;;  %v2660_v24 = vsel %vm2659_vm12, %v3152_v17, %v2656_v40  ;;  %v2745_v43 = vadd.f32 %v3156_v51, %v2744_v36  ;;  %v2462_v37 = vsub.f32 1.0, %v2461_v2 }
 0x327   :  { %2934 = vst [vmem:[%s6683_s3 + $0x30] sm:$0xff] %v2576_v53  ;;  %v2665_v8 = vsel %vm6621_vm0, %v2664_v35, %v2660_v24  ;;  %v3164_v56 = vpop.eup %3163  ;;  %3167 = vrcp.f32 %v2708_v23  ;;  %v2559_v28 = vand.u32 2147483648, %v6612_v39  ;;  %v2557_v47 = vand.u32 2147483647, %v6612_v39 }
 0x328   :  { %2942 = vst [vmem:[%s6683_s3 + $0x50] sm:$0xff] %v2665_v8  ;;  %v2749_v54 = vsel %vm2748_vm1, %v3156_v51, %v2745_v43  ;;  %v2463_v25 = vmul.f32 %v3160_v33, %v2462_v37  ;;  %v2549_v7 = vmul.f32 %v3164_v56, %v6612_v39  ;;  %vm2554_vm6 = vweird.f32 %v3164_v56 }
 0x329   :  { %v2754_v60 = vsel %vm6639_vm15, %v2753_v10, %v2749_v54  ;;  %v3166_v58 = vpop.eup %3165  ;;  %vm2553_vm7 = vweird.f32 %v6612_v39  ;;  %v2560_v18 = vor.u32 1.1754944e-38, %v2559_v28  ;;  %vm2558_vm9 = vcmp.eq.f32.partialorder %v2557_v47, 8.507059e+37 }
 0x32a   :  { %2950 = vst [vmem:[%s6683_s3 + $0x70] sm:$0xff] %v2754_v60  ;;  %v2464_v12 = vadd.f32 %v3160_v33, %v2463_v25  ;;  %v2550_v4 = vsub.f32 1.0, %v2549_v7  ;;  %v2638_v42 = vmul.f32 %v3166_v58, %v6631_v15  ;;  %vm2555_vm8 = vmor %vm2553_vm7, %vm2554_vm6  ;;  %v2648_v19 = vand.u32 2147483648, %v6631_v15 }
 0x32b   :  { %vm2643_vm10 = vweird.f32 %v3166_v58  ;;  %v2646_v34 = vand.u32 2147483647, %v6631_v15  ;;  %vm2642_vm0 = vweird.f32 %v6631_v15  ;;  %v2737_v48 = vand.u32 2147483648, %v2708_v23 }
 0x32c   :  { %v2468_v27 = vsel %vm2467_vm4, %v3160_v33, %v2464_v12  ;;  %v2551_v38 = vmul.f32 %v3164_v56, %v2550_v4  ;;  %v2639_v62 = vsub.f32 1.0, %v2638_v42  ;;  %vm2644_vm11 = vmor %vm2642_vm0, %vm2643_vm10  ;;  %v2649_v9 = vor.u32 1.1754944e-38, %v2648_v19 }
 0x32d   :  { %v2473_v59 = vsel %vm2470_vm5, %v2472_v6, %v2468_v27  ;;  %v3168_v57 = vpop.eup %3167  ;;  %v2735_v45 = vand.u32 2147483647, %v2708_v23  ;;  %vm2647_vm13 = vcmp.eq.f32.partialorder %v2646_v34, 8.507059e+37  ;;  %vm2731_vm14 = vweird.f32 %v2708_v23 }
 0x32e   :  { %2506 = vst [vmem:[%s6683_s3 + $0x8] sm:$0xff] %v2473_v59  ;;  %v2552_v29 = vadd.f32 %v3164_v56, %v2551_v38  ;;  %v2727_v17 = vmul.f32 %v3168_v57, %v2708_v23  ;;  %v2640_v13 = vmul.f32 %v3166_v58, %v2639_v62  ;;  %vm2732_vm12 = vweird.f32 %v3168_v57 }
 0x32f   :  { %vm2733_vm15 = vmor %vm2731_vm14, %vm2732_vm12  ;;  %v2738_v39 = vor.u32 1.1754944e-38, %v2737_v48  ;;  %vm2736_vm1 = vcmp.eq.f32.partialorder %v2735_v45, 8.507059e+37 }
 0x330   :  { %v2556_v3 = vsel %vm2555_vm8, %v3164_v56, %v2552_v29  ;;  %v2728_v44 = vsub.f32 1.0, %v2727_v17  ;;  %v2641_v30 = vadd.f32 %v3166_v58, %v2640_v13 }
 0x331   :  { %v2561_v61 = vsel %vm2558_vm9, %v2560_v18, %v2556_v3 }
 0x332   :  { %2933 = vst [vmem:[%s6683_s3 + $0x28] sm:$0xff] %v2561_v61  ;;  %v2729_v11 = vmul.f32 %v3168_v57, %v2728_v44  ;;  %v2645_v51 = vsel %vm2644_vm11, %v3166_v58, %v2641_v30 }
 0x333   :  { %v2650_v1 = vsel %vm2647_vm13, %v2649_v9, %v2645_v51 }
 0x334   :  { %v2730_v55 = vadd.f32 %v3168_v57, %v2729_v11  ;;  %2941 = vst [vmem:[%s6683_s3 + $0x48] sm:$0xff] %v2650_v1 }
 0x336   :  { %v2734_v0 = vsel %vm2733_vm15, %v3168_v57, %v2730_v55 }
 0x337   :  { %v2739_v5 = vsel %vm2736_vm1, %v2738_v39, %v2734_v0 }
 0x338   :  { %2949 = vst [vmem:[%s6683_s3 + $0x68] sm:$0xff] %v2739_v5 }

</bundles_post_ra>
